<compile_context>
chip_gen: v6e
topology: v6e:2x2x1
jax: 0.10.0
libtpu: 0.0.40
codegen_flags: <defaults>
</compile_context>

<pallas_src>
import functools

import jax
import jax.numpy as jnp
from jax.experimental import pallas as pl
from jax.experimental.pallas import tpu as pltpu


# Architecture constants (hard-coded by the module: fc1 = Linear(7*7*64, 512)).
FC1_K = 7 * 7 * 64          # 3136
FC1_KP = 3200               # 3136 padded up to a multiple of 128 (25 * 128)
FC1_TK = 640                # K tile for the fused fc reduction grid (5 steps)
FC1_H = 512
CONV_CPAD = 128             # lane-dense conv output channels
_VMEM_LIMIT = 48 * 1024 * 1024


def _round_up(x, m):
    return ((x + m - 1) // m) * m


def _choose_tm(m, max_tm=1024):
    """Pick an M tile and the padded M it implies.

    Small M -> one full-extent block (no pad, no post-call slice).
    Large M -> 16-row-aligned tiles (bf16 (16,128) sublane packing)."""
    if m <= max_tm:
        return m, m
    n_tiles = -(-m // max_tm)
    tm = _round_up(-(-m // n_tiles), 16)
    return tm, tm * n_tiles


# ----------------------------------------------------------------------------
# Pallas kernel 1: tiled matmul + bias + ReLU (conv layers via im2col).
# bf16 inputs, f32 accumulate, f32 epilogue, bf16 store.
# ----------------------------------------------------------------------------
def _matmul_bias_kernel(a_ref, w_ref, b_ref, o_ref, *, apply_relu):
    acc = jnp.dot(a_ref[...], w_ref[...], preferred_element_type=jnp.float32)
    acc = acc + b_ref[...]                       # (1, Np) broadcasts over (TM, Np)
    if apply_relu:
        acc = jnp.maximum(acc, 0.0)
    o_ref[...] = acc.astype(o_ref.dtype)


def matmul_bias_relu(a, w, b_row, *, apply_relu, out_dtype=jnp.bfloat16):
    """a: (M, K) bf16, w: (K, Np) bf16, b_row: (1, Np) f32 -> (M, Np) out_dtype."""
    m, k = a.shape
    k2, np_ = w.shape
    assert k == k2, (k, k2)
    tm, mp = _choose_tm(m)
    if mp != m:
        a = jnp.pad(a, ((0, mp - m), (0, 0)))
    out = pl.pallas_call(
        functools.partial(_matmul_bias_kernel, apply_relu=apply_relu),
        out_shape=jax.ShapeDtypeStruct((mp, np_), out_dtype),
        grid=(mp // tm,),
        in_specs=[
            pl.BlockSpec((tm, k), lambda i: (i, 0)),
            pl.BlockSpec((k, np_), lambda i: (0, 0)),
            pl.BlockSpec((1, np_), lambda i: (0, 0)),
        ],
        out_specs=pl.BlockSpec((tm, np_), lambda i: (i, 0)),
        compiler_params=pltpu.CompilerParams(
            dimension_semantics=("parallel",),
            vmem_limit_bytes=_VMEM_LIMIT,
        ),
    )(a, w, b_row)
    return out[:m] if mp != m else out


# ----------------------------------------------------------------------------
# Pallas kernel 2: fused fc1 (+bias, ReLU) -> fc2 (+bias).
# Grid = (M tiles [parallel], K tiles [arbitrary]); the 512-wide hidden
# activation lives only in a (TM, 512) f32 VMEM scratch.  fc2 runs in f32.
# ----------------------------------------------------------------------------
def _fused_fc_kernel(x_ref, w1_ref, b1_ref, w2_ref, b2_ref, q_ref, h_acc):
    k = pl.program_id(1)

    @pl.when(k == 0)
    def _():
        h_acc[...] = jnp.zeros_like(h_acc)

    h_acc[...] += jnp.dot(x_ref[...], w1_ref[...],
                          preferred_element_type=jnp.float32)

    @pl.when(k == pl.num_programs(1) - 1)
    def _():
        h = jnp.maximum(h_acc[...] + b1_ref[...], 0.0)       # f32 epilogue
        q = jnp.dot(h, w2_ref[...], preferred_element_type=jnp.float32)
        q_ref[...] = (q + b2_ref[...]).astype(q_ref.dtype)


def fused_fc(x, w1, b1, w2, b2, *, max_tm=256):
    """x: (M, Kp) bf16, w1: (Kp, H) bf16, b1: (1, H) f32,
       w2: (H, Nap) f32, b2: (1, Nap) f32 -> (M, Nap) f32."""
    m, kp = x.shape
    _, h = w1.shape
    _, nap = w2.shape
    assert kp % FC1_TK == 0, (kp, FC1_TK)
    if m <= max_tm:
        tm, mp = m, m
    else:
        tm = max_tm
        mp = _round_up(m, max_tm)
    if mp != m:
        x = jnp.pad(x, ((0, mp - m), (0, 0)))
    out = pl.pallas_call(
        _fused_fc_kernel,
        out_shape=jax.ShapeDtypeStruct((mp, nap), jnp.float32),
        grid=(mp // tm, kp // FC1_TK),
        in_specs=[
            pl.BlockSpec((tm, FC1_TK), lambda i, k: (i, k)),
            pl.BlockSpec((FC1_TK, h), lambda i, k: (k, 0)),
            pl.BlockSpec((1, h), lambda i, k: (0, 0)),
            pl.BlockSpec((h, nap), lambda i, k: (0, 0)),
            pl.BlockSpec((1, nap), lambda i, k: (0, 0)),
        ],
        out_specs=pl.BlockSpec((tm, nap), lambda i, k: (i, 0)),
        scratch_shapes=[pltpu.VMEM((tm, h), jnp.float32)],
        compiler_params=pltpu.CompilerParams(
            dimension_semantics=("parallel", "arbitrary"),
            vmem_limit_bytes=_VMEM_LIMIT,
        ),
    )(x, w1, b1, w2, b2)
    return out[:m] if mp != m else out


# ----------------------------------------------------------------------------
# Glue: im2col patch extraction in bf16 (static python loop over the window).
# TODO(synk): fold this into the conv kernel (strided pl.ds loads in VMEM).
# ----------------------------------------------------------------------------
def im2col(x_nhwc, kh, kw, stride):
    n, h, w, c = x_nhwc.shape
    ho = (h - kh) // stride + 1
    wo = (w - kw) // stride + 1
    patches = []
    for i in range(kh):
        for j in range(kw):
            p = x_nhwc[:, i:i + stride * ho:stride, j:j + stride * wo:stride, :]
            patches.append(p)                            # (N, Ho, Wo, C)
    cols = jnp.concatenate(patches, axis=-1)             # feature order (kh, kw, C)
    return cols.reshape(n * ho * wo, kh * kw * c), ho, wo


def conv2d_relu(x_nhwc, w_mat, b_row, k, stride):
    """Valid conv + bias + ReLU via bf16 im2col + Pallas MXU matmul.

    x_nhwc carries only the REAL input channels; w_mat is (k*k*C_in, 128) bf16
    (output channels zero-padded to 128 for lane-dense stores)."""
    n = x_nhwc.shape[0]
    cols, ho, wo = im2col(x_nhwc, k, k, stride)
    assert cols.shape[1] == w_mat.shape[0], (cols.shape, w_mat.shape)
    out = matmul_bias_relu(cols, w_mat, b_row, apply_relu=True)
    return out.reshape(n, ho, wo, w_mat.shape[1])


# ----------------------------------------------------------------------------
# Deterministic parameter init (mimics the PyTorch __init__ shapes / inits)
# ----------------------------------------------------------------------------
def init_params(key, action_size):
    ks = jax.random.split(key, 10)

    def u(k, shape, bound):
        return jax.random.uniform(k, shape, jnp.float32, -bound, bound)

    def conv(kw_, kb_, o, c, kh, kwd):
        fan_in = c * kh * kwd
        bound = 1.0 / jnp.sqrt(fan_in)
        return u(kw_, (o, c, kh, kwd), bound), u(kb_, (o,), bound)

    conv1_w, conv1_b = conv(ks[0], ks[1], 32, 4, 8, 8)
    conv2_w, conv2_b = conv(ks[2], ks[3], 64, 32, 4, 4)
    conv3_w, conv3_b = conv(ks[4], ks[5], 64, 64, 3, 3)

    fan1 = FC1_K
    fc1_w = u(ks[6], (FC1_H, fan1), 1.0 / jnp.sqrt(fan1))
    fc1_b = u(ks[7], (FC1_H,), 1.0 / jnp.sqrt(fan1))

    # fc2: kaiming_uniform_(nonlinearity='linear') -> bound = sqrt(3/fan_in); bias = 0
    fc2_w = u(ks[8], (action_size, FC1_H), jnp.sqrt(3.0 / FC1_H))
    fc2_b = jnp.zeros((action_size,), jnp.float32)

    return dict(conv1_w=conv1_w, conv1_b=conv1_b,
                conv2_w=conv2_w, conv2_b=conv2_b,
                conv3_w=conv3_w, conv3_b=conv3_b,
                fc1_w=fc1_w, fc1_b=fc1_b,
                fc2_w=fc2_w, fc2_b=fc2_b)


# ----------------------------------------------------------------------------
# One-time parameter preparation: fold every transpose / permutation / padding
# / input scaling into the stored weights (kernel-ready layouts).
# ----------------------------------------------------------------------------
def _prep_conv(w_oihw, b, c_out_pad):
    o, c, kh, kw = w_oihw.shape
    w = jnp.transpose(w_oihw, (2, 3, 1, 0)).reshape(kh * kw * c, o)   # (K, O)
    w = jnp.pad(w, ((0, 0), (0, c_out_pad - o))).astype(jnp.bfloat16)
    b2 = jnp.pad(b, (0, c_out_pad - o)).reshape(1, c_out_pad).astype(jnp.float32)
    return w, b2


def prepare_params(params):
    prep = {}
    # conv1: 1/255 input scaling folded into the weights (conv is linear in x).
    prep["conv1_w"], prep["conv1_b"] = _prep_conv(
        params["conv1_w"] * (1.0 / 255.0), params["conv1_b"], c_out_pad=CONV_CPAD)
    # conv2/conv3 consume the REAL-channel activations (sliced before im2col),
    # so their K dims are the true 512 / 576 (no input-channel padding).
    prep["conv2_w"], prep["conv2_b"] = _prep_conv(
        params["conv2_w"], params["conv2_b"], c_out_pad=CONV_CPAD)
    prep["conv3_w"], prep["conv3_b"] = _prep_conv(
        params["conv3_w"], params["conv3_b"], c_out_pad=CONV_CPAD)

    # fc1: torch layout is (512, 3136) with K ordered (C, H, W) (NCHW flatten).
    # Re-order K rows to (H, W, C) so the forward flattens NHWC directly,
    # transpose to (K, 512), pad K to a multiple of 128, cast to bf16.
    fc1_w = params["fc1_w"].reshape(FC1_H, 64, 7, 7)
    fc1_w = jnp.transpose(fc1_w, (2, 3, 1, 0)).reshape(FC1_K, FC1_H)
    prep["fc1_w"] = jnp.pad(fc1_w, ((0, FC1_KP - FC1_K), (0, 0))).astype(jnp.bfloat16)
    prep["fc1_b"] = params["fc1_b"].reshape(1, FC1_H).astype(jnp.float32)

    # fc2 stays f32 (tiny matmul): reduces bf16 drift on the Q-values.
    na = params["fc2_w"].shape[0]
    nap = _round_up(na, 128)
    prep["fc2_w"] = jnp.pad(params["fc2_w"].T, ((0, 0), (0, nap - na))).astype(jnp.float32)
    prep["fc2_b"] = jnp.pad(params["fc2_b"], (0, nap - na)).reshape(1, nap).astype(jnp.float32)
    return prep


# ----------------------------------------------------------------------------
# Forward pass (semantics of DQN.forward)
# ----------------------------------------------------------------------------
@functools.partial(jax.jit, static_argnames=("action_size",))
def dqn_forward(prep, x_nchw, *, action_size):
    # 1/255 is folded into conv1's weights; pixel values <=255 are exact in bf16.
    x = jnp.transpose(x_nchw, (0, 2, 3, 1)).astype(jnp.bfloat16)          # NHWC bf16
    x = conv2d_relu(x, prep["conv1_w"], prep["conv1_b"], 8, 4)            # (N,20,20,128)
    x = conv2d_relu(x[..., :32], prep["conv2_w"], prep["conv2_b"], 4, 2)  # (N, 9, 9,128)
    x = conv2d_relu(x[..., :64], prep["conv3_w"], prep["conv3_b"], 3, 1)  # (N, 7, 7,128)
    n = x.shape[0]
    # Drop the zero padding channels and flatten in NHWC (H, W, C) order;
    # fc1's rows were permuted at prepare time to match (== torch view(N,-1)).
    x = x[..., :64].reshape(n, FC1_K)                                     # (N, 3136) bf16
    mp = _round_up(max(n, 16), 16)                                        # bf16 sublane pack
    x = jnp.pad(x, ((0, mp - n), (0, FC1_KP - FC1_K)))
    q = fused_fc(x, prep["fc1_w"], prep["fc1_b"], prep["fc2_w"], prep["fc2_b"])
    return q[:n, :action_size]


# ----------------------------------------------------------------------------
# Pure-JAX f32 reference (matches the PyTorch module) for validation.
# ----------------------------------------------------------------------------
def dqn_reference(params, x_nchw, action_size):
    x = x_nchw.astype(jnp.float32) / 255.0

    def conv(x, w, b, stride):
        y = jax.lax.conv_general_dilated(
            x, w, (stride, stride), "VALID",
            dimension_numbers=("NCHW", "OIHW", "NCHW"))
        return jax.nn.relu(y + b[None, :, None, None])

    x = conv(x, params["conv1_w"], params["conv1_b"], 4)
    x = conv(x, params["conv2_w"], params["conv2_b"], 2)
    x = conv(x, params["conv3_w"], params["conv3_b"], 1)
    x = x.reshape(x.shape[0], -1)                       # NCHW flatten (C,H,W order)
    h = jax.nn.relu(x @ params["fc1_w"].T + params["fc1_b"])
    return h @ params["fc2_w"].T + params["fc2_b"]


if __name__ == "__main__":
    key = jax.random.PRNGKey(0)
    k_param, k_x = jax.random.split(key)

    ACTION_SIZE = 6
    BATCH = 2
    # The architecture hard-codes 84x84x4 inputs (fc1 expects 7*7*64).
    x = jax.random.randint(k_x, (BATCH, 4, 84, 84), 0, 256, dtype=jnp.int32)
    x = x.astype(jnp.float32)

    params = init_params(k_param, ACTION_SIZE)
    prepared = prepare_params(params)

    q_values = dqn_forward(prepared, x, action_size=ACTION_SIZE)
    q_values = jax.block_until_ready(q_values)

    assert q_values.shape == (BATCH, ACTION_SIZE), q_values.shape
    assert q_values.dtype == jnp.float32
    assert bool(jnp.all(jnp.isfinite(q_values)))

    q_ref = dqn_reference(params, x, ACTION_SIZE)
    max_err = float(jnp.max(jnp.abs(q_values - q_ref)))
    assert max_err < 5e-2, f"max abs error vs f32 reference: {max_err}"

    print("KERNEL_OK")
</pallas_src>

<mosaic_0001>
module attributes {stable_mosaic.version = 11 : i64} {
  func.func @_matmul_bias_kernel(%arg0: i32, %arg1: memref<800x256xbf16, #tpu.memory_space<vmem>>, %arg2: memref<256x128xbf16, #tpu.memory_space<vmem>>, %arg3: memref<1x128xf32, #tpu.memory_space<vmem>>, %arg4: memref<800x128xbf16, #tpu.memory_space<vmem>>) attributes {dimension_semantics = [#tpu.dimension_semantics<parallel>], iteration_bounds = array<i64: 1>, scalar_prefetch = 0 : i64, scratch_operands = 0 : i64, tpu.core_type = #tpu.core_type<tc>, window_params = [{transform_indices = @transform_0, window_bounds = array<i64: 800, 256>}, {pipeline_mode = #tpu.pipeline_mode<synchronous>, transform_indices = @transform_1, window_bounds = array<i64: 256, 128>}, {pipeline_mode = #tpu.pipeline_mode<synchronous>, transform_indices = @transform_2, window_bounds = array<i64: 1, 128>}, {transform_indices = @transform_3, window_bounds = array<i64: 800, 128>}]} {
    %c0 = arith.constant 0 : index
    %c0_0 = arith.constant 0 : index
    %0 = vector.load %arg1[%c0, %c0_0] : memref<800x256xbf16, #tpu.memory_space<vmem>>, vector<800x256xbf16>
    %c0_1 = arith.constant 0 : index
    %c0_2 = arith.constant 0 : index
    %1 = vector.load %arg2[%c0_1, %c0_2] : memref<256x128xbf16, #tpu.memory_space<vmem>>, vector<256x128xbf16>
    %cst = arith.constant dense<0.000000e+00> : vector<800x128xf32>
    %2 = tpu.matmul %0, %1, %cst {dimension_numbers = #tpu.dot_dimension_numbers<[1], [0], [0], [1], [0, 0, 1, 1], [], []>} : vector<800x256xbf16>, vector<256x128xbf16>, vector<800x128xf32> -> vector<800x128xf32>
    %c0_3 = arith.constant 0 : index
    %c0_4 = arith.constant 0 : index
    %3 = vector.load %arg3[%c0_3, %c0_4] : memref<1x128xf32, #tpu.memory_space<vmem>>, vector<1x128xf32>
    %4 = vector.broadcast %3 : vector<1x128xf32> to vector<800x128xf32>
    %5 = arith.addf %2, %4 : vector<800x128xf32>
    %cst_5 = arith.constant 0.000000e+00 : f32
    %6 = vector.broadcast %cst_5 : f32 to vector<800x128xf32>
    %7 = arith.maximumf %5, %6 : vector<800x128xf32>
    %8 = arith.truncf %7 : vector<800x128xf32> to vector<800x128xbf16>
    %c0_6 = arith.constant 0 : index
    %c0_7 = arith.constant 0 : index
    %9 = vector.load %arg4[%c0_6, %c0_7] : memref<800x128xbf16, #tpu.memory_space<vmem>>, vector<800x128xbf16>
    tpu.vector_store %arg4[%c0_6, %c0_7], %8 {strides = array<i32>} : memref<800x128xbf16, #tpu.memory_space<vmem>>, vector<800x128xbf16>,
    return
  }
  func.func @transform_0(%arg0: i32) -> (i32, i32) {
    %c0_i32 = arith.constant 0 : i32
    %c0_i32_0 = arith.constant 0 : i32
    return %arg0, %c0_i32 : i32, i32
  }
  func.func @transform_1(%arg0: i32) -> (i32, i32) {
    %c0_i32 = arith.constant 0 : i32
    %c0_i32_0 = arith.constant 0 : i32
    %c0_i32_1 = arith.constant 0 : i32
    return %c0_i32, %c0_i32_0 : i32, i32
  }
  func.func @transform_2(%arg0: i32) -> (i32, i32) {
    %c0_i32 = arith.constant 0 : i32
    %c0_i32_0 = arith.constant 0 : i32
    %c0_i32_1 = arith.constant 0 : i32
    return %c0_i32, %c0_i32_0 : i32, i32
  }
  func.func @transform_3(%arg0: i32) -> (i32, i32) {
    %c0_i32 = arith.constant 0 : i32
    %c0_i32_0 = arith.constant 0 : i32
    return %arg0, %c0_i32 : i32, i32
  }
}

module attributes {stable_mosaic.version = 11 : i64} {
  func.func @_matmul_bias_kernel(%arg0: i32, %arg1: memref<162x512xbf16, #tpu.memory_space<vmem>>, %arg2: memref<512x128xbf16, #tpu.memory_space<vmem>>, %arg3: memref<1x128xf32, #tpu.memory_space<vmem>>, %arg4: memref<162x128xbf16, #tpu.memory_space<vmem>>) attributes {dimension_semantics = [#tpu.dimension_semantics<parallel>], iteration_bounds = array<i64: 1>, scalar_prefetch = 0 : i64, scratch_operands = 0 : i64, tpu.core_type = #tpu.core_type<tc>, window_params = [{transform_indices = @transform_0, window_bounds = array<i64: 162, 512>}, {pipeline_mode = #tpu.pipeline_mode<synchronous>, transform_indices = @transform_1, window_bounds = array<i64: 512, 128>}, {pipeline_mode = #tpu.pipeline_mode<synchronous>, transform_indices = @transform_2, window_bounds = array<i64: 1, 128>}, {transform_indices = @transform_3, window_bounds = array<i64: 162, 128>}]} {
    %c0 = arith.constant 0 : index
    %c0_0 = arith.constant 0 : index
    %0 = vector.load %arg1[%c0, %c0_0] : memref<162x512xbf16, #tpu.memory_space<vmem>>, vector<162x512xbf16>
    %c0_1 = arith.constant 0 : index
    %c0_2 = arith.constant 0 : index
    %1 = vector.load %arg2[%c0_1, %c0_2] : memref<512x128xbf16, #tpu.memory_space<vmem>>, vector<512x128xbf16>
    %cst = arith.constant dense<0.000000e+00> : vector<162x128xf32>
    %2 = tpu.matmul %0, %1, %cst {dimension_numbers = #tpu.dot_dimension_numbers<[1], [0], [0], [1], [0, 0, 1, 1], [], []>} : vector<162x512xbf16>, vector<512x128xbf16>, vector<162x128xf32> -> vector<162x128xf32>
    %c0_3 = arith.constant 0 : index
    %c0_4 = arith.constant 0 : index
    %3 = vector.load %arg3[%c0_3, %c0_4] : memref<1x128xf32, #tpu.memory_space<vmem>>, vector<1x128xf32>
    %4 = vector.broadcast %3 : vector<1x128xf32> to vector<162x128xf32>
    %5 = arith.addf %2, %4 : vector<162x128xf32>
    %cst_5 = arith.constant 0.000000e+00 : f32
    %6 = vector.broadcast %cst_5 : f32 to vector<162x128xf32>
    %7 = arith.maximumf %5, %6 : vector<162x128xf32>
    %8 = arith.truncf %7 : vector<162x128xf32> to vector<162x128xbf16>
    %c0_6 = arith.constant 0 : index
    %c0_7 = arith.constant 0 : index
    %9 = vector.load %arg4[%c0_6, %c0_7] : memref<162x128xbf16, #tpu.memory_space<vmem>>, vector<162x128xbf16>
    tpu.vector_store %arg4[%c0_6, %c0_7], %8 {strides = array<i32>} : memref<162x128xbf16, #tpu.memory_space<vmem>>, vector<162x128xbf16>,
    return
  }
  func.func @transform_0(%arg0: i32) -> (i32, i32) {
    %c0_i32 = arith.constant 0 : i32
    %c0_i32_0 = arith.constant 0 : i32
    return %arg0, %c0_i32 : i32, i32
  }
  func.func @transform_1(%arg0: i32) -> (i32, i32) {
    %c0_i32 = arith.constant 0 : i32
    %c0_i32_0 = arith.constant 0 : i32
    %c0_i32_1 = arith.constant 0 : i32
    return %c0_i32, %c0_i32_0 : i32, i32
  }
  func.func @transform_2(%arg0: i32) -> (i32, i32) {
    %c0_i32 = arith.constant 0 : i32
    %c0_i32_0 = arith.constant 0 : i32
    %c0_i32_1 = arith.constant 0 : i32
    return %c0_i32, %c0_i32_0 : i32, i32
  }
  func.func @transform_3(%arg0: i32) -> (i32, i32) {
    %c0_i32 = arith.constant 0 : i32
    %c0_i32_0 = arith.constant 0 : i32
    return %arg0, %c0_i32 : i32, i32
  }
}

module attributes {stable_mosaic.version = 11 : i64} {
  func.func @_matmul_bias_kernel(%arg0: i32, %arg1: memref<98x576xbf16, #tpu.memory_space<vmem>>, %arg2: memref<576x128xbf16, #tpu.memory_space<vmem>>, %arg3: memref<1x128xf32, #tpu.memory_space<vmem>>, %arg4: memref<98x128xbf16, #tpu.memory_space<vmem>>) attributes {dimension_semantics = [#tpu.dimension_semantics<parallel>], iteration_bounds = array<i64: 1>, scalar_prefetch = 0 : i64, scratch_operands = 0 : i64, tpu.core_type = #tpu.core_type<tc>, window_params = [{transform_indices = @transform_0, window_bounds = array<i64: 98, 576>}, {pipeline_mode = #tpu.pipeline_mode<synchronous>, transform_indices = @transform_1, window_bounds = array<i64: 576, 128>}, {pipeline_mode = #tpu.pipeline_mode<synchronous>, transform_indices = @transform_2, window_bounds = array<i64: 1, 128>}, {transform_indices = @transform_3, window_bounds = array<i64: 98, 128>}]} {
    %c0 = arith.constant 0 : index
    %c0_0 = arith.constant 0 : index
    %0 = vector.load %arg1[%c0, %c0_0] : memref<98x576xbf16, #tpu.memory_space<vmem>>, vector<98x576xbf16>
    %c0_1 = arith.constant 0 : index
    %c0_2 = arith.constant 0 : index
    %1 = vector.load %arg2[%c0_1, %c0_2] : memref<576x128xbf16, #tpu.memory_space<vmem>>, vector<576x128xbf16>
    %cst = arith.constant dense<0.000000e+00> : vector<98x128xf32>
    %2 = tpu.matmul %0, %1, %cst {dimension_numbers = #tpu.dot_dimension_numbers<[1], [0], [0], [1], [0, 0, 1, 1], [], []>} : vector<98x576xbf16>, vector<576x128xbf16>, vector<98x128xf32> -> vector<98x128xf32>
    %c0_3 = arith.constant 0 : index
    %c0_4 = arith.constant 0 : index
    %3 = vector.load %arg3[%c0_3, %c0_4] : memref<1x128xf32, #tpu.memory_space<vmem>>, vector<1x128xf32>
    %4 = vector.broadcast %3 : vector<1x128xf32> to vector<98x128xf32>
    %5 = arith.addf %2, %4 : vector<98x128xf32>
    %cst_5 = arith.constant 0.000000e+00 : f32
    %6 = vector.broadcast %cst_5 : f32 to vector<98x128xf32>
    %7 = arith.maximumf %5, %6 : vector<98x128xf32>
    %8 = arith.truncf %7 : vector<98x128xf32> to vector<98x128xbf16>
    %c0_6 = arith.constant 0 : index
    %c0_7 = arith.constant 0 : index
    %9 = vector.load %arg4[%c0_6, %c0_7] : memref<98x128xbf16, #tpu.memory_space<vmem>>, vector<98x128xbf16>
    tpu.vector_store %arg4[%c0_6, %c0_7], %8 {strides = array<i32>} : memref<98x128xbf16, #tpu.memory_space<vmem>>, vector<98x128xbf16>,
    return
  }
  func.func @transform_0(%arg0: i32) -> (i32, i32) {
    %c0_i32 = arith.constant 0 : i32
    %c0_i32_0 = arith.constant 0 : i32
    return %arg0, %c0_i32 : i32, i32
  }
  func.func @transform_1(%arg0: i32) -> (i32, i32) {
    %c0_i32 = arith.constant 0 : i32
    %c0_i32_0 = arith.constant 0 : i32
    %c0_i32_1 = arith.constant 0 : i32
    return %c0_i32, %c0_i32_0 : i32, i32
  }
  func.func @transform_2(%arg0: i32) -> (i32, i32) {
    %c0_i32 = arith.constant 0 : i32
    %c0_i32_0 = arith.constant 0 : i32
    %c0_i32_1 = arith.constant 0 : i32
    return %c0_i32, %c0_i32_0 : i32, i32
  }
  func.func @transform_3(%arg0: i32) -> (i32, i32) {
    %c0_i32 = arith.constant 0 : i32
    %c0_i32_0 = arith.constant 0 : i32
    return %arg0, %c0_i32 : i32, i32
  }
}

module attributes {stable_mosaic.version = 11 : i64} {
  func.func @_fused_fc_kernel(%arg0: i32, %arg1: i32, %arg2: memref<16x640xbf16, #tpu.memory_space<vmem>>, %arg3: memref<640x512xbf16, #tpu.memory_space<vmem>>, %arg4: memref<1x512xf32, #tpu.memory_space<vmem>>, %arg5: memref<512x128xf32, #tpu.memory_space<vmem>>, %arg6: memref<1x128xf32, #tpu.memory_space<vmem>>, %arg7: memref<16x128xf32, #tpu.memory_space<vmem>>, %arg8: memref<16x512xf32, #tpu.memory_space<vmem>>) attributes {dimension_semantics = [#tpu.dimension_semantics<parallel>, #tpu.dimension_semantics<arbitrary>], iteration_bounds = array<i64: 1, 5>, scalar_prefetch = 0 : i64, scratch_operands = 1 : i64, tpu.core_type = #tpu.core_type<tc>, window_params = [{transform_indices = @transform_0, window_bounds = array<i64: 16, 640>}, {transform_indices = @transform_1, window_bounds = array<i64: 640, 512>}, {pipeline_mode = #tpu.pipeline_mode<synchronous>, transform_indices = @transform_2, window_bounds = array<i64: 1, 512>}, {pipeline_mode = #tpu.pipeline_mode<synchronous>, transform_indices = @transform_3, window_bounds = array<i64: 512, 128>}, {pipeline_mode = #tpu.pipeline_mode<synchronous>, transform_indices = @transform_4, window_bounds = array<i64: 1, 128>}, {transform_indices = @transform_5, window_bounds = array<i64: 16, 128>}]} {
    %c0_i32 = arith.constant 0 : i32
    %0 = arith.cmpi eq, %arg1, %c0_i32 : i32
    %1 = arith.extui %0 : i1 to i32
    %c0_i32_0 = arith.constant 0 : i32
    %2 = arith.cmpi ne, %1, %c0_i32_0 : i32
    scf.if %2 {
      %cst_9 = arith.constant 0.000000e+00 : f32
      %12 = vector.broadcast %cst_9 : f32 to vector<16x512xf32>
      %c0_10 = arith.constant 0 : index
      %c0_11 = arith.constant 0 : index
      %13 = vector.load %arg8[%c0_10, %c0_11] : memref<16x512xf32, #tpu.memory_space<vmem>>, vector<16x512xf32>
      tpu.vector_store %arg8[%c0_10, %c0_11], %12 {strides = array<i32>} : memref<16x512xf32, #tpu.memory_space<vmem>>, vector<16x512xf32>,
    } else {
    }
    %c0 = arith.constant 0 : index
    %c0_1 = arith.constant 0 : index
    %3 = vector.load %arg8[%c0, %c0_1] : memref<16x512xf32, #tpu.memory_space<vmem>>, vector<16x512xf32>
    %c0_2 = arith.constant 0 : index
    %c0_3 = arith.constant 0 : index
    %4 = vector.load %arg2[%c0_2, %c0_3] : memref<16x640xbf16, #tpu.memory_space<vmem>>, vector<16x640xbf16>
    %c0_4 = arith.constant 0 : index
    %c0_5 = arith.constant 0 : index
    %5 = vector.load %arg3[%c0_4, %c0_5] : memref<640x512xbf16, #tpu.memory_space<vmem>>, vector<640x512xbf16>
    %cst = arith.constant dense<0.000000e+00> : vector<16x512xf32>
    %6 = tpu.matmul %4, %5, %cst {dimension_numbers = #tpu.dot_dimension_numbers<[1], [0], [0], [1], [0, 0, 1, 1], [], []>} : vector<16x640xbf16>, vector<640x512xbf16>, vector<16x512xf32> -> vector<16x512xf32>
    %7 = arith.addf %3, %6 : vector<16x512xf32>
    %c0_6 = arith.constant 0 : index
    %c0_7 = arith.constant 0 : index
    %8 = vector.load %arg8[%c0_6, %c0_7] : memref<16x512xf32, #tpu.memory_space<vmem>>, vector<16x512xf32>
    tpu.vector_store %arg8[%c0_6, %c0_7], %7 {strides = array<i32>} : memref<16x512xf32, #tpu.memory_space<vmem>>, vector<16x512xf32>,
    %c4_i32 = arith.constant 4 : i32
    %9 = arith.cmpi eq, %arg1, %c4_i32 : i32
    %10 = arith.extui %9 : i1 to i32
    %c0_i32_8 = arith.constant 0 : i32
    %11 = arith.cmpi ne, %10, %c0_i32_8 : i32
    scf.if %11 {
      %c0_9 = arith.constant 0 : index
      %c0_10 = arith.constant 0 : index
      %12 = vector.load %arg8[%c0_9, %c0_10] : memref<16x512xf32, #tpu.memory_space<vmem>>, vector<16x512xf32>
      %c0_11 = arith.constant 0 : index
      %c0_12 = arith.constant 0 : index
      %13 = vector.load %arg4[%c0_11, %c0_12] : memref<1x512xf32, #tpu.memory_space<vmem>>, vector<1x512xf32>
      %14 = vector.broadcast %13 : vector<1x512xf32> to vector<16x512xf32>
      %15 = arith.addf %12, %14 : vector<16x512xf32>
      %cst_13 = arith.constant 0.000000e+00 : f32
      %16 = vector.broadcast %cst_13 : f32 to vector<16x512xf32>
      %17 = arith.maximumf %15, %16 : vector<16x512xf32>
      %c0_14 = arith.constant 0 : index
      %c0_15 = arith.constant 0 : index
      %18 = vector.load %arg5[%c0_14, %c0_15] : memref<512x128xf32, #tpu.memory_space<vmem>>, vector<512x128xf32>
      %cst_16 = arith.constant dense<0.000000e+00> : vector<16x128xf32>
      %19 = tpu.matmul %17, %18, %cst_16 {dimension_numbers = #tpu.dot_dimension_numbers<[1], [0], [0], [1], [0, 0, 1, 1], [], []>} : vector<16x512xf32>, vector<512x128xf32>, vector<16x128xf32> -> vector<16x128xf32>
      %c0_17 = arith.constant 0 : index
      %c0_18 = arith.constant 0 : index
      %20 = vector.load %arg6[%c0_17, %c0_18] : memref<1x128xf32, #tpu.memory_space<vmem>>, vector<1x128xf32>
      %21 = vector.broadcast %20 : vector<1x128xf32> to vector<16x128xf32>
      %22 = arith.addf %19, %21 : vector<16x128xf32>
      %c0_19 = arith.constant 0 : index
      %c0_20 = arith.constant 0 : index
      %23 = vector.load %arg7[%c0_19, %c0_20] : memref<16x128xf32, #tpu.memory_space<vmem>>, vector<16x128xf32>
      tpu.vector_store %arg7[%c0_19, %c0_20], %22 {strides = array<i32>} : memref<16x128xf32, #tpu.memory_space<vmem>>, vector<16x128xf32>,
    } else {
    }
    return
  }
  func.func @transform_0(%arg0: i32, %arg1: i32) -> (i32, i32) {
    %c0_i32 = arith.constant 0 : i32
    return %arg0, %arg1 : i32, i32
  }
  func.func @transform_1(%arg0: i32, %arg1: i32) -> (i32, i32) {
    %c0_i32 = arith.constant 0 : i32
    %c0_i32_0 = arith.constant 0 : i32
    return %arg1, %c0_i32 : i32, i32
  }
  func.func @transform_2(%arg0: i32, %arg1: i32) -> (i32, i32) {
    %c0_i32 = arith.constant 0 : i32
    %c0_i32_0 = arith.constant 0 : i32
    %c0_i32_1 = arith.constant 0 : i32
    return %c0_i32, %c0_i32_0 : i32, i32
  }
  func.func @transform_3(%arg0: i32, %arg1: i32) -> (i32, i32) {
    %c0_i32 = arith.constant 0 : i32
    %c0_i32_0 = arith.constant 0 : i32
    %c0_i32_1 = arith.constant 0 : i32
    return %c0_i32, %c0_i32_0 : i32, i32
  }
  func.func @transform_4(%arg0: i32, %arg1: i32) -> (i32, i32) {
    %c0_i32 = arith.constant 0 : i32
    %c0_i32_0 = arith.constant 0 : i32
    %c0_i32_1 = arith.constant 0 : i32
    return %c0_i32, %c0_i32_0 : i32, i32
  }
  func.func @transform_5(%arg0: i32, %arg1: i32) -> (i32, i32) {
    %c0_i32 = arith.constant 0 : i32
    %c0_i32_0 = arith.constant 0 : i32
    return %arg0, %c0_i32 : i32, i32
  }
}

</mosaic_0001>

<bundles_post_ra>
// kernel: dqn_forward.4
= control target key start
LH: loop header
LB: loop body
LE: loop exit
PB: predicated region body
PF: predicated region fallthrough
CT: control target
= control target key end

     0   :  { %v2602_v0 = vmov 0   ;;  %s3258_s1 = inlined_call_operand.vmem [shape: bf16[256,128], index: 1, kind: input, shape index: {}]   ;;  %s3259_s0 = inlined_call_operand.vmem [shape: bf16[800,256], index: 0, kind: input, shape index: {}]   ;;  %s3260_s2 = inlined_call_operand.vmem [shape: f32[1,128], index: 2, kind: input, shape index: {}]   ;;  %s3261_s3 = inlined_call_operand.vmem [shape: bf16[800,128], index: 3, kind: output, shape index: {}]  }
   0x1   :  { %750 = vmatprep.subr.bf16.mxu0 %v2602_v0  ;;  %2403 = vmatprep.subr.bf16.mxu1 %v2602_v0  ;;  %v2436_v1 = vld [vmem:[%s3258_s1 + $0x38] sm:$0xff]   ;;  %v2437_v2 = vld [vmem:[%s3258_s1 + $0x30] sm:$0xff]   ;;  %v2438_v3 = vld [vmem:[%s3258_s1 + $0x28] sm:$0xff]  }
   0x2   :  { %751 = vmatpush1.bf16.msra.mxu0 %v2436_v1  ;;  %2419 = vmatpush1.bf16.msra.mxu1 %v2436_v1  ;;  %v2439_v4 = vld [vmem:[%s3258_s1 + $0x20] sm:$0xff]   ;;  %v2440_v5 = vld [vmem:[%s3258_s1 + $0x18] sm:$0xff]   ;;  %v2441_v7 = vld [vmem:[%s3258_s1 + $0x10] sm:$0xff]  }
   0x3   :  { %752 = vmatprep.subr.bf16.mxu0 %v2602_v0  ;;  %2404 = vmatprep.subr.bf16.mxu1 %v2602_v0  ;;  %v2454_v6 = vld [vmem:[%s3259_s0 + $0x4] ss:$8 sps:$4 sm:$0xff]   ;;  %v2457_v8 = vld [vmem:[%s3259_s0 + $0x194] ss:$8 sps:$4 sm:$0xff]   ;;  %v2452_v19 = vld [vmem:[%s3259_s0] ss:$8 sps:$4 sm:$0xff]  }
   0x4   :  { %782 = vmatprep.mubr.bf16.mxu0 %v2454_v6  ;;  %982 = vmatprep.mubr.bf16.mxu1 %v2457_v8  ;;  %v2442_v9 = vld [vmem:[%s3258_s1 + $0x8] sm:$0xff]   ;;  %v2443_v10 = vld [vmem:[%s3258_s1] sm:$0xff]   ;;  %v2444_v11 = vld [vmem:[%s3258_s1 + $0x78] sm:$0xff]  }
   0x5   :  { %v2445_v12 = vld [vmem:[%s3258_s1 + $0x70] sm:$0xff]   ;;  %v2446_v13 = vld [vmem:[%s3258_s1 + $0x68] sm:$0xff]   ;;  %v2447_v14 = vld [vmem:[%s3258_s1 + $0x60] sm:$0xff]  }
   0x6   :  { %753 = vmatpush1.bf16.msra.mxu0 %v2437_v2  ;;  %2420 = vmatpush1.bf16.msra.mxu1 %v2437_v2  ;;  %v2448_v15 = vld [vmem:[%s3258_s1 + $0x58] sm:$0xff]   ;;  %v2449_v16 = vld [vmem:[%s3258_s1 + $0x50] sm:$0xff]   ;;  %v2450_v17 = vld [vmem:[%s3258_s1 + $0x48] sm:$0xff]  }
   0x7   :  { %754 = vmatprep.subr.bf16.mxu0 %v2602_v0  ;;  %2405 = vmatprep.subr.bf16.mxu1 %v2602_v0  ;;  %v2451_v18 = vld [vmem:[%s3258_s1 + $0x40] sm:$0xff]   ;;  %v2455_v20 = vld [vmem:[%s3259_s0 + $0x190] ss:$8 sps:$4 sm:$0xff]   ;;  %v2458_v21 = vld [vmem:[%s3259_s0 + $0x14] ss:$8 sps:$4 sm:$0xff]  }
   0x8   :  { %v2460_v22 = vld [vmem:[%s3259_s0 + $0x1a4] ss:$8 sps:$4 sm:$0xff]   ;;  %v2462_v23 = vld [vmem:[%s3259_s0 + $0x10] ss:$8 sps:$4 sm:$0xff]   ;;  %v2463_v24 = vld [vmem:[%s3259_s0 + $0x1a0] ss:$8 sps:$4 sm:$0xff]  }
   0x9   :  { %v2464_v25 = vld [vmem:[%s3259_s0 + $0x24] ss:$8 sps:$4 sm:$0xff]   ;;  %v2466_v26 = vld [vmem:[%s3259_s0 + $0x1b4] ss:$8 sps:$4 sm:$0xff]   ;;  %v2468_v27 = vld [vmem:[%s3259_s0 + $0x20] ss:$8 sps:$4 sm:$0xff]  }
   0xa   :  { %755 = vmatpush1.bf16.msra.mxu0 %v2438_v3  ;;  %2421 = vmatpush1.bf16.msra.mxu1 %v2438_v3  ;;  %v2469_v28 = vld [vmem:[%s3259_s0 + $0x1b0] ss:$8 sps:$4 sm:$0xff]   ;;  %v2470_v29 = vld [vmem:[%s3259_s0 + $0x34] ss:$8 sps:$4 sm:$0xff]   ;;  %v2472_v30 = vld [vmem:[%s3259_s0 + $0x1c4] ss:$8 sps:$4 sm:$0xff]  }
   0xb   :  { %756 = vmatprep.subr.bf16.mxu0 %v2602_v0  ;;  %2406 = vmatprep.subr.bf16.mxu1 %v2602_v0  ;;  %v2474_v31 = vld [vmem:[%s3259_s0 + $0x30] ss:$8 sps:$4 sm:$0xff]   ;;  %v2475_v32 = vld [vmem:[%s3259_s0 + $0x1c0] ss:$8 sps:$4 sm:$0xff]   ;;  %v2476_v33 = vld [vmem:[%s3259_s0 + $0x44] ss:$8 sps:$4 sm:$0xff]  }
   0xc   :  { %v2478_v34 = vld [vmem:[%s3259_s0 + $0x1d4] ss:$8 sps:$4 sm:$0xff]   ;;  %v2480_v35 = vld [vmem:[%s3259_s0 + $0x40] ss:$8 sps:$4 sm:$0xff]   ;;  %v2481_v36 = vld [vmem:[%s3259_s0 + $0x1d0] ss:$8 sps:$4 sm:$0xff]  }
   0xd   :  { %v2482_v37 = vld [vmem:[%s3259_s0 + $0x54] ss:$8 sps:$4 sm:$0xff]   ;;  %v2484_v38 = vld [vmem:[%s3259_s0 + $0x1e4] ss:$8 sps:$4 sm:$0xff]   ;;  %v2486_v39 = vld [vmem:[%s3259_s0 + $0x50] ss:$8 sps:$4 sm:$0xff]  }
   0xe   :  { %757 = vmatpush1.bf16.msra.mxu0 %v2439_v4  ;;  %2422 = vmatpush1.bf16.msra.mxu1 %v2439_v4  ;;  %v2487_v40 = vld [vmem:[%s3259_s0 + $0x1e0] ss:$8 sps:$4 sm:$0xff]   ;;  %v2488_v41 = vld [vmem:[%s3259_s0 + $0x64] ss:$8 sps:$4 sm:$0xff]   ;;  %v2490_v42 = vld [vmem:[%s3259_s0 + $0x1f4] ss:$8 sps:$4 sm:$0xff]  }
   0xf   :  { %758 = vmatprep.subr.bf16.mxu0 %v2602_v0  ;;  %2407 = vmatprep.subr.bf16.mxu1 %v2602_v0  ;;  %v2492_v43 = vld [vmem:[%s3259_s0 + $0x60] ss:$8 sps:$4 sm:$0xff]   ;;  %v2493_v44 = vld [vmem:[%s3259_s0 + $0x1f0] ss:$8 sps:$4 sm:$0xff]   ;;  %v2494_v45 = vld [vmem:[%s3259_s0 + $0x74] ss:$8 sps:$4 sm:$0xff]  }
  0x10   :  { %v2496_v46 = vld [vmem:[%s3259_s0 + $0x204] ss:$8 sps:$4 sm:$0xff]   ;;  %v2498_v47 = vld [vmem:[%s3259_s0 + $0x70] ss:$8 sps:$4 sm:$0xff]   ;;  %v2499_v48 = vld [vmem:[%s3259_s0 + $0x200] ss:$8 sps:$4 sm:$0xff]  }
  0x11   :  { %v2500_v49 = vld [vmem:[%s3259_s0 + $0x84] ss:$8 sps:$4 sm:$0xff]   ;;  %v2502_v50 = vld [vmem:[%s3259_s0 + $0x214] ss:$8 sps:$4 sm:$0xff]   ;;  %v2504_v51 = vld [vmem:[%s3259_s0 + $0x80] ss:$8 sps:$4 sm:$0xff]  }
  0x12   :  { %759 = vmatpush1.bf16.msra.mxu0 %v2440_v5  ;;  %2423 = vmatpush1.bf16.msra.mxu1 %v2440_v5  ;;  %v2505_v52 = vld [vmem:[%s3259_s0 + $0x210] ss:$8 sps:$4 sm:$0xff]   ;;  %v2506_v53 = vld [vmem:[%s3259_s0 + $0x94] ss:$8 sps:$4 sm:$0xff]   ;;  %v2508_v54 = vld [vmem:[%s3259_s0 + $0x224] ss:$8 sps:$4 sm:$0xff]  }
  0x13   :  { %760 = vmatprep.subr.bf16.mxu0 %v2602_v0  ;;  %2408 = vmatprep.subr.bf16.mxu1 %v2602_v0  ;;  %v2510_v55 = vld [vmem:[%s3259_s0 + $0x90] ss:$8 sps:$4 sm:$0xff]   ;;  %v2511_v56 = vld [vmem:[%s3259_s0 + $0x220] ss:$8 sps:$4 sm:$0xff]   ;;  %v2512_v57 = vld [vmem:[%s3259_s0 + $0xa4] ss:$8 sps:$4 sm:$0xff]  }
  0x14   :  { %v2514_v58 = vld [vmem:[%s3259_s0 + $0x234] ss:$8 sps:$4 sm:$0xff]   ;;  %v2516_v59 = vld [vmem:[%s3259_s0 + $0xa0] ss:$8 sps:$4 sm:$0xff]   ;;  %v2517_v60 = vld [vmem:[%s3259_s0 + $0x230] ss:$8 sps:$4 sm:$0xff]  }
  0x15   :  { %v2518_v61 = vld [vmem:[%s3259_s0 + $0xb4] ss:$8 sps:$4 sm:$0xff]   ;;  %v2520_v62 = vld [vmem:[%s3259_s0 + $0x244] ss:$8 sps:$4 sm:$0xff]   ;;  %v2522_v63 = vld [vmem:[%s3259_s0 + $0xb0] ss:$8 sps:$4 sm:$0xff]  }
  0x16   :  { %761 = vmatpush1.bf16.msra.mxu0 %v2441_v7  ;;  %2424 = vmatpush1.bf16.msra.mxu1 %v2441_v7  ;;  %v2524_v1 = vld [vmem:[%s3259_s0 + $0xc4] ss:$8 sps:$4 sm:$0xff]   ;;  %v2526_v2 = vld [vmem:[%s3259_s0 + $0x254] ss:$8 sps:$4 sm:$0xff]   ;;  %v2528_v3 = vld [vmem:[%s3259_s0 + $0xc0] ss:$8 sps:$4 sm:$0xff]  }
  0x17   :  { %762 = vmatprep.subr.bf16.mxu0 %v2602_v0  ;;  %2409 = vmatprep.subr.bf16.mxu1 %v2602_v0  ;;  %v2529_v4 = vld [vmem:[%s3259_s0 + $0x250] ss:$8 sps:$4 sm:$0xff]   ;;  %v2530_v5 = vld [vmem:[%s3259_s0 + $0xd4] ss:$8 sps:$4 sm:$0xff]   ;;  %v2532_v6 = vld [vmem:[%s3259_s0 + $0x264] ss:$8 sps:$4 sm:$0xff]  }
  0x18   :  { %v2534_v7 = vld [vmem:[%s3259_s0 + $0xd0] ss:$8 sps:$4 sm:$0xff]   ;;  %v2535_v8 = vld [vmem:[%s3259_s0 + $0x260] ss:$8 sps:$4 sm:$0xff]  }
  0x1a   :  { %763 = vmatpush1.bf16.msra.mxu0 %v2442_v9  ;;  %2425 = vmatpush1.bf16.msra.mxu1 %v2442_v9  ;;  %v2536_v9 = vld [vmem:[%s3259_s0 + $0xe4] ss:$8 sps:$4 sm:$0xff]  }
  0x1b   :  { %764 = vmatprep.subr.bf16.mxu0 %v2602_v0  ;;  %2410 = vmatprep.subr.bf16.mxu1 %v2602_v0 }
  0x1e   :  { %765 = vmatpush1.bf16.msra.mxu0 %v2443_v10  ;;  %2426 = vmatpush1.bf16.msra.mxu1 %v2443_v10  ;;  %v2538_v10 = vld [vmem:[%s3259_s0 + $0x274] ss:$8 sps:$4 sm:$0xff]  }
  0x1f   :  { %766 = vmatprep.subr.bf16.mxu0 %v2602_v0  ;;  %2411 = vmatprep.subr.bf16.mxu1 %v2602_v0 }
  0x22   :  { %767 = vmatpush2.bf16.msra.mxu0 %v2444_v11  ;;  %2427 = vmatpush2.bf16.msra.mxu1 %v2444_v11  ;;  %v2540_v11 = vld [vmem:[%s3259_s0 + $0xe0] ss:$8 sps:$4 sm:$0xff]  }
  0x23   :  { %768 = vmatprep.subr.bf16.mxu0 %v2602_v0  ;;  %2412 = vmatprep.subr.bf16.mxu1 %v2602_v0 }
  0x26   :  { %769 = vmatpush2.bf16.msra.mxu0 %v2445_v12  ;;  %2428 = vmatpush2.bf16.msra.mxu1 %v2445_v12  ;;  %v2541_v12 = vld [vmem:[%s3259_s0 + $0x270] ss:$8 sps:$4 sm:$0xff]  }
  0x27   :  { %770 = vmatprep.subr.bf16.mxu0 %v2602_v0  ;;  %2413 = vmatprep.subr.bf16.mxu1 %v2602_v0 }
  0x2a   :  { %771 = vmatpush2.bf16.msra.mxu0 %v2446_v13  ;;  %2429 = vmatpush2.bf16.msra.mxu1 %v2446_v13  ;;  %v2542_v13 = vld [vmem:[%s3259_s0 + $0xf4] ss:$8 sps:$4 sm:$0xff]  }
  0x2b   :  { %772 = vmatprep.subr.bf16.mxu0 %v2602_v0  ;;  %2414 = vmatprep.subr.bf16.mxu1 %v2602_v0 }
  0x2e   :  { %773 = vmatpush2.bf16.msra.mxu0 %v2447_v14  ;;  %2430 = vmatpush2.bf16.msra.mxu1 %v2447_v14  ;;  %v2544_v14 = vld [vmem:[%s3259_s0 + $0x284] ss:$8 sps:$4 sm:$0xff]  }
  0x2f   :  { %774 = vmatprep.subr.bf16.mxu0 %v2602_v0  ;;  %2415 = vmatprep.subr.bf16.mxu1 %v2602_v0 }
  0x32   :  { %775 = vmatpush2.bf16.msra.mxu0 %v2448_v15  ;;  %2431 = vmatpush2.bf16.msra.mxu1 %v2448_v15  ;;  %v2546_v15 = vld [vmem:[%s3259_s0 + $0xf0] ss:$8 sps:$4 sm:$0xff]  }
  0x33   :  { %776 = vmatprep.subr.bf16.mxu0 %v2602_v0  ;;  %2416 = vmatprep.subr.bf16.mxu1 %v2602_v0 }
  0x36   :  { %777 = vmatpush2.bf16.msra.mxu0 %v2449_v16  ;;  %2432 = vmatpush2.bf16.msra.mxu1 %v2449_v16  ;;  %v2547_v16 = vld [vmem:[%s3259_s0 + $0x280] ss:$8 sps:$4 sm:$0xff]  }
  0x37   :  { %778 = vmatprep.subr.bf16.mxu0 %v2602_v0  ;;  %2417 = vmatprep.subr.bf16.mxu1 %v2602_v0 }
  0x3a   :  { %779 = vmatpush2.bf16.msra.mxu0 %v2450_v17  ;;  %2433 = vmatpush2.bf16.msra.mxu1 %v2450_v17  ;;  %v2548_v17 = vld [vmem:[%s3259_s0 + $0x104] ss:$8 sps:$4 sm:$0xff]  }
  0x3b   :  { %780 = vmatprep.subr.bf16.mxu0 %v2602_v0  ;;  %2418 = vmatprep.subr.bf16.mxu1 %v2602_v0  ;;  %v2523_v0 = vld [vmem:[%s3259_s0 + $0x240] ss:$8 sps:$4 sm:$0xff]  }
  0x3e   :  { %781 = vmatpush2.bf16.msra.mxu0 %v2451_v18  ;;  %2434 = vmatpush2.bf16.msra.mxu1 %v2451_v18  ;;  %v2550_v18 = vld [vmem:[%s3259_s0 + $0x294] ss:$8 sps:$4 sm:$0xff]  }
  0x41   :  { %783 = vmatmul.mubr.bf16.vlgmr.msra.gmra.mxu0 %v2452_v19  ;;  %983 = vmatmul.mubr.bf16.vlgmr.msra.gmra.mxu1 %v2455_v20  ;;  %v2552_v19 = vld [vmem:[%s3259_s0 + $0x100] ss:$8 sps:$4 sm:$0xff]   ;;  %v2553_v20 = vld [vmem:[%s3259_s0 + $0x290] ss:$8 sps:$4 sm:$0xff]  }
  0x42   :  { %790 = vmatprep.mubr.bf16.mxu0 %v2458_v21  ;;  %990 = vmatprep.mubr.bf16.mxu1 %v2460_v22  ;;  %v2554_v21 = vld [vmem:[%s3259_s0 + $0x114] ss:$8 sps:$4 sm:$0xff]   ;;  %v2556_v22 = vld [vmem:[%s3259_s0 + $0x2a4] ss:$8 sps:$4 sm:$0xff]  }
  0x49   :  { %791 = vmatmul.mubr.bf16.gmra.mxu0 %v2462_v23  ;;  %991 = vmatmul.mubr.bf16.gmra.mxu1 %v2463_v24  ;;  %v2558_v23 = vld [vmem:[%s3259_s0 + $0x110] ss:$8 sps:$4 sm:$0xff]   ;;  %v2559_v24 = vld [vmem:[%s3259_s0 + $0x2a0] ss:$8 sps:$4 sm:$0xff]  }
  0x4a   :  { %798 = vmatprep.mubr.bf16.mxu0 %v2464_v25  ;;  %998 = vmatprep.mubr.bf16.mxu1 %v2466_v26  ;;  %v2560_v25 = vld [vmem:[%s3259_s0 + $0x124] ss:$8 sps:$4 sm:$0xff]   ;;  %v2562_v26 = vld [vmem:[%s3259_s0 + $0x2b4] ss:$8 sps:$4 sm:$0xff]  }
  0x51   :  { %799 = vmatmul.mubr.bf16.gmra.mxu0 %v2468_v27  ;;  %999 = vmatmul.mubr.bf16.gmra.mxu1 %v2469_v28  ;;  %v2564_v27 = vld [vmem:[%s3259_s0 + $0x120] ss:$8 sps:$4 sm:$0xff]   ;;  %v2565_v28 = vld [vmem:[%s3259_s0 + $0x2b0] ss:$8 sps:$4 sm:$0xff]  }
  0x52   :  { %806 = vmatprep.mubr.bf16.mxu0 %v2470_v29  ;;  %1006 = vmatprep.mubr.bf16.mxu1 %v2472_v30  ;;  %v2566_v29 = vld [vmem:[%s3259_s0 + $0x134] ss:$8 sps:$4 sm:$0xff]   ;;  %v2568_v30 = vld [vmem:[%s3259_s0 + $0x2c4] ss:$8 sps:$4 sm:$0xff]  }
  0x59   :  { %807 = vmatmul.mubr.bf16.gmra.mxu0 %v2474_v31  ;;  %1007 = vmatmul.mubr.bf16.gmra.mxu1 %v2475_v32  ;;  %v2570_v31 = vld [vmem:[%s3259_s0 + $0x130] ss:$8 sps:$4 sm:$0xff]   ;;  %v2571_v32 = vld [vmem:[%s3259_s0 + $0x2c0] ss:$8 sps:$4 sm:$0xff]  }
  0x5a   :  { %814 = vmatprep.mubr.bf16.mxu0 %v2476_v33  ;;  %1014 = vmatprep.mubr.bf16.mxu1 %v2478_v34  ;;  %v2572_v33 = vld [vmem:[%s3259_s0 + $0x144] ss:$8 sps:$4 sm:$0xff]   ;;  %v2574_v34 = vld [vmem:[%s3259_s0 + $0x2d4] ss:$8 sps:$4 sm:$0xff]  }
  0x61   :  { %815 = vmatmul.mubr.bf16.gmra.mxu0 %v2480_v35  ;;  %1015 = vmatmul.mubr.bf16.gmra.mxu1 %v2481_v36  ;;  %v2576_v35 = vld [vmem:[%s3259_s0 + $0x140] ss:$8 sps:$4 sm:$0xff]   ;;  %v2577_v36 = vld [vmem:[%s3259_s0 + $0x2d0] ss:$8 sps:$4 sm:$0xff]  }
  0x62   :  { %822 = vmatprep.mubr.bf16.mxu0 %v2482_v37  ;;  %1022 = vmatprep.mubr.bf16.mxu1 %v2484_v38  ;;  %v2578_v37 = vld [vmem:[%s3259_s0 + $0x154] ss:$8 sps:$4 sm:$0xff]   ;;  %v2580_v38 = vld [vmem:[%s3259_s0 + $0x2e4] ss:$8 sps:$4 sm:$0xff]  }
  0x69   :  { %823 = vmatmul.mubr.bf16.gmra.mxu0 %v2486_v39  ;;  %1023 = vmatmul.mubr.bf16.gmra.mxu1 %v2487_v40  ;;  %v2582_v39 = vld [vmem:[%s3259_s0 + $0x150] ss:$8 sps:$4 sm:$0xff]   ;;  %v2583_v40 = vld [vmem:[%s3259_s0 + $0x2e0] ss:$8 sps:$4 sm:$0xff]  }
  0x6a   :  { %830 = vmatprep.mubr.bf16.mxu0 %v2488_v41  ;;  %1030 = vmatprep.mubr.bf16.mxu1 %v2490_v42  ;;  %v2584_v41 = vld [vmem:[%s3259_s0 + $0x164] ss:$8 sps:$4 sm:$0xff]   ;;  %v2586_v42 = vld [vmem:[%s3259_s0 + $0x2f4] ss:$8 sps:$4 sm:$0xff]  }
  0x71   :  { %831 = vmatmul.mubr.bf16.gmra.mxu0 %v2492_v43  ;;  %1031 = vmatmul.mubr.bf16.gmra.mxu1 %v2493_v44  ;;  %v2588_v43 = vld [vmem:[%s3259_s0 + $0x160] ss:$8 sps:$4 sm:$0xff]   ;;  %v2589_v44 = vld [vmem:[%s3259_s0 + $0x2f0] ss:$8 sps:$4 sm:$0xff]  }
  0x72   :  { %838 = vmatprep.mubr.bf16.mxu0 %v2494_v45  ;;  %1038 = vmatprep.mubr.bf16.mxu1 %v2496_v46  ;;  %v2590_v45 = vld [vmem:[%s3259_s0 + $0x174] ss:$8 sps:$4 sm:$0xff]   ;;  %v2592_v46 = vld [vmem:[%s3259_s0 + $0x304] ss:$8 sps:$4 sm:$0xff]  }
  0x79   :  { %839 = vmatmul.mubr.bf16.gmra.mxu0 %v2498_v47  ;;  %1039 = vmatmul.mubr.bf16.gmra.mxu1 %v2499_v48  ;;  %v2594_v47 = vld [vmem:[%s3259_s0 + $0x170] ss:$8 sps:$4 sm:$0xff]   ;;  %v2595_v48 = vld [vmem:[%s3259_s0 + $0x300] ss:$8 sps:$4 sm:$0xff]  }
  0x7a   :  { %846 = vmatprep.mubr.bf16.mxu0 %v2500_v49  ;;  %1046 = vmatprep.mubr.bf16.mxu1 %v2502_v50  ;;  %v2596_v49 = vld [vmem:[%s3259_s0 + $0x184] ss:$8 sps:$4 sm:$0xff]   ;;  %v2598_v50 = vld [vmem:[%s3259_s0 + $0x314] ss:$8 sps:$4 sm:$0xff]  }
  0x81   :  { %847 = vmatmul.mubr.bf16.gmra.mxu0 %v2504_v51  ;;  %1047 = vmatmul.mubr.bf16.gmra.mxu1 %v2505_v52  ;;  %v2600_v51 = vld [vmem:[%s3259_s0 + $0x180] ss:$8 sps:$4 sm:$0xff]   ;;  %v2601_v52 = vld [vmem:[%s3259_s0 + $0x310] ss:$8 sps:$4 sm:$0xff]  }
  0x82   :  { %854 = vmatprep.mubr.bf16.mxu0 %v2506_v53  ;;  %1054 = vmatprep.mubr.bf16.mxu1 %v2508_v54  ;;  %v3006_v53 = vld [vmem:[%s3260_s2] ss:$0 sm:$0xff] }
  0x89   :  { %855 = vmatmul.mubr.bf16.gmra.mxu0 %v2510_v55  ;;  %1055 = vmatmul.mubr.bf16.gmra.mxu1 %v2511_v56 }
  0x8a   :  { %862 = vmatprep.mubr.bf16.mxu0 %v2512_v57  ;;  %1062 = vmatprep.mubr.bf16.mxu1 %v2514_v58 }
  0x91   :  { %863 = vmatmul.mubr.bf16.gmra.mxu0 %v2516_v59  ;;  %1063 = vmatmul.mubr.bf16.gmra.mxu1 %v2517_v60 }
  0x92   :  { %870 = vmatprep.mubr.bf16.mxu0 %v2518_v61  ;;  %1070 = vmatprep.mubr.bf16.mxu1 %v2520_v62 }
  0x99   :  { %871 = vmatmul.mubr.bf16.gmra.mxu0 %v2522_v63  ;;  %1071 = vmatmul.mubr.bf16.gmra.mxu1 %v2523_v0 }
  0x9a   :  { %878 = vmatprep.mubr.bf16.mxu0 %v2524_v1  ;;  %1078 = vmatprep.mubr.bf16.mxu1 %v2526_v2 }
  0xa1   :  { %879 = vmatmul.mubr.bf16.gmra.mxu0 %v2528_v3  ;;  %1079 = vmatmul.mubr.bf16.gmra.mxu1 %v2529_v4 }
  0xa2   :  { %886 = vmatprep.mubr.bf16.mxu0 %v2530_v5  ;;  %1086 = vmatprep.mubr.bf16.mxu1 %v2532_v6 }
  0xa9   :  { %887 = vmatmul.mubr.bf16.gmra.mxu0 %v2534_v7  ;;  %1087 = vmatmul.mubr.bf16.gmra.mxu1 %v2535_v8 }
  0xaa   :  { %894 = vmatprep.mubr.bf16.mxu0 %v2536_v9  ;;  %1094 = vmatprep.mubr.bf16.mxu1 %v2538_v10 }
  0xb1   :  { %895 = vmatmul.mubr.bf16.gmra.mxu0 %v2540_v11  ;;  %1095 = vmatmul.mubr.bf16.gmra.mxu1 %v2541_v12 }
  0xb2   :  { %902 = vmatprep.mubr.bf16.mxu0 %v2542_v13  ;;  %1102 = vmatprep.mubr.bf16.mxu1 %v2544_v14 }
  0xb9   :  { %903 = vmatmul.mubr.bf16.gmra.mxu0 %v2546_v15  ;;  %1103 = vmatmul.mubr.bf16.gmra.mxu1 %v2547_v16 }
  0xba   :  { %910 = vmatprep.mubr.bf16.mxu0 %v2548_v17  ;;  %1110 = vmatprep.mubr.bf16.mxu1 %v2550_v18 }
  0xc1   :  { %911 = vmatmul.mubr.bf16.gmra.mxu0 %v2552_v19  ;;  %1111 = vmatmul.mubr.bf16.gmra.mxu1 %v2553_v20 }
  0xc2   :  { %918 = vmatprep.mubr.bf16.mxu0 %v2554_v21  ;;  %1118 = vmatprep.mubr.bf16.mxu1 %v2556_v22 }
  0xc9   :  { %919 = vmatmul.mubr.bf16.gmra.mxu0 %v2558_v23  ;;  %1119 = vmatmul.mubr.bf16.gmra.mxu1 %v2559_v24 }
  0xca   :  { %926 = vmatprep.mubr.bf16.mxu0 %v2560_v25  ;;  %1126 = vmatprep.mubr.bf16.mxu1 %v2562_v26 }
  0xd1   :  { %927 = vmatmul.mubr.bf16.gmra.mxu0 %v2564_v27  ;;  %1127 = vmatmul.mubr.bf16.gmra.mxu1 %v2565_v28 }
  0xd2   :  { %934 = vmatprep.mubr.bf16.mxu0 %v2566_v29  ;;  %1134 = vmatprep.mubr.bf16.mxu1 %v2568_v30 }
  0xd9   :  { %935 = vmatmul.mubr.bf16.gmra.mxu0 %v2570_v31  ;;  %1135 = vmatmul.mubr.bf16.gmra.mxu1 %v2571_v32 }
  0xda   :  { %942 = vmatprep.mubr.bf16.mxu0 %v2572_v33  ;;  %1142 = vmatprep.mubr.bf16.mxu1 %v2574_v34 }
  0xe1   :  { %943 = vmatmul.mubr.bf16.gmra.mxu0 %v2576_v35  ;;  %1143 = vmatmul.mubr.bf16.gmra.mxu1 %v2577_v36 }
  0xe2   :  { %950 = vmatprep.mubr.bf16.mxu0 %v2578_v37  ;;  %1150 = vmatprep.mubr.bf16.mxu1 %v2580_v38 }
  0xe9   :  { %951 = vmatmul.mubr.bf16.gmra.mxu0 %v2582_v39  ;;  %1151 = vmatmul.mubr.bf16.gmra.mxu1 %v2583_v40 }
  0xea   :  { %958 = vmatprep.mubr.bf16.mxu0 %v2584_v41  ;;  %1158 = vmatprep.mubr.bf16.mxu1 %v2586_v42 }
  0xf1   :  { %959 = vmatmul.mubr.bf16.gmra.mxu0 %v2588_v43  ;;  %1159 = vmatmul.mubr.bf16.gmra.mxu1 %v2589_v44 }
  0xf2   :  { %966 = vmatprep.mubr.bf16.mxu0 %v2590_v45  ;;  %1166 = vmatprep.mubr.bf16.mxu1 %v2592_v46 }
  0xf9   :  { %967 = vmatmul.mubr.bf16.gmra.mxu0 %v2594_v47  ;;  %1167 = vmatmul.mubr.bf16.gmra.mxu1 %v2595_v48 }
  0xfa   :  { %974 = vmatprep.mubr.bf16.mxu0 %v2596_v49  ;;  %1174 = vmatprep.mubr.bf16.mxu1 %v2598_v50 }
 0x101   :  { %v784_v54 = vpop.f32.mrf.mxu0  ;;  %975 = vmatmul.mubr.bf16.gmra.mxu0 %v2600_v51  ;;  %v984_v55 = vpop.f32.mrf.mxu1  ;;  %1175 = vmatmul.mubr.bf16.gmra.mxu1 %v2601_v52 }
 0x102   :  { %v785_v58 = vadd.f32 %v3006_v53, %v784_v54  ;;  %v985_v59 = vadd.f32 %v3006_v53, %v984_v55 }
 0x103   :  { %v786_v56 = vpop.f32.mrf.mxu0  ;;  %v986_v57 = vpop.f32.mrf.mxu1 }
 0x104   :  { %v1183_v2 = vmax.f32 %v785_v58, 0.0  ;;  %v1233_v3 = vmax.f32 %v985_v59, 0.0 }
 0x105   :  { %v787_v60 = vpop.f32.mrf.mxu0  ;;  %v987_v61 = vpop.f32.mrf.mxu1 }
 0x106   :  { %v788_v62 = vadd.f32 %v3006_v53, %v787_v60  ;;  %v988_v63 = vadd.f32 %v3006_v53, %v987_v61 }
 0x107   :  { %v789_v0 = vpop.f32.mrf.mxu0  ;;  %v989_v1 = vpop.f32.mrf.mxu1 }
 0x108   :  { %v1184_v4 = vmax.f32 %v788_v62, 0.0  ;;  %v1234_v5 = vmax.f32 %v988_v63, 0.0 }
 0x109   :  { %v792_v6 = vpop.f32.mrf.mxu0  ;;  %v992_v7 = vpop.f32.mrf.mxu1 }
 0x10a   :  { %v2107_v8 = vpack.c.bf16 %v1184_v4, %v1183_v2  ;;  %v2232_v9 = vpack.c.bf16 %v1234_v5, %v1233_v3  ;;  %v793_v12 = vadd.f32 %v3006_v53, %v792_v6  ;;  %v993_v13 = vadd.f32 %v3006_v53, %v992_v7 }
 0x10b   :  { %v794_v10 = vpop.f32.mrf.mxu0  ;;  %v994_v11 = vpop.f32.mrf.mxu1 }
 0x10c   :  { %2108 = vst [vmem:[%s3261_s3] sm:$0xff] %v2107_v8   ;;  %2378 = vst [vmem:[%s3261_s3 + $0xc8] sm:$0xff] %v2232_v9   ;;  %v1185_v20 = vmax.f32 %v793_v12, 0.0  ;;  %v1235_v21 = vmax.f32 %v993_v13, 0.0 }
 0x10d   :  { %v795_v14 = vpop.f32.mrf.mxu0  ;;  %v995_v15 = vpop.f32.mrf.mxu1 }
 0x10e   :  { %v796_v16 = vadd.f32 %v3006_v53, %v795_v14  ;;  %v996_v17 = vadd.f32 %v3006_v53, %v995_v15 }
 0x10f   :  { %v797_v18 = vpop.f32.mrf.mxu0  ;;  %v997_v19 = vpop.f32.mrf.mxu1 }
 0x110   :  { %v1186_v22 = vmax.f32 %v796_v16, 0.0  ;;  %v1236_v23 = vmax.f32 %v996_v17, 0.0 }
 0x111   :  { %v800_v24 = vpop.f32.mrf.mxu0  ;;  %v1000_v25 = vpop.f32.mrf.mxu1 }
 0x112   :  { %v2112_v26 = vpack.c.bf16 %v1186_v22, %v1185_v20  ;;  %v2237_v27 = vpack.c.bf16 %v1236_v23, %v1235_v21  ;;  %v801_v30 = vadd.f32 %v3006_v53, %v800_v24  ;;  %v1001_v31 = vadd.f32 %v3006_v53, %v1000_v25 }
 0x113   :  { %v802_v28 = vpop.f32.mrf.mxu0  ;;  %v1002_v29 = vpop.f32.mrf.mxu1 }
 0x114   :  { %2354 = vst [vmem:[%s3261_s3 + $0x8] sm:$0xff] %v2112_v26   ;;  %2379 = vst [vmem:[%s3261_s3 + $0xd0] sm:$0xff] %v2237_v27   ;;  %v1187_v38 = vmax.f32 %v801_v30, 0.0  ;;  %v1237_v39 = vmax.f32 %v1001_v31, 0.0 }
 0x115   :  { %v803_v32 = vpop.f32.mrf.mxu0  ;;  %v1003_v33 = vpop.f32.mrf.mxu1 }
 0x116   :  { %v804_v34 = vadd.f32 %v3006_v53, %v803_v32  ;;  %v1004_v35 = vadd.f32 %v3006_v53, %v1003_v33 }
 0x117   :  { %v805_v36 = vpop.f32.mrf.mxu0  ;;  %v1005_v37 = vpop.f32.mrf.mxu1 }
 0x118   :  { %v1188_v40 = vmax.f32 %v804_v34, 0.0  ;;  %v1238_v41 = vmax.f32 %v1004_v35, 0.0 }
 0x119   :  { %v808_v42 = vpop.f32.mrf.mxu0  ;;  %v1008_v43 = vpop.f32.mrf.mxu1 }
 0x11a   :  { %v2117_v44 = vpack.c.bf16 %v1188_v40, %v1187_v38  ;;  %v2242_v45 = vpack.c.bf16 %v1238_v41, %v1237_v39  ;;  %v809_v48 = vadd.f32 %v3006_v53, %v808_v42  ;;  %v1009_v49 = vadd.f32 %v3006_v53, %v1008_v43 }
 0x11b   :  { %v810_v46 = vpop.f32.mrf.mxu0  ;;  %v1010_v47 = vpop.f32.mrf.mxu1 }
 0x11c   :  { %2355 = vst [vmem:[%s3261_s3 + $0x10] sm:$0xff] %v2117_v44   ;;  %2380 = vst [vmem:[%s3261_s3 + $0xd8] sm:$0xff] %v2242_v45   ;;  %v1189_v57 = vmax.f32 %v809_v48, 0.0  ;;  %v1239_v58 = vmax.f32 %v1009_v49, 0.0 }
 0x11d   :  { %v811_v50 = vpop.f32.mrf.mxu0  ;;  %v1011_v51 = vpop.f32.mrf.mxu1 }
 0x11e   :  { %v812_v52 = vadd.f32 %v3006_v53, %v811_v50  ;;  %v1012_v54 = vadd.f32 %v3006_v53, %v1011_v51 }
 0x11f   :  { %v813_v55 = vpop.f32.mrf.mxu0  ;;  %v1013_v56 = vpop.f32.mrf.mxu1 }
 0x120   :  { %v1190_v59 = vmax.f32 %v812_v52, 0.0  ;;  %v1240_v60 = vmax.f32 %v1012_v54, 0.0 }
 0x121   :  { %v816_v61 = vpop.f32.mrf.mxu0  ;;  %v1016_v62 = vpop.f32.mrf.mxu1 }
 0x122   :  { %v2122_v63 = vpack.c.bf16 %v1190_v59, %v1189_v57  ;;  %v2247_v0 = vpack.c.bf16 %v1240_v60, %v1239_v58  ;;  %v817_v3 = vadd.f32 %v3006_v53, %v816_v61  ;;  %v1017_v4 = vadd.f32 %v3006_v53, %v1016_v62 }
 0x123   :  { %v818_v1 = vpop.f32.mrf.mxu0  ;;  %v1018_v2 = vpop.f32.mrf.mxu1 }
 0x124   :  { %2356 = vst [vmem:[%s3261_s3 + $0x18] sm:$0xff] %v2122_v63   ;;  %2381 = vst [vmem:[%s3261_s3 + $0xe0] sm:$0xff] %v2247_v0   ;;  %v1191_v11 = vmax.f32 %v817_v3, 0.0  ;;  %v1241_v12 = vmax.f32 %v1017_v4, 0.0 }
 0x125   :  { %v819_v5 = vpop.f32.mrf.mxu0  ;;  %v1019_v6 = vpop.f32.mrf.mxu1 }
 0x126   :  { %v820_v7 = vadd.f32 %v3006_v53, %v819_v5  ;;  %v1020_v8 = vadd.f32 %v3006_v53, %v1019_v6 }
 0x127   :  { %v821_v9 = vpop.f32.mrf.mxu0  ;;  %v1021_v10 = vpop.f32.mrf.mxu1 }
 0x128   :  { %v1192_v13 = vmax.f32 %v820_v7, 0.0  ;;  %v1242_v14 = vmax.f32 %v1020_v8, 0.0 }
 0x129   :  { %v824_v15 = vpop.f32.mrf.mxu0  ;;  %v1024_v16 = vpop.f32.mrf.mxu1 }
 0x12a   :  { %v2127_v17 = vpack.c.bf16 %v1192_v13, %v1191_v11  ;;  %v2252_v18 = vpack.c.bf16 %v1242_v14, %v1241_v12  ;;  %v825_v21 = vadd.f32 %v3006_v53, %v824_v15  ;;  %v1025_v22 = vadd.f32 %v3006_v53, %v1024_v16 }
 0x12b   :  { %v826_v19 = vpop.f32.mrf.mxu0  ;;  %v1026_v20 = vpop.f32.mrf.mxu1 }
 0x12c   :  { %2357 = vst [vmem:[%s3261_s3 + $0x20] sm:$0xff] %v2127_v17   ;;  %2382 = vst [vmem:[%s3261_s3 + $0xe8] sm:$0xff] %v2252_v18   ;;  %v1193_v29 = vmax.f32 %v825_v21, 0.0  ;;  %v1243_v30 = vmax.f32 %v1025_v22, 0.0 }
 0x12d   :  { %v827_v23 = vpop.f32.mrf.mxu0  ;;  %v1027_v24 = vpop.f32.mrf.mxu1 }
 0x12e   :  { %v828_v25 = vadd.f32 %v3006_v53, %v827_v23  ;;  %v1028_v26 = vadd.f32 %v3006_v53, %v1027_v24 }
 0x12f   :  { %v829_v27 = vpop.f32.mrf.mxu0  ;;  %v1029_v28 = vpop.f32.mrf.mxu1 }
 0x130   :  { %v1194_v31 = vmax.f32 %v828_v25, 0.0  ;;  %v1244_v32 = vmax.f32 %v1028_v26, 0.0 }
 0x131   :  { %v832_v33 = vpop.f32.mrf.mxu0  ;;  %v1032_v34 = vpop.f32.mrf.mxu1 }
 0x132   :  { %v2132_v35 = vpack.c.bf16 %v1194_v31, %v1193_v29  ;;  %v2257_v36 = vpack.c.bf16 %v1244_v32, %v1243_v30  ;;  %v833_v39 = vadd.f32 %v3006_v53, %v832_v33  ;;  %v1033_v40 = vadd.f32 %v3006_v53, %v1032_v34 }
 0x133   :  { %v834_v37 = vpop.f32.mrf.mxu0  ;;  %v1034_v38 = vpop.f32.mrf.mxu1 }
 0x134   :  { %2358 = vst [vmem:[%s3261_s3 + $0x28] sm:$0xff] %v2132_v35   ;;  %2383 = vst [vmem:[%s3261_s3 + $0xf0] sm:$0xff] %v2257_v36   ;;  %v1195_v47 = vmax.f32 %v833_v39, 0.0  ;;  %v1245_v48 = vmax.f32 %v1033_v40, 0.0 }
 0x135   :  { %v835_v41 = vpop.f32.mrf.mxu0  ;;  %v1035_v42 = vpop.f32.mrf.mxu1 }
 0x136   :  { %v836_v43 = vadd.f32 %v3006_v53, %v835_v41  ;;  %v1036_v44 = vadd.f32 %v3006_v53, %v1035_v42 }
 0x137   :  { %v837_v45 = vpop.f32.mrf.mxu0  ;;  %v1037_v46 = vpop.f32.mrf.mxu1 }
 0x138   :  { %v1196_v49 = vmax.f32 %v836_v43, 0.0  ;;  %v1246_v50 = vmax.f32 %v1036_v44, 0.0 }
 0x139   :  { %v840_v51 = vpop.f32.mrf.mxu0  ;;  %v1040_v52 = vpop.f32.mrf.mxu1 }
 0x13a   :  { %v2137_v54 = vpack.c.bf16 %v1196_v49, %v1195_v47  ;;  %v2262_v55 = vpack.c.bf16 %v1246_v50, %v1245_v48  ;;  %v841_v58 = vadd.f32 %v3006_v53, %v840_v51  ;;  %v1041_v59 = vadd.f32 %v3006_v53, %v1040_v52 }
 0x13b   :  { %v842_v56 = vpop.f32.mrf.mxu0  ;;  %v1042_v57 = vpop.f32.mrf.mxu1 }
 0x13c   :  { %2359 = vst [vmem:[%s3261_s3 + $0x30] sm:$0xff] %v2137_v54   ;;  %2384 = vst [vmem:[%s3261_s3 + $0xf8] sm:$0xff] %v2262_v55   ;;  %v1197_v2 = vmax.f32 %v841_v58, 0.0  ;;  %v1247_v3 = vmax.f32 %v1041_v59, 0.0 }
 0x13d   :  { %v843_v60 = vpop.f32.mrf.mxu0  ;;  %v1043_v61 = vpop.f32.mrf.mxu1 }
 0x13e   :  { %v844_v62 = vadd.f32 %v3006_v53, %v843_v60  ;;  %v1044_v63 = vadd.f32 %v3006_v53, %v1043_v61 }
 0x13f   :  { %v845_v0 = vpop.f32.mrf.mxu0  ;;  %v1045_v1 = vpop.f32.mrf.mxu1 }
 0x140   :  { %v1198_v4 = vmax.f32 %v844_v62, 0.0  ;;  %v1248_v5 = vmax.f32 %v1044_v63, 0.0 }
 0x141   :  { %v848_v6 = vpop.f32.mrf.mxu0  ;;  %v1048_v7 = vpop.f32.mrf.mxu1 }
 0x142   :  { %v2142_v8 = vpack.c.bf16 %v1198_v4, %v1197_v2  ;;  %v2267_v9 = vpack.c.bf16 %v1248_v5, %v1247_v3  ;;  %v849_v12 = vadd.f32 %v3006_v53, %v848_v6  ;;  %v1049_v13 = vadd.f32 %v3006_v53, %v1048_v7 }
 0x143   :  { %v850_v10 = vpop.f32.mrf.mxu0  ;;  %v1050_v11 = vpop.f32.mrf.mxu1 }
 0x144   :  { %2360 = vst [vmem:[%s3261_s3 + $0x38] sm:$0xff] %v2142_v8   ;;  %2385 = vst [vmem:[%s3261_s3 + $0x100] sm:$0xff] %v2267_v9   ;;  %v1199_v20 = vmax.f32 %v849_v12, 0.0  ;;  %v1249_v21 = vmax.f32 %v1049_v13, 0.0 }
 0x145   :  { %v851_v14 = vpop.f32.mrf.mxu0  ;;  %v1051_v15 = vpop.f32.mrf.mxu1 }
 0x146   :  { %v852_v16 = vadd.f32 %v3006_v53, %v851_v14  ;;  %v1052_v17 = vadd.f32 %v3006_v53, %v1051_v15 }
 0x147   :  { %v853_v18 = vpop.f32.mrf.mxu0  ;;  %v1053_v19 = vpop.f32.mrf.mxu1 }
 0x148   :  { %v1200_v22 = vmax.f32 %v852_v16, 0.0  ;;  %v1250_v23 = vmax.f32 %v1052_v17, 0.0 }
 0x149   :  { %v856_v24 = vpop.f32.mrf.mxu0  ;;  %v1056_v25 = vpop.f32.mrf.mxu1 }
 0x14a   :  { %v2147_v26 = vpack.c.bf16 %v1200_v22, %v1199_v20  ;;  %v2272_v27 = vpack.c.bf16 %v1250_v23, %v1249_v21  ;;  %v857_v30 = vadd.f32 %v3006_v53, %v856_v24  ;;  %v1057_v31 = vadd.f32 %v3006_v53, %v1056_v25 }
 0x14b   :  { %v858_v28 = vpop.f32.mrf.mxu0  ;;  %v1058_v29 = vpop.f32.mrf.mxu1 }
 0x14c   :  { %2361 = vst [vmem:[%s3261_s3 + $0x40] sm:$0xff] %v2147_v26   ;;  %2386 = vst [vmem:[%s3261_s3 + $0x108] sm:$0xff] %v2272_v27   ;;  %v1201_v38 = vmax.f32 %v857_v30, 0.0  ;;  %v1251_v39 = vmax.f32 %v1057_v31, 0.0 }
 0x14d   :  { %v859_v32 = vpop.f32.mrf.mxu0  ;;  %v1059_v33 = vpop.f32.mrf.mxu1 }
 0x14e   :  { %v860_v34 = vadd.f32 %v3006_v53, %v859_v32  ;;  %v1060_v35 = vadd.f32 %v3006_v53, %v1059_v33 }
 0x14f   :  { %v861_v36 = vpop.f32.mrf.mxu0  ;;  %v1061_v37 = vpop.f32.mrf.mxu1 }
 0x150   :  { %v1202_v40 = vmax.f32 %v860_v34, 0.0  ;;  %v1252_v41 = vmax.f32 %v1060_v35, 0.0 }
 0x151   :  { %v864_v42 = vpop.f32.mrf.mxu0  ;;  %v1064_v43 = vpop.f32.mrf.mxu1 }
 0x152   :  { %v2152_v44 = vpack.c.bf16 %v1202_v40, %v1201_v38  ;;  %v2277_v45 = vpack.c.bf16 %v1252_v41, %v1251_v39  ;;  %v865_v48 = vadd.f32 %v3006_v53, %v864_v42  ;;  %v1065_v49 = vadd.f32 %v3006_v53, %v1064_v43 }
 0x153   :  { %v866_v46 = vpop.f32.mrf.mxu0  ;;  %v1066_v47 = vpop.f32.mrf.mxu1 }
 0x154   :  { %2362 = vst [vmem:[%s3261_s3 + $0x48] sm:$0xff] %v2152_v44   ;;  %2387 = vst [vmem:[%s3261_s3 + $0x110] sm:$0xff] %v2277_v45   ;;  %v1203_v57 = vmax.f32 %v865_v48, 0.0  ;;  %v1253_v58 = vmax.f32 %v1065_v49, 0.0 }
 0x155   :  { %v867_v50 = vpop.f32.mrf.mxu0  ;;  %v1067_v51 = vpop.f32.mrf.mxu1 }
 0x156   :  { %v868_v52 = vadd.f32 %v3006_v53, %v867_v50  ;;  %v1068_v54 = vadd.f32 %v3006_v53, %v1067_v51 }
 0x157   :  { %v869_v55 = vpop.f32.mrf.mxu0  ;;  %v1069_v56 = vpop.f32.mrf.mxu1 }
 0x158   :  { %v1204_v59 = vmax.f32 %v868_v52, 0.0  ;;  %v1254_v60 = vmax.f32 %v1068_v54, 0.0 }
 0x159   :  { %v872_v61 = vpop.f32.mrf.mxu0  ;;  %v1072_v62 = vpop.f32.mrf.mxu1 }
 0x15a   :  { %v2157_v63 = vpack.c.bf16 %v1204_v59, %v1203_v57  ;;  %v2282_v0 = vpack.c.bf16 %v1254_v60, %v1253_v58  ;;  %v873_v3 = vadd.f32 %v3006_v53, %v872_v61  ;;  %v1073_v4 = vadd.f32 %v3006_v53, %v1072_v62 }
 0x15b   :  { %v874_v1 = vpop.f32.mrf.mxu0  ;;  %v1074_v2 = vpop.f32.mrf.mxu1 }
 0x15c   :  { %2363 = vst [vmem:[%s3261_s3 + $0x50] sm:$0xff] %v2157_v63   ;;  %2388 = vst [vmem:[%s3261_s3 + $0x118] sm:$0xff] %v2282_v0   ;;  %v1205_v11 = vmax.f32 %v873_v3, 0.0  ;;  %v1255_v12 = vmax.f32 %v1073_v4, 0.0 }
 0x15d   :  { %v875_v5 = vpop.f32.mrf.mxu0  ;;  %v1075_v6 = vpop.f32.mrf.mxu1 }
 0x15e   :  { %v876_v7 = vadd.f32 %v3006_v53, %v875_v5  ;;  %v1076_v8 = vadd.f32 %v3006_v53, %v1075_v6 }
 0x15f   :  { %v877_v9 = vpop.f32.mrf.mxu0  ;;  %v1077_v10 = vpop.f32.mrf.mxu1 }
 0x160   :  { %v1206_v13 = vmax.f32 %v876_v7, 0.0  ;;  %v1256_v14 = vmax.f32 %v1076_v8, 0.0 }
 0x161   :  { %v880_v15 = vpop.f32.mrf.mxu0  ;;  %v1080_v16 = vpop.f32.mrf.mxu1 }
 0x162   :  { %v2162_v17 = vpack.c.bf16 %v1206_v13, %v1205_v11  ;;  %v2287_v18 = vpack.c.bf16 %v1256_v14, %v1255_v12  ;;  %v881_v21 = vadd.f32 %v3006_v53, %v880_v15  ;;  %v1081_v22 = vadd.f32 %v3006_v53, %v1080_v16 }
 0x163   :  { %v882_v19 = vpop.f32.mrf.mxu0  ;;  %v1082_v20 = vpop.f32.mrf.mxu1 }
 0x164   :  { %2364 = vst [vmem:[%s3261_s3 + $0x58] sm:$0xff] %v2162_v17   ;;  %2389 = vst [vmem:[%s3261_s3 + $0x120] sm:$0xff] %v2287_v18   ;;  %v1207_v29 = vmax.f32 %v881_v21, 0.0  ;;  %v1257_v30 = vmax.f32 %v1081_v22, 0.0 }
 0x165   :  { %v883_v23 = vpop.f32.mrf.mxu0  ;;  %v1083_v24 = vpop.f32.mrf.mxu1 }
 0x166   :  { %v884_v25 = vadd.f32 %v3006_v53, %v883_v23  ;;  %v1084_v26 = vadd.f32 %v3006_v53, %v1083_v24 }
 0x167   :  { %v885_v27 = vpop.f32.mrf.mxu0  ;;  %v1085_v28 = vpop.f32.mrf.mxu1 }
 0x168   :  { %v1208_v31 = vmax.f32 %v884_v25, 0.0  ;;  %v1258_v32 = vmax.f32 %v1084_v26, 0.0 }
 0x169   :  { %v888_v33 = vpop.f32.mrf.mxu0  ;;  %v1088_v34 = vpop.f32.mrf.mxu1 }
 0x16a   :  { %v2167_v35 = vpack.c.bf16 %v1208_v31, %v1207_v29  ;;  %v2292_v36 = vpack.c.bf16 %v1258_v32, %v1257_v30  ;;  %v889_v39 = vadd.f32 %v3006_v53, %v888_v33  ;;  %v1089_v40 = vadd.f32 %v3006_v53, %v1088_v34 }
 0x16b   :  { %v890_v37 = vpop.f32.mrf.mxu0  ;;  %v1090_v38 = vpop.f32.mrf.mxu1 }
 0x16c   :  { %2365 = vst [vmem:[%s3261_s3 + $0x60] sm:$0xff] %v2167_v35   ;;  %2390 = vst [vmem:[%s3261_s3 + $0x128] sm:$0xff] %v2292_v36   ;;  %v1209_v47 = vmax.f32 %v889_v39, 0.0  ;;  %v1259_v48 = vmax.f32 %v1089_v40, 0.0 }
 0x16d   :  { %v891_v41 = vpop.f32.mrf.mxu0  ;;  %v1091_v42 = vpop.f32.mrf.mxu1 }
 0x16e   :  { %v892_v43 = vadd.f32 %v3006_v53, %v891_v41  ;;  %v1092_v44 = vadd.f32 %v3006_v53, %v1091_v42 }
 0x16f   :  { %v893_v45 = vpop.f32.mrf.mxu0  ;;  %v1093_v46 = vpop.f32.mrf.mxu1 }
 0x170   :  { %v1210_v49 = vmax.f32 %v892_v43, 0.0  ;;  %v1260_v50 = vmax.f32 %v1092_v44, 0.0 }
 0x171   :  { %v896_v51 = vpop.f32.mrf.mxu0  ;;  %v1096_v52 = vpop.f32.mrf.mxu1 }
 0x172   :  { %v2172_v54 = vpack.c.bf16 %v1210_v49, %v1209_v47  ;;  %v2297_v55 = vpack.c.bf16 %v1260_v50, %v1259_v48  ;;  %v897_v58 = vadd.f32 %v3006_v53, %v896_v51  ;;  %v1097_v59 = vadd.f32 %v3006_v53, %v1096_v52 }
 0x173   :  { %v898_v56 = vpop.f32.mrf.mxu0  ;;  %v1098_v57 = vpop.f32.mrf.mxu1 }
 0x174   :  { %2366 = vst [vmem:[%s3261_s3 + $0x68] sm:$0xff] %v2172_v54   ;;  %2391 = vst [vmem:[%s3261_s3 + $0x130] sm:$0xff] %v2297_v55   ;;  %v1211_v2 = vmax.f32 %v897_v58, 0.0  ;;  %v1261_v3 = vmax.f32 %v1097_v59, 0.0 }
 0x175   :  { %v899_v60 = vpop.f32.mrf.mxu0  ;;  %v1099_v61 = vpop.f32.mrf.mxu1 }
 0x176   :  { %v900_v62 = vadd.f32 %v3006_v53, %v899_v60  ;;  %v1100_v63 = vadd.f32 %v3006_v53, %v1099_v61 }
 0x177   :  { %v901_v0 = vpop.f32.mrf.mxu0  ;;  %v1101_v1 = vpop.f32.mrf.mxu1 }
 0x178   :  { %v1212_v4 = vmax.f32 %v900_v62, 0.0  ;;  %v1262_v5 = vmax.f32 %v1100_v63, 0.0 }
 0x179   :  { %v904_v6 = vpop.f32.mrf.mxu0  ;;  %v1104_v7 = vpop.f32.mrf.mxu1 }
 0x17a   :  { %v2177_v8 = vpack.c.bf16 %v1212_v4, %v1211_v2  ;;  %v2302_v9 = vpack.c.bf16 %v1262_v5, %v1261_v3  ;;  %v905_v12 = vadd.f32 %v3006_v53, %v904_v6  ;;  %v1105_v13 = vadd.f32 %v3006_v53, %v1104_v7 }
 0x17b   :  { %v906_v10 = vpop.f32.mrf.mxu0  ;;  %v1106_v11 = vpop.f32.mrf.mxu1 }
 0x17c   :  { %2367 = vst [vmem:[%s3261_s3 + $0x70] sm:$0xff] %v2177_v8   ;;  %2392 = vst [vmem:[%s3261_s3 + $0x138] sm:$0xff] %v2302_v9   ;;  %v1213_v20 = vmax.f32 %v905_v12, 0.0  ;;  %v1263_v21 = vmax.f32 %v1105_v13, 0.0 }
 0x17d   :  { %v907_v14 = vpop.f32.mrf.mxu0  ;;  %v1107_v15 = vpop.f32.mrf.mxu1 }
 0x17e   :  { %v908_v16 = vadd.f32 %v3006_v53, %v907_v14  ;;  %v1108_v17 = vadd.f32 %v3006_v53, %v1107_v15 }
 0x17f   :  { %v909_v18 = vpop.f32.mrf.mxu0  ;;  %v1109_v19 = vpop.f32.mrf.mxu1 }
 0x180   :  { %v1214_v22 = vmax.f32 %v908_v16, 0.0  ;;  %v1264_v23 = vmax.f32 %v1108_v17, 0.0 }
 0x181   :  { %v912_v24 = vpop.f32.mrf.mxu0  ;;  %v1112_v25 = vpop.f32.mrf.mxu1 }
 0x182   :  { %v2182_v26 = vpack.c.bf16 %v1214_v22, %v1213_v20  ;;  %v2307_v27 = vpack.c.bf16 %v1264_v23, %v1263_v21  ;;  %v913_v30 = vadd.f32 %v3006_v53, %v912_v24  ;;  %v1113_v31 = vadd.f32 %v3006_v53, %v1112_v25 }
 0x183   :  { %v914_v28 = vpop.f32.mrf.mxu0  ;;  %v1114_v29 = vpop.f32.mrf.mxu1 }
 0x184   :  { %2368 = vst [vmem:[%s3261_s3 + $0x78] sm:$0xff] %v2182_v26   ;;  %2393 = vst [vmem:[%s3261_s3 + $0x140] sm:$0xff] %v2307_v27   ;;  %v1215_v38 = vmax.f32 %v913_v30, 0.0  ;;  %v1265_v39 = vmax.f32 %v1113_v31, 0.0 }
 0x185   :  { %v915_v32 = vpop.f32.mrf.mxu0  ;;  %v1115_v33 = vpop.f32.mrf.mxu1 }
 0x186   :  { %v916_v34 = vadd.f32 %v3006_v53, %v915_v32  ;;  %v1116_v35 = vadd.f32 %v3006_v53, %v1115_v33 }
 0x187   :  { %v917_v36 = vpop.f32.mrf.mxu0  ;;  %v1117_v37 = vpop.f32.mrf.mxu1 }
 0x188   :  { %v1216_v40 = vmax.f32 %v916_v34, 0.0  ;;  %v1266_v41 = vmax.f32 %v1116_v35, 0.0 }
 0x189   :  { %v920_v42 = vpop.f32.mrf.mxu0  ;;  %v1120_v43 = vpop.f32.mrf.mxu1 }
 0x18a   :  { %v2187_v44 = vpack.c.bf16 %v1216_v40, %v1215_v38  ;;  %v2312_v45 = vpack.c.bf16 %v1266_v41, %v1265_v39  ;;  %v921_v48 = vadd.f32 %v3006_v53, %v920_v42  ;;  %v1121_v49 = vadd.f32 %v3006_v53, %v1120_v43 }
 0x18b   :  { %v922_v46 = vpop.f32.mrf.mxu0  ;;  %v1122_v47 = vpop.f32.mrf.mxu1 }
 0x18c   :  { %2369 = vst [vmem:[%s3261_s3 + $0x80] sm:$0xff] %v2187_v44   ;;  %2394 = vst [vmem:[%s3261_s3 + $0x148] sm:$0xff] %v2312_v45   ;;  %v1217_v57 = vmax.f32 %v921_v48, 0.0  ;;  %v1267_v58 = vmax.f32 %v1121_v49, 0.0 }
 0x18d   :  { %v923_v50 = vpop.f32.mrf.mxu0  ;;  %v1123_v51 = vpop.f32.mrf.mxu1 }
 0x18e   :  { %v924_v52 = vadd.f32 %v3006_v53, %v923_v50  ;;  %v1124_v54 = vadd.f32 %v3006_v53, %v1123_v51 }
 0x18f   :  { %v925_v55 = vpop.f32.mrf.mxu0  ;;  %v1125_v56 = vpop.f32.mrf.mxu1 }
 0x190   :  { %v1218_v59 = vmax.f32 %v924_v52, 0.0  ;;  %v1268_v60 = vmax.f32 %v1124_v54, 0.0 }
 0x191   :  { %v928_v61 = vpop.f32.mrf.mxu0  ;;  %v1128_v62 = vpop.f32.mrf.mxu1 }
 0x192   :  { %v2192_v63 = vpack.c.bf16 %v1218_v59, %v1217_v57  ;;  %v2317_v0 = vpack.c.bf16 %v1268_v60, %v1267_v58  ;;  %v929_v3 = vadd.f32 %v3006_v53, %v928_v61  ;;  %v1129_v4 = vadd.f32 %v3006_v53, %v1128_v62 }
 0x193   :  { %v930_v1 = vpop.f32.mrf.mxu0  ;;  %v1130_v2 = vpop.f32.mrf.mxu1 }
 0x194   :  { %2370 = vst [vmem:[%s3261_s3 + $0x88] sm:$0xff] %v2192_v63   ;;  %2395 = vst [vmem:[%s3261_s3 + $0x150] sm:$0xff] %v2317_v0   ;;  %v1219_v11 = vmax.f32 %v929_v3, 0.0  ;;  %v1269_v12 = vmax.f32 %v1129_v4, 0.0 }
 0x195   :  { %v931_v5 = vpop.f32.mrf.mxu0  ;;  %v1131_v6 = vpop.f32.mrf.mxu1 }
 0x196   :  { %v932_v7 = vadd.f32 %v3006_v53, %v931_v5  ;;  %v1132_v8 = vadd.f32 %v3006_v53, %v1131_v6 }
 0x197   :  { %v933_v9 = vpop.f32.mrf.mxu0  ;;  %v1133_v10 = vpop.f32.mrf.mxu1 }
 0x198   :  { %v1220_v13 = vmax.f32 %v932_v7, 0.0  ;;  %v1270_v14 = vmax.f32 %v1132_v8, 0.0 }
 0x199   :  { %v936_v15 = vpop.f32.mrf.mxu0  ;;  %v1136_v16 = vpop.f32.mrf.mxu1 }
 0x19a   :  { %v2197_v17 = vpack.c.bf16 %v1220_v13, %v1219_v11  ;;  %v2322_v18 = vpack.c.bf16 %v1270_v14, %v1269_v12  ;;  %v937_v21 = vadd.f32 %v3006_v53, %v936_v15  ;;  %v1137_v22 = vadd.f32 %v3006_v53, %v1136_v16 }
 0x19b   :  { %v938_v19 = vpop.f32.mrf.mxu0  ;;  %v1138_v20 = vpop.f32.mrf.mxu1 }
 0x19c   :  { %2371 = vst [vmem:[%s3261_s3 + $0x90] sm:$0xff] %v2197_v17   ;;  %2396 = vst [vmem:[%s3261_s3 + $0x158] sm:$0xff] %v2322_v18   ;;  %v1221_v29 = vmax.f32 %v937_v21, 0.0  ;;  %v1271_v30 = vmax.f32 %v1137_v22, 0.0 }
 0x19d   :  { %v939_v23 = vpop.f32.mrf.mxu0  ;;  %v1139_v24 = vpop.f32.mrf.mxu1 }
 0x19e   :  { %v940_v25 = vadd.f32 %v3006_v53, %v939_v23  ;;  %v1140_v26 = vadd.f32 %v3006_v53, %v1139_v24 }
 0x19f   :  { %v941_v27 = vpop.f32.mrf.mxu0  ;;  %v1141_v28 = vpop.f32.mrf.mxu1 }
 0x1a0   :  { %v1222_v31 = vmax.f32 %v940_v25, 0.0  ;;  %v1272_v32 = vmax.f32 %v1140_v26, 0.0 }
 0x1a1   :  { %v944_v33 = vpop.f32.mrf.mxu0  ;;  %v1144_v34 = vpop.f32.mrf.mxu1 }
 0x1a2   :  { %v2202_v35 = vpack.c.bf16 %v1222_v31, %v1221_v29  ;;  %v2327_v36 = vpack.c.bf16 %v1272_v32, %v1271_v30  ;;  %v945_v39 = vadd.f32 %v3006_v53, %v944_v33  ;;  %v1145_v40 = vadd.f32 %v3006_v53, %v1144_v34 }
 0x1a3   :  { %v946_v37 = vpop.f32.mrf.mxu0  ;;  %v1146_v38 = vpop.f32.mrf.mxu1 }
 0x1a4   :  { %2372 = vst [vmem:[%s3261_s3 + $0x98] sm:$0xff] %v2202_v35   ;;  %2397 = vst [vmem:[%s3261_s3 + $0x160] sm:$0xff] %v2327_v36   ;;  %v1223_v47 = vmax.f32 %v945_v39, 0.0  ;;  %v1273_v48 = vmax.f32 %v1145_v40, 0.0 }
 0x1a5   :  { %v947_v41 = vpop.f32.mrf.mxu0  ;;  %v1147_v42 = vpop.f32.mrf.mxu1 }
 0x1a6   :  { %v948_v43 = vadd.f32 %v3006_v53, %v947_v41  ;;  %v1148_v44 = vadd.f32 %v3006_v53, %v1147_v42 }
 0x1a7   :  { %v949_v45 = vpop.f32.mrf.mxu0  ;;  %v1149_v46 = vpop.f32.mrf.mxu1 }
 0x1a8   :  { %v1224_v49 = vmax.f32 %v948_v43, 0.0  ;;  %v1274_v50 = vmax.f32 %v1148_v44, 0.0 }
 0x1a9   :  { %v952_v51 = vpop.f32.mrf.mxu0  ;;  %v1152_v52 = vpop.f32.mrf.mxu1 }
 0x1aa   :  { %v2207_v54 = vpack.c.bf16 %v1224_v49, %v1223_v47  ;;  %v2332_v55 = vpack.c.bf16 %v1274_v50, %v1273_v48  ;;  %v953_v58 = vadd.f32 %v3006_v53, %v952_v51  ;;  %v1153_v59 = vadd.f32 %v3006_v53, %v1152_v52 }
 0x1ab   :  { %v954_v56 = vpop.f32.mrf.mxu0  ;;  %v1154_v57 = vpop.f32.mrf.mxu1 }
 0x1ac   :  { %2373 = vst [vmem:[%s3261_s3 + $0xa0] sm:$0xff] %v2207_v54   ;;  %2398 = vst [vmem:[%s3261_s3 + $0x168] sm:$0xff] %v2332_v55   ;;  %v1225_v2 = vmax.f32 %v953_v58, 0.0  ;;  %v1275_v3 = vmax.f32 %v1153_v59, 0.0 }
 0x1ad   :  { %v955_v60 = vpop.f32.mrf.mxu0  ;;  %v1155_v61 = vpop.f32.mrf.mxu1 }
 0x1ae   :  { %v956_v62 = vadd.f32 %v3006_v53, %v955_v60  ;;  %v1156_v63 = vadd.f32 %v3006_v53, %v1155_v61 }
 0x1af   :  { %v957_v0 = vpop.f32.mrf.mxu0  ;;  %v1157_v1 = vpop.f32.mrf.mxu1 }
 0x1b0   :  { %v1226_v4 = vmax.f32 %v956_v62, 0.0  ;;  %v1276_v5 = vmax.f32 %v1156_v63, 0.0 }
 0x1b1   :  { %v960_v6 = vpop.f32.mrf.mxu0  ;;  %v1160_v7 = vpop.f32.mrf.mxu1 }
 0x1b2   :  { %v2212_v8 = vpack.c.bf16 %v1226_v4, %v1225_v2  ;;  %v2337_v9 = vpack.c.bf16 %v1276_v5, %v1275_v3  ;;  %v961_v12 = vadd.f32 %v3006_v53, %v960_v6  ;;  %v1161_v13 = vadd.f32 %v3006_v53, %v1160_v7 }
 0x1b3   :  { %v962_v10 = vpop.f32.mrf.mxu0  ;;  %v1162_v11 = vpop.f32.mrf.mxu1 }
 0x1b4   :  { %2374 = vst [vmem:[%s3261_s3 + $0xa8] sm:$0xff] %v2212_v8   ;;  %2399 = vst [vmem:[%s3261_s3 + $0x170] sm:$0xff] %v2337_v9   ;;  %v1227_v20 = vmax.f32 %v961_v12, 0.0  ;;  %v1277_v21 = vmax.f32 %v1161_v13, 0.0 }
 0x1b5   :  { %v963_v14 = vpop.f32.mrf.mxu0  ;;  %v1163_v15 = vpop.f32.mrf.mxu1 }
 0x1b6   :  { %v964_v16 = vadd.f32 %v3006_v53, %v963_v14  ;;  %v1164_v17 = vadd.f32 %v3006_v53, %v1163_v15 }
 0x1b7   :  { %v965_v18 = vpop.f32.mrf.mxu0  ;;  %v1165_v19 = vpop.f32.mrf.mxu1 }
 0x1b8   :  { %v1228_v22 = vmax.f32 %v964_v16, 0.0  ;;  %v1278_v23 = vmax.f32 %v1164_v17, 0.0 }
 0x1b9   :  { %v968_v24 = vpop.f32.mrf.mxu0  ;;  %v1168_v25 = vpop.f32.mrf.mxu1 }
 0x1ba   :  { %v2217_v26 = vpack.c.bf16 %v1228_v22, %v1227_v20  ;;  %v2342_v27 = vpack.c.bf16 %v1278_v23, %v1277_v21  ;;  %v969_v30 = vadd.f32 %v3006_v53, %v968_v24  ;;  %v1169_v31 = vadd.f32 %v3006_v53, %v1168_v25 }
 0x1bb   :  { %v970_v28 = vpop.f32.mrf.mxu0  ;;  %v1170_v29 = vpop.f32.mrf.mxu1 }
 0x1bc   :  { %2375 = vst [vmem:[%s3261_s3 + $0xb0] sm:$0xff] %v2217_v26   ;;  %2400 = vst [vmem:[%s3261_s3 + $0x178] sm:$0xff] %v2342_v27   ;;  %v1229_v38 = vmax.f32 %v969_v30, 0.0  ;;  %v1279_v39 = vmax.f32 %v1169_v31, 0.0 }
 0x1bd   :  { %v971_v32 = vpop.f32.mrf.mxu0  ;;  %v1171_v33 = vpop.f32.mrf.mxu1 }
 0x1be   :  { %v972_v34 = vadd.f32 %v3006_v53, %v971_v32  ;;  %v1172_v35 = vadd.f32 %v3006_v53, %v1171_v33 }
 0x1bf   :  { %v973_v36 = vpop.f32.mrf.mxu0  ;;  %v1173_v37 = vpop.f32.mrf.mxu1 }
 0x1c0   :  { %v1230_v40 = vmax.f32 %v972_v34, 0.0  ;;  %v1280_v41 = vmax.f32 %v1172_v35, 0.0 }
 0x1c1   :  { %v976_v42 = vpop.f32.mrf.mxu0  ;;  %v1176_v43 = vpop.f32.mrf.mxu1 }
 0x1c2   :  { %v2222_v44 = vpack.c.bf16 %v1230_v40, %v1229_v38  ;;  %v2347_v45 = vpack.c.bf16 %v1280_v41, %v1279_v39  ;;  %v977_v48 = vadd.f32 %v3006_v53, %v976_v42  ;;  %v1177_v49 = vadd.f32 %v3006_v53, %v1176_v43 }
 0x1c3   :  { %v978_v46 = vpop.f32.mrf.mxu0  ;;  %v1178_v47 = vpop.f32.mrf.mxu1 }
 0x1c4   :  { %2376 = vst [vmem:[%s3261_s3 + $0xb8] sm:$0xff] %v2222_v44   ;;  %2401 = vst [vmem:[%s3261_s3 + $0x180] sm:$0xff] %v2347_v45   ;;  %v1231_v57 = vmax.f32 %v977_v48, 0.0  ;;  %v1281_v58 = vmax.f32 %v1177_v49, 0.0 }
 0x1c5   :  { %v979_v50 = vpop.f32.mrf.mxu0  ;;  %v1179_v51 = vpop.f32.mrf.mxu1 }
 0x1c6   :  { %v980_v52 = vadd.f32 %v3006_v53, %v979_v50  ;;  %v1180_v54 = vadd.f32 %v3006_v53, %v1179_v51 }
 0x1c7   :  { %v981_v55 = vpop.f32.mrf.mxu0  ;;  %v1181_v56 = vpop.f32.mrf.mxu1 }
 0x1c8   :  { %v1232_v59 = vmax.f32 %v980_v52, 0.0  ;;  %v1282_v60 = vmax.f32 %v1180_v54, 0.0 }
 0x1ca   :  { %v2227_v61 = vpack.c.bf16 %v1232_v59, %v1231_v57  ;;  %v2352_v62 = vpack.c.bf16 %v1282_v60, %v1281_v58 }
 0x1cc   :  { %2377 = vst [vmem:[%s3261_s3 + $0xc0] sm:$0xff] %v2227_v61   ;;  %2402 = vst [vmem:[%s3261_s3 + $0x188] sm:$0xff] %v2352_v62  }

// kernel: dqn_forward.5
= control target key start
LH: loop header
LB: loop body
LE: loop exit
PB: predicated region body
PF: predicated region fallthrough
CT: control target
= control target key end

     0   :  { %s1644_s1 = inlined_call_operand.vmem [shape: bf16[512,128], index: 1, kind: input, shape index: {}]   ;;  %s1645_s0 = inlined_call_operand.vmem [shape: bf16[162,512], index: 0, kind: input, shape index: {}]   ;;  %s1646_s2 = inlined_call_operand.vmem [shape: f32[1,128], index: 2, kind: input, shape index: {}]   ;;  %s1647_s3 = inlined_call_operand.vmem [shape: bf16[162,128], index: 3, kind: output, shape index: {}]  }
   0x1   :  { %v1247_v0 = vld [vmem:[%s1644_s1 + $0x78] sm:$0xff]   ;;  %v1251_v4 = vld [vmem:[%s1644_s1 + $0x70] sm:$0xff]   ;;  %v1255_v8 = vld [vmem:[%s1644_s1 + $0x68] sm:$0xff]  }
   0x2   :  { %v1248_v1 = vld [vmem:[%s1644_s1 + $0xf8] sm:$0xff]   ;;  %1083 = vmatprep.subr.bf16.mxu0 %v1247_v0  ;;  %v1252_v5 = vld [vmem:[%s1644_s1 + $0xf0] sm:$0xff]   ;;  %v1256_v9 = vld [vmem:[%s1644_s1 + $0xe8] sm:$0xff]  }
   0x3   :  { %v1249_v2 = vld [vmem:[%s1644_s1 + $0x38] sm:$0xff]   ;;  %1165 = vmatprep.subr.bf16.mxu1 %v1248_v1  ;;  %v1253_v6 = vld [vmem:[%s1644_s1 + $0x30] sm:$0xff]   ;;  %v1257_v10 = vld [vmem:[%s1644_s1 + $0x28] sm:$0xff]  }
   0x4   :  { %v1250_v3 = vld [vmem:[%s1644_s1 + $0xb8] sm:$0xff]   ;;  %1084 = vmatpush3.bf16.msra.mxu0 %v1249_v2  ;;  %v1254_v7 = vld [vmem:[%s1644_s1 + $0xb0] sm:$0xff]   ;;  %v1258_v11 = vld [vmem:[%s1644_s1 + $0xa8] sm:$0xff]  }
   0x5   :  { %1166 = vmatpush3.bf16.msra.mxu1 %v1250_v3  ;;  %1085 = vmatprep.subr.bf16.mxu0 %v1251_v4  ;;  %v1259_v12 = vld [vmem:[%s1644_s1 + $0x60] sm:$0xff]   ;;  %v1263_v16 = vld [vmem:[%s1644_s1 + $0x58] sm:$0xff]   ;;  %v1267_v20 = vld [vmem:[%s1644_s1 + $0x50] sm:$0xff]  }
   0x6   :  { %1167 = vmatprep.subr.bf16.mxu1 %v1252_v5  ;;  %v1260_v13 = vld [vmem:[%s1644_s1 + $0xe0] sm:$0xff]   ;;  %v1264_v17 = vld [vmem:[%s1644_s1 + $0xd8] sm:$0xff]   ;;  %v1268_v21 = vld [vmem:[%s1644_s1 + $0xd0] sm:$0xff]  }
   0x7   :  { %v1261_v14 = vld [vmem:[%s1644_s1 + $0x20] sm:$0xff]   ;;  %v1265_v18 = vld [vmem:[%s1644_s1 + $0x18] sm:$0xff]   ;;  %v1269_v22 = vld [vmem:[%s1644_s1 + $0x10] sm:$0xff]  }
   0x8   :  { %1086 = vmatpush3.bf16.msra.mxu0 %v1253_v6  ;;  %v1262_v15 = vld [vmem:[%s1644_s1 + $0xa0] sm:$0xff]   ;;  %v1266_v19 = vld [vmem:[%s1644_s1 + $0x98] sm:$0xff]   ;;  %v1270_v23 = vld [vmem:[%s1644_s1 + $0x90] sm:$0xff]  }
   0x9   :  { %1168 = vmatpush3.bf16.msra.mxu1 %v1254_v7  ;;  %1087 = vmatprep.subr.bf16.mxu0 %v1255_v8  ;;  %v1271_v24 = vld [vmem:[%s1644_s1 + $0x48] sm:$0xff]   ;;  %v1275_v28 = vld [vmem:[%s1644_s1 + $0x40] sm:$0xff]  }
   0xa   :  { %1169 = vmatprep.subr.bf16.mxu1 %v1256_v9  ;;  %v1272_v25 = vld [vmem:[%s1644_s1 + $0xc8] sm:$0xff]   ;;  %v1276_v29 = vld [vmem:[%s1644_s1 + $0xc0] sm:$0xff]  }
   0xb   :  { %v1273_v26 = vld [vmem:[%s1644_s1 + $0x8] sm:$0xff]   ;;  %v1277_v30 = vld [vmem:[%s1644_s1] sm:$0xff]  }
   0xc   :  { %1088 = vmatpush3.bf16.msra.mxu0 %v1257_v10  ;;  %v1274_v27 = vld [vmem:[%s1644_s1 + $0x88] sm:$0xff]   ;;  %v1278_v31 = vld [vmem:[%s1644_s1 + $0x80] sm:$0xff]  }
   0xd   :  { %1170 = vmatpush3.bf16.msra.mxu1 %v1258_v11  ;;  %1089 = vmatprep.subr.bf16.mxu0 %v1259_v12  ;;  %v1279_v32 = vld [vmem:[%s1645_s0] ss:$16 sps:$4 sm:$0xff]   ;;  %v1281_v33 = vld [vmem:[%s1645_s0 + $0x4] ss:$16 sps:$4 sm:$0xff]   ;;  %v1282_v34 = vld [vmem:[%s1645_s0 + $0x8] ss:$16 sps:$4 sm:$0xff]  }
   0xe   :  { %1171 = vmatprep.subr.bf16.mxu1 %v1260_v13  ;;  %v1284_v35 = vld [vmem:[%s1645_s0 + $0xc] ss:$16 sps:$4 sm:$0xff]   ;;  %566 = vmatprep.mubr.bf16.mxu0 %v1281_v33  ;;  %v1285_v36 = vld [vmem:[%s1645_s0 + $0x24] ss:$16 sps:$4 sm:$0xff]   ;;  %v1289_v38 = vld [vmem:[%s1645_s0 + $0x20] ss:$16 sps:$4 sm:$0xff]  }
   0xf   :  { %686 = vmatprep.mubr.bf16.mxu1 %v1284_v35  ;;  %v1287_v37 = vld [vmem:[%s1645_s0 + $0x2c] ss:$16 sps:$4 sm:$0xff]   ;;  %v1290_v39 = vld [vmem:[%s1645_s0 + $0x28] ss:$16 sps:$4 sm:$0xff]   ;;  %v1291_v40 = vld [vmem:[%s1645_s0 + $0x44] ss:$16 sps:$4 sm:$0xff]  }
  0x10   :  { %1090 = vmatpush3.bf16.msra.mxu0 %v1261_v14  ;;  %v1293_v41 = vld [vmem:[%s1645_s0 + $0x4c] ss:$16 sps:$4 sm:$0xff]   ;;  %v1295_v42 = vld [vmem:[%s1645_s0 + $0x40] ss:$16 sps:$4 sm:$0xff]   ;;  %v1296_v43 = vld [vmem:[%s1645_s0 + $0x48] ss:$16 sps:$4 sm:$0xff]  }
  0x11   :  { %1172 = vmatpush3.bf16.msra.mxu1 %v1262_v15  ;;  %1091 = vmatprep.subr.bf16.mxu0 %v1263_v16  ;;  %v1297_v44 = vld [vmem:[%s1645_s0 + $0x64] ss:$16 sps:$4 sm:$0xff]   ;;  %v1299_v45 = vld [vmem:[%s1645_s0 + $0x6c] ss:$16 sps:$4 sm:$0xff]   ;;  %v1301_v46 = vld [vmem:[%s1645_s0 + $0x60] ss:$16 sps:$4 sm:$0xff]  }
  0x12   :  { %1173 = vmatprep.subr.bf16.mxu1 %v1264_v17  ;;  %v1302_v47 = vld [vmem:[%s1645_s0 + $0x68] ss:$16 sps:$4 sm:$0xff]   ;;  %v1303_v48 = vld [vmem:[%s1645_s0 + $0x84] ss:$16 sps:$4 sm:$0xff]   ;;  %v1305_v49 = vld [vmem:[%s1645_s0 + $0x8c] ss:$16 sps:$4 sm:$0xff]  }
  0x13   :  { %v1307_v50 = vld [vmem:[%s1645_s0 + $0x80] ss:$16 sps:$4 sm:$0xff]   ;;  %v1308_v51 = vld [vmem:[%s1645_s0 + $0x88] ss:$16 sps:$4 sm:$0xff]   ;;  %v1309_v52 = vld [vmem:[%s1645_s0 + $0xa4] ss:$16 sps:$4 sm:$0xff]  }
  0x14   :  { %1092 = vmatpush3.bf16.msra.mxu0 %v1265_v18  ;;  %v1311_v53 = vld [vmem:[%s1645_s0 + $0xac] ss:$16 sps:$4 sm:$0xff]   ;;  %v1313_v54 = vld [vmem:[%s1645_s0 + $0xa0] ss:$16 sps:$4 sm:$0xff]   ;;  %v1314_v55 = vld [vmem:[%s1645_s0 + $0xa8] ss:$16 sps:$4 sm:$0xff]  }
  0x15   :  { %1174 = vmatpush3.bf16.msra.mxu1 %v1266_v19  ;;  %1093 = vmatprep.subr.bf16.mxu0 %v1267_v20  ;;  %v1315_v56 = vld [vmem:[%s1645_s0 + $0xc4] ss:$16 sps:$4 sm:$0xff]   ;;  %v1317_v57 = vld [vmem:[%s1645_s0 + $0xcc] ss:$16 sps:$4 sm:$0xff]   ;;  %v1319_v58 = vld [vmem:[%s1645_s0 + $0xc0] ss:$16 sps:$4 sm:$0xff]  }
  0x16   :  { %1175 = vmatprep.subr.bf16.mxu1 %v1268_v21  ;;  %v1320_v59 = vld [vmem:[%s1645_s0 + $0xc8] ss:$16 sps:$4 sm:$0xff]   ;;  %v1321_v60 = vld [vmem:[%s1645_s0 + $0xe4] ss:$16 sps:$4 sm:$0xff]   ;;  %v1323_v61 = vld [vmem:[%s1645_s0 + $0xec] ss:$16 sps:$4 sm:$0xff]  }
  0x17   :  { %v1325_v62 = vld [vmem:[%s1645_s0 + $0xe0] ss:$16 sps:$4 sm:$0xff]   ;;  %v1326_v63 = vld [vmem:[%s1645_s0 + $0xe8] ss:$16 sps:$4 sm:$0xff]   ;;  %v1327_v0 = vld [vmem:[%s1645_s0 + $0x104] ss:$16 sps:$4 sm:$0xff]  }
  0x18   :  { %1094 = vmatpush3.bf16.msra.mxu0 %v1269_v22  ;;  %v1329_v1 = vld [vmem:[%s1645_s0 + $0x10c] ss:$16 sps:$4 sm:$0xff]   ;;  %v1331_v2 = vld [vmem:[%s1645_s0 + $0x100] ss:$16 sps:$4 sm:$0xff]   ;;  %v1332_v3 = vld [vmem:[%s1645_s0 + $0x108] ss:$16 sps:$4 sm:$0xff]  }
  0x19   :  { %1176 = vmatpush3.bf16.msra.mxu1 %v1270_v23  ;;  %1095 = vmatprep.subr.bf16.mxu0 %v1271_v24  ;;  %v1333_v4 = vld [vmem:[%s1645_s0 + $0x124] ss:$16 sps:$4 sm:$0xff]   ;;  %v1335_v5 = vld [vmem:[%s1645_s0 + $0x12c] ss:$16 sps:$4 sm:$0xff]   ;;  %v1337_v8 = vld [vmem:[%s1645_s0 + $0x120] ss:$16 sps:$4 sm:$0xff]  }
  0x1a   :  { %1177 = vmatprep.subr.bf16.mxu1 %v1272_v25  ;;  %v55_v6 = vld [vmem:[%s1645_s0 + $0x140] sm:$0x11]  ;;  %v56_v7 = vld [vmem:[%s1645_s0 + $0x148] sm:$0x11] }
  0x1b   :  { %v1338_v9 = vld [vmem:[%s1645_s0 + $0x128] ss:$16 sps:$4 sm:$0xff]   ;;  %v947_v10 = vcombine.high %v55_v6, %v55_v6  ;;  %v949_v11 = vcombine.high %v56_v7, %v56_v7  ;;  %v946_v12 = vcombine.low %v55_v6, %v55_v6  ;;  %v948_v13 = vcombine.low %v56_v7, %v56_v7  ;;  %v1588_v16 = vld [vmem:[%s1646_s2] ss:$0 sm:$0xff] }
  0x1c   :  { %1096 = vmatpush3.bf16.msra.mxu0 %v1273_v26 }
  0x1d   :  { %1178 = vmatpush3.bf16.msra.mxu1 %v1274_v27  ;;  %1097 = vmatprep.subr.bf16.mxu0 %v1275_v28 }
  0x1e   :  { %1179 = vmatprep.subr.bf16.mxu1 %v1276_v29 }
  0x20   :  { %1098 = vmatpush3.bf16.msra.mxu0 %v1277_v30 }
  0x21   :  { %1180 = vmatpush3.bf16.msra.mxu1 %v1278_v31 }
  0x23   :  { %567 = vmatmul.mubr.bf16.vlgmr.msra.gmra.mxu0 %v1279_v32 }
  0x24   :  { %687 = vmatmul.mubr.bf16.vlgmr.msra.gmra.mxu1 %v1282_v34  ;;  %574 = vmatprep.mubr.bf16.mxu0 %v1285_v36 }
  0x25   :  { %694 = vmatprep.mubr.bf16.mxu1 %v1287_v37 }
  0x2b   :  { %575 = vmatmul.mubr.bf16.gmra.mxu0 %v1289_v38 }
  0x2c   :  { %695 = vmatmul.mubr.bf16.gmra.mxu1 %v1290_v39  ;;  %582 = vmatprep.mubr.bf16.mxu0 %v1291_v40 }
  0x2d   :  { %702 = vmatprep.mubr.bf16.mxu1 %v1293_v41 }
  0x33   :  { %583 = vmatmul.mubr.bf16.gmra.mxu0 %v1295_v42 }
  0x34   :  { %703 = vmatmul.mubr.bf16.gmra.mxu1 %v1296_v43  ;;  %590 = vmatprep.mubr.bf16.mxu0 %v1297_v44 }
  0x35   :  { %710 = vmatprep.mubr.bf16.mxu1 %v1299_v45 }
  0x3b   :  { %591 = vmatmul.mubr.bf16.gmra.mxu0 %v1301_v46 }
  0x3c   :  { %711 = vmatmul.mubr.bf16.gmra.mxu1 %v1302_v47  ;;  %598 = vmatprep.mubr.bf16.mxu0 %v1303_v48 }
  0x3d   :  { %718 = vmatprep.mubr.bf16.mxu1 %v1305_v49 }
  0x43   :  { %599 = vmatmul.mubr.bf16.gmra.mxu0 %v1307_v50 }
  0x44   :  { %719 = vmatmul.mubr.bf16.gmra.mxu1 %v1308_v51  ;;  %606 = vmatprep.mubr.bf16.mxu0 %v1309_v52 }
  0x45   :  { %726 = vmatprep.mubr.bf16.mxu1 %v1311_v53 }
  0x4b   :  { %607 = vmatmul.mubr.bf16.gmra.mxu0 %v1313_v54 }
  0x4c   :  { %727 = vmatmul.mubr.bf16.gmra.mxu1 %v1314_v55  ;;  %614 = vmatprep.mubr.bf16.mxu0 %v1315_v56 }
  0x4d   :  { %734 = vmatprep.mubr.bf16.mxu1 %v1317_v57 }
  0x53   :  { %615 = vmatmul.mubr.bf16.gmra.mxu0 %v1319_v58 }
  0x54   :  { %735 = vmatmul.mubr.bf16.gmra.mxu1 %v1320_v59  ;;  %622 = vmatprep.mubr.bf16.mxu0 %v1321_v60 }
  0x55   :  { %742 = vmatprep.mubr.bf16.mxu1 %v1323_v61 }
  0x5b   :  { %623 = vmatmul.mubr.bf16.gmra.mxu0 %v1325_v62 }
  0x5c   :  { %743 = vmatmul.mubr.bf16.gmra.mxu1 %v1326_v63  ;;  %630 = vmatprep.mubr.bf16.mxu0 %v1327_v0 }
  0x5d   :  { %750 = vmatprep.mubr.bf16.mxu1 %v1329_v1 }
  0x63   :  { %631 = vmatmul.mubr.bf16.gmra.mxu0 %v1331_v2 }
  0x64   :  { %751 = vmatmul.mubr.bf16.gmra.mxu1 %v1332_v3  ;;  %638 = vmatprep.mubr.bf16.mxu0 %v1333_v4 }
  0x65   :  { %758 = vmatprep.mubr.bf16.mxu1 %v1335_v5 }
  0x6b   :  { %639 = vmatmul.mubr.bf16.gmra.mxu0 %v1337_v8 }
  0x6c   :  { %759 = vmatmul.mubr.bf16.gmra.mxu1 %v1338_v9  ;;  %646 = vmatprep.mubr.bf16.mxu0 %v947_v10 }
  0x6d   :  { %766 = vmatprep.mubr.bf16.mxu1 %v949_v11 }
  0x73   :  { %647 = vmatmul.mubr.bf16.gmra.mxu0 %v946_v12 }
  0x74   :  { %767 = vmatmul.mubr.bf16.gmra.mxu1 %v948_v13 }
  0xe3   :  { %v1099_v14 = vpop.f32.mrf.mxu0 }
  0xe4   :  { %v1181_v15 = vpop.f32.mrf.mxu1 }
  0xe5   :  { %v1100_v17 = vpop.f32.mrf.mxu0 }
  0xe6   :  { %v1101_v18 = vadd.f32 %v1100_v17, %v1099_v14  ;;  %v1182_v19 = vpop.f32.mrf.mxu1 }
  0xe7   :  { %v1102_v20 = vpop.f32.mrf.mxu0  ;;  %v1183_v24 = vadd.f32 %v1182_v19, %v1181_v15 }
  0xe8   :  { %v569_v21 = vadd.f32 %v1101_v18, %v1588_v16  ;;  %v1184_v22 = vpop.f32.mrf.mxu1 }
  0xe9   :  { %v1103_v23 = vpop.f32.mrf.mxu0 }
  0xea   :  { %v1104_v25 = vadd.f32 %v1103_v23, %v1102_v20  ;;  %v1185_v26 = vpop.f32.mrf.mxu1  ;;  %v689_v28 = vadd.f32 %v1183_v24, %v569_v21 }
  0xeb   :  { %v1105_v27 = vpop.f32.mrf.mxu0  ;;  %v1186_v30 = vadd.f32 %v1185_v26, %v1184_v22 }
  0xec   :  { %v572_v29 = vadd.f32 %v1104_v25, %v1588_v16  ;;  %v1187_v31 = vpop.f32.mrf.mxu1  ;;  %v774_v37 = vmax.f32 %v689_v28, 0.0 }
  0xed   :  { %v1106_v32 = vpop.f32.mrf.mxu0 }
  0xee   :  { %v692_v33 = vadd.f32 %v1186_v30, %v572_v29  ;;  %v1107_v34 = vadd.f32 %v1106_v32, %v1105_v27  ;;  %v1188_v35 = vpop.f32.mrf.mxu1 }
  0xef   :  { %v1108_v36 = vpop.f32.mrf.mxu0  ;;  %v1189_v43 = vadd.f32 %v1188_v35, %v1187_v31 }
  0xf0   :  { %v775_v38 = vmax.f32 %v692_v33, 0.0  ;;  %v577_v39 = vadd.f32 %v1107_v34, %v1588_v16  ;;  %v1190_v40 = vpop.f32.mrf.mxu1 }
  0xf1   :  { %v1109_v41 = vpop.f32.mrf.mxu0 }
  0xf2   :  { %v1027_v42 = vpack.c.bf16 %v775_v38, %v774_v37  ;;  %v1110_v44 = vadd.f32 %v1109_v41, %v1108_v36  ;;  %v1191_v45 = vpop.f32.mrf.mxu1  ;;  %v697_v47 = vadd.f32 %v1189_v43, %v577_v39 }
  0xf3   :  { %v1111_v46 = vpop.f32.mrf.mxu0  ;;  %v1192_v49 = vadd.f32 %v1191_v45, %v1190_v40 }
  0xf4   :  { %1028 = vst [vmem:[%s1647_s3] sm:$0xff] %v1027_v42   ;;  %v580_v48 = vadd.f32 %v1110_v44, %v1588_v16  ;;  %v1193_v50 = vpop.f32.mrf.mxu1  ;;  %v776_v56 = vmax.f32 %v697_v47, 0.0 }
  0xf5   :  { %v1112_v51 = vpop.f32.mrf.mxu0 }
  0xf6   :  { %v700_v52 = vadd.f32 %v1192_v49, %v580_v48  ;;  %v1113_v53 = vadd.f32 %v1112_v51, %v1111_v46  ;;  %v1194_v54 = vpop.f32.mrf.mxu1 }
  0xf7   :  { %v1114_v55 = vpop.f32.mrf.mxu0  ;;  %v1195_v62 = vadd.f32 %v1194_v54, %v1193_v50 }
  0xf8   :  { %v777_v57 = vmax.f32 %v700_v52, 0.0  ;;  %v585_v58 = vadd.f32 %v1113_v53, %v1588_v16  ;;  %v1196_v59 = vpop.f32.mrf.mxu1 }
  0xf9   :  { %v1115_v60 = vpop.f32.mrf.mxu0 }
  0xfa   :  { %v1032_v61 = vpack.c.bf16 %v777_v57, %v776_v56  ;;  %v1116_v63 = vadd.f32 %v1115_v60, %v1114_v55  ;;  %v1197_v0 = vpop.f32.mrf.mxu1  ;;  %v705_v2 = vadd.f32 %v1195_v62, %v585_v58 }
  0xfb   :  { %v1117_v1 = vpop.f32.mrf.mxu0  ;;  %v1198_v4 = vadd.f32 %v1197_v0, %v1196_v59 }
  0xfc   :  { %1074 = vst [vmem:[%s1647_s3 + $0x8] sm:$0xff] %v1032_v61   ;;  %v588_v3 = vadd.f32 %v1116_v63, %v1588_v16  ;;  %v1199_v5 = vpop.f32.mrf.mxu1  ;;  %v778_v11 = vmax.f32 %v705_v2, 0.0 }
  0xfd   :  { %v1118_v6 = vpop.f32.mrf.mxu0 }
  0xfe   :  { %v708_v7 = vadd.f32 %v1198_v4, %v588_v3  ;;  %v1119_v8 = vadd.f32 %v1118_v6, %v1117_v1  ;;  %v1200_v9 = vpop.f32.mrf.mxu1 }
  0xff   :  { %v1120_v10 = vpop.f32.mrf.mxu0  ;;  %v1201_v18 = vadd.f32 %v1200_v9, %v1199_v5 }
 0x100   :  { %v779_v12 = vmax.f32 %v708_v7, 0.0  ;;  %v593_v13 = vadd.f32 %v1119_v8, %v1588_v16  ;;  %v1202_v14 = vpop.f32.mrf.mxu1 }
 0x101   :  { %v1121_v15 = vpop.f32.mrf.mxu0 }
 0x102   :  { %v1037_v17 = vpack.c.bf16 %v779_v12, %v778_v11  ;;  %v1122_v19 = vadd.f32 %v1121_v15, %v1120_v10  ;;  %v1203_v20 = vpop.f32.mrf.mxu1  ;;  %v713_v22 = vadd.f32 %v1201_v18, %v593_v13 }
 0x103   :  { %v1123_v21 = vpop.f32.mrf.mxu0  ;;  %v1204_v24 = vadd.f32 %v1203_v20, %v1202_v14 }
 0x104   :  { %1075 = vst [vmem:[%s1647_s3 + $0x10] sm:$0xff] %v1037_v17   ;;  %v596_v23 = vadd.f32 %v1122_v19, %v1588_v16  ;;  %v1205_v25 = vpop.f32.mrf.mxu1  ;;  %v780_v31 = vmax.f32 %v713_v22, 0.0 }
 0x105   :  { %v1124_v26 = vpop.f32.mrf.mxu0 }
 0x106   :  { %v716_v27 = vadd.f32 %v1204_v24, %v596_v23  ;;  %v1125_v28 = vadd.f32 %v1124_v26, %v1123_v21  ;;  %v1206_v29 = vpop.f32.mrf.mxu1 }
 0x107   :  { %v1126_v30 = vpop.f32.mrf.mxu0  ;;  %v1207_v37 = vadd.f32 %v1206_v29, %v1205_v25 }
 0x108   :  { %v781_v32 = vmax.f32 %v716_v27, 0.0  ;;  %v601_v33 = vadd.f32 %v1125_v28, %v1588_v16  ;;  %v1208_v34 = vpop.f32.mrf.mxu1 }
 0x109   :  { %v1127_v35 = vpop.f32.mrf.mxu0 }
 0x10a   :  { %v1042_v36 = vpack.c.bf16 %v781_v32, %v780_v31  ;;  %v1128_v38 = vadd.f32 %v1127_v35, %v1126_v30  ;;  %v1209_v39 = vpop.f32.mrf.mxu1  ;;  %v721_v41 = vadd.f32 %v1207_v37, %v601_v33 }
 0x10b   :  { %v1129_v40 = vpop.f32.mrf.mxu0  ;;  %v1210_v43 = vadd.f32 %v1209_v39, %v1208_v34 }
 0x10c   :  { %1076 = vst [vmem:[%s1647_s3 + $0x18] sm:$0xff] %v1042_v36   ;;  %v604_v42 = vadd.f32 %v1128_v38, %v1588_v16  ;;  %v1211_v44 = vpop.f32.mrf.mxu1  ;;  %v782_v50 = vmax.f32 %v721_v41, 0.0 }
 0x10d   :  { %v1130_v45 = vpop.f32.mrf.mxu0 }
 0x10e   :  { %v724_v46 = vadd.f32 %v1210_v43, %v604_v42  ;;  %v1131_v47 = vadd.f32 %v1130_v45, %v1129_v40  ;;  %v1212_v48 = vpop.f32.mrf.mxu1 }
 0x10f   :  { %v1132_v49 = vpop.f32.mrf.mxu0  ;;  %v1213_v56 = vadd.f32 %v1212_v48, %v1211_v44 }
 0x110   :  { %v783_v51 = vmax.f32 %v724_v46, 0.0  ;;  %v609_v52 = vadd.f32 %v1131_v47, %v1588_v16  ;;  %v1214_v53 = vpop.f32.mrf.mxu1 }
 0x111   :  { %v1133_v54 = vpop.f32.mrf.mxu0 }
 0x112   :  { %v1047_v55 = vpack.c.bf16 %v783_v51, %v782_v50  ;;  %v1134_v57 = vadd.f32 %v1133_v54, %v1132_v49  ;;  %v1215_v58 = vpop.f32.mrf.mxu1  ;;  %v729_v60 = vadd.f32 %v1213_v56, %v609_v52 }
 0x113   :  { %v1135_v59 = vpop.f32.mrf.mxu0  ;;  %v1216_v62 = vadd.f32 %v1215_v58, %v1214_v53 }
 0x114   :  { %1077 = vst [vmem:[%s1647_s3 + $0x20] sm:$0xff] %v1047_v55   ;;  %v612_v61 = vadd.f32 %v1134_v57, %v1588_v16  ;;  %v1217_v63 = vpop.f32.mrf.mxu1  ;;  %v784_v5 = vmax.f32 %v729_v60, 0.0 }
 0x115   :  { %v1136_v0 = vpop.f32.mrf.mxu0 }
 0x116   :  { %v732_v1 = vadd.f32 %v1216_v62, %v612_v61  ;;  %v1137_v2 = vadd.f32 %v1136_v0, %v1135_v59  ;;  %v1218_v3 = vpop.f32.mrf.mxu1 }
 0x117   :  { %v1138_v4 = vpop.f32.mrf.mxu0  ;;  %v1219_v11 = vadd.f32 %v1218_v3, %v1217_v63 }
 0x118   :  { %v785_v6 = vmax.f32 %v732_v1, 0.0  ;;  %v617_v7 = vadd.f32 %v1137_v2, %v1588_v16  ;;  %v1220_v8 = vpop.f32.mrf.mxu1 }
 0x119   :  { %v1139_v9 = vpop.f32.mrf.mxu0 }
 0x11a   :  { %v1052_v10 = vpack.c.bf16 %v785_v6, %v784_v5  ;;  %v1140_v12 = vadd.f32 %v1139_v9, %v1138_v4  ;;  %v1221_v13 = vpop.f32.mrf.mxu1  ;;  %v737_v15 = vadd.f32 %v1219_v11, %v617_v7 }
 0x11b   :  { %v1141_v14 = vpop.f32.mrf.mxu0  ;;  %v1222_v18 = vadd.f32 %v1221_v13, %v1220_v8 }
 0x11c   :  { %1078 = vst [vmem:[%s1647_s3 + $0x28] sm:$0xff] %v1052_v10   ;;  %v620_v17 = vadd.f32 %v1140_v12, %v1588_v16  ;;  %v1223_v19 = vpop.f32.mrf.mxu1  ;;  %v786_v25 = vmax.f32 %v737_v15, 0.0 }
 0x11d   :  { %v1142_v20 = vpop.f32.mrf.mxu0 }
 0x11e   :  { %v740_v21 = vadd.f32 %v1222_v18, %v620_v17  ;;  %v1143_v22 = vadd.f32 %v1142_v20, %v1141_v14  ;;  %v1224_v23 = vpop.f32.mrf.mxu1 }
 0x11f   :  { %v1144_v24 = vpop.f32.mrf.mxu0  ;;  %v1225_v31 = vadd.f32 %v1224_v23, %v1223_v19 }
 0x120   :  { %v787_v26 = vmax.f32 %v740_v21, 0.0  ;;  %v625_v27 = vadd.f32 %v1143_v22, %v1588_v16  ;;  %v1226_v28 = vpop.f32.mrf.mxu1 }
 0x121   :  { %v1145_v29 = vpop.f32.mrf.mxu0 }
 0x122   :  { %v1057_v30 = vpack.c.bf16 %v787_v26, %v786_v25  ;;  %v1146_v32 = vadd.f32 %v1145_v29, %v1144_v24  ;;  %v1227_v33 = vpop.f32.mrf.mxu1  ;;  %v745_v35 = vadd.f32 %v1225_v31, %v625_v27 }
 0x123   :  { %v1147_v34 = vpop.f32.mrf.mxu0  ;;  %v1228_v37 = vadd.f32 %v1227_v33, %v1226_v28 }
 0x124   :  { %1079 = vst [vmem:[%s1647_s3 + $0x30] sm:$0xff] %v1057_v30   ;;  %v628_v36 = vadd.f32 %v1146_v32, %v1588_v16  ;;  %v1229_v38 = vpop.f32.mrf.mxu1  ;;  %v788_v44 = vmax.f32 %v745_v35, 0.0 }
 0x125   :  { %v1148_v39 = vpop.f32.mrf.mxu0 }
 0x126   :  { %v748_v40 = vadd.f32 %v1228_v37, %v628_v36  ;;  %v1149_v41 = vadd.f32 %v1148_v39, %v1147_v34  ;;  %v1230_v42 = vpop.f32.mrf.mxu1 }
 0x127   :  { %v1150_v43 = vpop.f32.mrf.mxu0  ;;  %v1231_v50 = vadd.f32 %v1230_v42, %v1229_v38 }
 0x128   :  { %v789_v45 = vmax.f32 %v748_v40, 0.0  ;;  %v633_v46 = vadd.f32 %v1149_v41, %v1588_v16  ;;  %v1232_v47 = vpop.f32.mrf.mxu1 }
 0x129   :  { %v1151_v48 = vpop.f32.mrf.mxu0 }
 0x12a   :  { %v1062_v49 = vpack.c.bf16 %v789_v45, %v788_v44  ;;  %v1152_v51 = vadd.f32 %v1151_v48, %v1150_v43  ;;  %v1233_v52 = vpop.f32.mrf.mxu1  ;;  %v753_v54 = vadd.f32 %v1231_v50, %v633_v46 }
 0x12b   :  { %v1153_v53 = vpop.f32.mrf.mxu0  ;;  %v1234_v56 = vadd.f32 %v1233_v52, %v1232_v47 }
 0x12c   :  { %1080 = vst [vmem:[%s1647_s3 + $0x38] sm:$0xff] %v1062_v49   ;;  %v636_v55 = vadd.f32 %v1152_v51, %v1588_v16  ;;  %v1235_v57 = vpop.f32.mrf.mxu1  ;;  %v790_v63 = vmax.f32 %v753_v54, 0.0 }
 0x12d   :  { %v1154_v58 = vpop.f32.mrf.mxu0 }
 0x12e   :  { %v756_v59 = vadd.f32 %v1234_v56, %v636_v55  ;;  %v1155_v60 = vadd.f32 %v1154_v58, %v1153_v53  ;;  %v1236_v61 = vpop.f32.mrf.mxu1 }
 0x12f   :  { %v1156_v62 = vpop.f32.mrf.mxu0  ;;  %v1237_v5 = vadd.f32 %v1236_v61, %v1235_v57 }
 0x130   :  { %v791_v0 = vmax.f32 %v756_v59, 0.0  ;;  %v641_v1 = vadd.f32 %v1155_v60, %v1588_v16  ;;  %v1238_v2 = vpop.f32.mrf.mxu1 }
 0x131   :  { %v1157_v3 = vpop.f32.mrf.mxu0 }
 0x132   :  { %v1067_v4 = vpack.c.bf16 %v791_v0, %v790_v63  ;;  %v1158_v6 = vadd.f32 %v1157_v3, %v1156_v62  ;;  %v1239_v7 = vpop.f32.mrf.mxu1  ;;  %v761_v9 = vadd.f32 %v1237_v5, %v641_v1 }
 0x133   :  { %v1159_v8 = vpop.f32.mrf.mxu0  ;;  %v1240_v11 = vadd.f32 %v1239_v7, %v1238_v2 }
 0x134   :  { %1081 = vst [vmem:[%s1647_s3 + $0x40] sm:$0xff] %v1067_v4   ;;  %v644_v10 = vadd.f32 %v1158_v6, %v1588_v16  ;;  %v1241_v12 = vpop.f32.mrf.mxu1  ;;  %v792_v19 = vmax.f32 %v761_v9, 0.0 }
 0x135   :  { %v1160_v13 = vpop.f32.mrf.mxu0 }
 0x136   :  { %v764_v14 = vadd.f32 %v1240_v11, %v644_v10  ;;  %v1161_v15 = vadd.f32 %v1160_v13, %v1159_v8  ;;  %v1242_v17 = vpop.f32.mrf.mxu1 }
 0x137   :  { %v1162_v18 = vpop.f32.mrf.mxu0  ;;  %v1243_v22 = vadd.f32 %v1242_v17, %v1241_v12 }
 0x138   :  { %v793_v20 = vmax.f32 %v764_v14, 0.0  ;;  %v649_v21 = vadd.f32 %v1161_v15, %v1588_v16  ;;  %v1244_v23 = vpop.f32.mrf.mxu1 }
 0x139   :  { %v1163_v24 = vpop.f32.mrf.mxu0 }
 0x13a   :  { %v1072_v25 = vpack.c.bf16 %v793_v20, %v792_v19  ;;  %v769_v26 = vadd.f32 %v1243_v22, %v649_v21  ;;  %v1245_v27 = vpop.f32.mrf.mxu1 }
 0x13c   :  { %1082 = vst [vmem:[%s1647_s3 + $0x48] sm:$0xff] %v1072_v25   ;;  %v794_v28 = vmax.f32 %v769_v26, 0.0 }
 0x13e   :  { %v1023_v29 = vpack.c.bf16 %v794_v28, %v794_v28 }
 0x140   :  { %900 = vst [vmem:[%s1647_s3 + $0x50] sm:$0x1] %v1023_v29 }

// kernel: dqn_forward.6
= control target key start
LH: loop header
LB: loop body
LE: loop exit
PB: predicated region body
PF: predicated region fallthrough
CT: control target
= control target key end

     0   :  { %v1281_v34 = vmov 0.0   ;;  %vm1282_vm0 = vmmov 0   ;;  %vm516_vm1 = vcmask 523264   ;;  %s1650_s1 = inlined_call_operand.vmem [shape: bf16[576,128], index: 1, kind: input, shape index: {}]   ;;  %s1651_s0 = inlined_call_operand.vmem [shape: bf16[98,576], index: 0, kind: input, shape index: {}]   ;;  %s1652_s2 = inlined_call_operand.vmem [shape: f32[1,128], index: 2, kind: input, shape index: {}]   ;;  %s1653_s3 = inlined_call_operand.vmem [shape: bf16[98,128], index: 3, kind: output, shape index: {}]  }
   0x1   :  { %v1198_v0 = vld [vmem:[%s1650_s1 + $0x78] sm:$0xff]   ;;  %v1202_v4 = vld [vmem:[%s1650_s1 + $0x70] sm:$0xff]   ;;  %v1206_v8 = vld [vmem:[%s1650_s1 + $0x68] sm:$0xff]  }
   0x2   :  { %v1199_v1 = vld [vmem:[%s1650_s1 + $0xf8] sm:$0xff]   ;;  %1025 = vmatprep.subr.bf16.mxu0 %v1198_v0  ;;  %v1203_v5 = vld [vmem:[%s1650_s1 + $0xf0] sm:$0xff]   ;;  %v1207_v9 = vld [vmem:[%s1650_s1 + $0xe8] sm:$0xff]  }
   0x3   :  { %v1200_v2 = vld [vmem:[%s1650_s1 + $0x38] sm:$0xff]   ;;  %1083 = vmatprep.subr.bf16.mxu1 %v1199_v1  ;;  %v1204_v6 = vld [vmem:[%s1650_s1 + $0x30] sm:$0xff]   ;;  %v1208_v10 = vld [vmem:[%s1650_s1 + $0x28] sm:$0xff]  }
   0x4   :  { %v1201_v3 = vld [vmem:[%s1650_s1 + $0xb8] sm:$0xff]   ;;  %1026 = vmatpush3.bf16.msra.mxu0 %v1200_v2  ;;  %v1205_v7 = vld [vmem:[%s1650_s1 + $0xb0] sm:$0xff]   ;;  %v1209_v11 = vld [vmem:[%s1650_s1 + $0xa8] sm:$0xff]  }
   0x5   :  { %1084 = vmatpush3.bf16.msra.mxu1 %v1201_v3  ;;  %1027 = vmatprep.subr.bf16.mxu0 %v1202_v4  ;;  %v1210_v12 = vld [vmem:[%s1650_s1 + $0x60] sm:$0xff]   ;;  %v1214_v16 = vld [vmem:[%s1650_s1 + $0x58] sm:$0xff]   ;;  %v1218_v20 = vld [vmem:[%s1650_s1 + $0x50] sm:$0xff]  }
   0x6   :  { %1085 = vmatprep.subr.bf16.mxu1 %v1203_v5  ;;  %v1211_v13 = vld [vmem:[%s1650_s1 + $0xe0] sm:$0xff]   ;;  %v1215_v17 = vld [vmem:[%s1650_s1 + $0xd8] sm:$0xff]   ;;  %v1219_v21 = vld [vmem:[%s1650_s1 + $0xd0] sm:$0xff]  }
   0x7   :  { %v1212_v14 = vld [vmem:[%s1650_s1 + $0x20] sm:$0xff]   ;;  %v1216_v18 = vld [vmem:[%s1650_s1 + $0x18] sm:$0xff]   ;;  %v1220_v22 = vld [vmem:[%s1650_s1 + $0x10] sm:$0xff]  }
   0x8   :  { %1028 = vmatpush3.bf16.msra.mxu0 %v1204_v6  ;;  %v1213_v15 = vld [vmem:[%s1650_s1 + $0xa0] sm:$0xff]   ;;  %v1217_v19 = vld [vmem:[%s1650_s1 + $0x98] sm:$0xff]   ;;  %v1221_v23 = vld [vmem:[%s1650_s1 + $0x90] sm:$0xff]  }
   0x9   :  { %1086 = vmatpush3.bf16.msra.mxu1 %v1205_v7  ;;  %1029 = vmatprep.subr.bf16.mxu0 %v1206_v8  ;;  %v1222_v24 = vld [vmem:[%s1650_s1 + $0x48] sm:$0xff]   ;;  %v1226_v28 = vld [vmem:[%s1650_s1 + $0x40] sm:$0xff]   ;;  %v1236_v37 = vld [vmem:[%s1650_s1 + $0x118] sm:$0xff]  }
   0xa   :  { %1087 = vmatprep.subr.bf16.mxu1 %v1207_v9  ;;  %v1223_v25 = vld [vmem:[%s1650_s1 + $0xc8] sm:$0xff]   ;;  %v1227_v29 = vld [vmem:[%s1650_s1 + $0xc0] sm:$0xff]   ;;  %v1247_v43 = vld [vmem:[%s1650_s1 + $0x110] sm:$0xff]  }
   0xb   :  { %v1224_v26 = vld [vmem:[%s1650_s1 + $0x8] sm:$0xff]   ;;  %v1228_v30 = vld [vmem:[%s1650_s1] sm:$0xff]   ;;  %v1245_v44 = vld [vmem:[%s1651_s0 + $0x5c] ss:$20 sps:$4 sm:$0xff]  }
   0xc   :  { %1030 = vmatpush3.bf16.msra.mxu0 %v1208_v10  ;;  %v1225_v27 = vld [vmem:[%s1650_s1 + $0x88] sm:$0xff]   ;;  %v1229_v31 = vld [vmem:[%s1650_s1 + $0x80] sm:$0xff]   ;;  %v1250_v48 = vld [vmem:[%s1651_s0 + $0x7c] ss:$20 sps:$4 sm:$0xff]  }
   0xd   :  { %1088 = vmatpush3.bf16.msra.mxu1 %v1209_v11  ;;  %1031 = vmatprep.subr.bf16.mxu0 %v1210_v12  ;;  %v1230_v32 = vld [vmem:[%s1651_s0] ss:$20 sps:$4 sm:$0xff]   ;;  %v1232_v33 = vld [vmem:[%s1651_s0 + $0x4] ss:$20 sps:$4 sm:$0xff]   ;;  %v1233_v35 = vld [vmem:[%s1651_s0 + $0x8] ss:$20 sps:$4 sm:$0xff]  }
   0xe   :  { %1089 = vmatprep.subr.bf16.mxu1 %v1211_v13  ;;  %v1235_v36 = vld [vmem:[%s1651_s0 + $0xc] ss:$20 sps:$4 sm:$0xff]   ;;  %570 = vmatprep.mubr.bf16.mxu0 %v1232_v33  ;;  %v1239_v39 = vld [vmem:[%s1651_s0 + $0x34] ss:$20 sps:$4 sm:$0xff]   ;;  %v1242_v41 = vld [vmem:[%s1651_s0 + $0x30] ss:$20 sps:$4 sm:$0xff]  }
   0xf   :  { %658 = vmatprep.mubr.bf16.mxu1 %v1235_v36  ;;  %v1237_v38 = vld [vmem:[%s1651_s0 + $0x2c] ss:$20 sps:$4 sm:$0xff]   ;;  %v1241_v40 = vld [vmem:[%s1651_s0 + $0x28] ss:$20 sps:$4 sm:$0xff]   ;;  %v1248_v46 = vld [vmem:[%s1651_s0 + $0x50] ss:$20 sps:$4 sm:$0xff]  }
  0x10   :  { %1032 = vmatpush3.bf16.msra.mxu0 %v1212_v14  ;;  %v1243_v42 = vld [vmem:[%s1651_s0 + $0x54] ss:$20 sps:$4 sm:$0xff]   ;;  %v1249_v47 = vld [vmem:[%s1651_s0 + $0x58] ss:$20 sps:$4 sm:$0xff]   ;;  %v1269_v50 = vld [vmem:[%s1650_s1 + $0x100] sm:$0xff]  }
  0x11   :  { %1090 = vmatpush3.bf16.msra.mxu1 %v1213_v15  ;;  %1033 = vmatprep.subr.bf16.mxu0 %v1214_v16  ;;  %v1256_v45 = vld [vmem:[%s1650_s1 + $0x108] sm:$0xff]   ;;  %v1252_v49 = vld [vmem:[%s1651_s0 + $0x84] ss:$20 sps:$4 sm:$0xff]   ;;  %v1255_v52 = vld [vmem:[%s1651_s0 + $0x80] ss:$20 sps:$4 sm:$0xff]  }
  0x12   :  { %1091 = vmatprep.subr.bf16.mxu1 %v1215_v17  ;;  %v1254_v51 = vld [vmem:[%s1651_s0 + $0x78] ss:$20 sps:$4 sm:$0xff]   ;;  %v1261_v55 = vld [vmem:[%s1651_s0 + $0xa0] ss:$20 sps:$4 sm:$0xff]   ;;  %v1262_v56 = vld [vmem:[%s1651_s0 + $0xa8] ss:$20 sps:$4 sm:$0xff]  }
  0x13   :  { %v1257_v53 = vld [vmem:[%s1651_s0 + $0xa4] ss:$20 sps:$4 sm:$0xff]   ;;  %v1259_v54 = vld [vmem:[%s1651_s0 + $0xac] ss:$20 sps:$4 sm:$0xff]   ;;  %v1265_v58 = vld [vmem:[%s1651_s0 + $0xd4] ss:$20 sps:$4 sm:$0xff]  }
  0x14   :  { %1034 = vmatpush3.bf16.msra.mxu0 %v1216_v18  ;;  %v1263_v57 = vld [vmem:[%s1651_s0 + $0xcc] ss:$20 sps:$4 sm:$0xff]   ;;  %v51_v59 = vld [vmem:[%s1651_s0 + $0xf0] sm:$0x11]  ;;  %v52_v60 = vld [vmem:[%s1651_s0 + $0xf8] sm:$0x11] }
  0x15   :  { %1092 = vmatpush3.bf16.msra.mxu1 %v1217_v19  ;;  %1035 = vmatprep.subr.bf16.mxu0 %v1218_v20  ;;  %v1267_v61 = vld [vmem:[%s1651_s0 + $0xc8] ss:$20 sps:$4 sm:$0xff]   ;;  %v1268_v62 = vld [vmem:[%s1651_s0 + $0xd0] ss:$20 sps:$4 sm:$0xff]   ;;  %v917_v63 = vcombine.high %v51_v59, %v51_v59  ;;  %v919_v0 = vcombine.high %v52_v60, %v52_v60  ;;  %v916_v1 = vcombine.low %v51_v59, %v51_v59  ;;  %v1276_v5 = vld [vmem:[%s1651_s0 + $0x38] ss:$20 sps:$4 sm:$0xff]  }
  0x16   :  { %1093 = vmatprep.subr.bf16.mxu1 %v1219_v21  ;;  %v918_v2 = vcombine.low %v52_v60, %v52_v60  ;;  %v1274_v3 = vld [vmem:[%s1651_s0 + $0x10] ss:$20 sps:$4 sm:$0xff]   ;;  %v1277_v6 = vld [vmem:[%s1651_s0 + $0xd8] ss:$20 sps:$4 sm:$0xff]   ;;  %v1278_v7 = vld [vmem:[%s1651_s0 + $0x60] ss:$20 sps:$4 sm:$0xff]  }
  0x17   :  { %v1275_v4 = vld [vmem:[%s1651_s0 + $0xb0] ss:$20 sps:$4 sm:$0xff]   ;;  %v1279_v8 = vld [vmem:[%s1651_s0 + $0x100] ss:$0 sps:$4 sm:$0x11]  }
  0x18   :  { %1036 = vmatpush3.bf16.msra.mxu0 %v1220_v22  ;;  %v1280_v9 = vld [vmem:[%s1651_s0 + $0x88] ss:$20 sps:$4 sm:$0xff]  }
  0x19   :  { %1094 = vmatpush3.bf16.msra.mxu1 %v1221_v23  ;;  %1037 = vmatprep.subr.bf16.mxu0 %v1222_v24 }
  0x1a   :  { %1095 = vmatprep.subr.bf16.mxu1 %v1223_v25 }
  0x1c   :  { %1038 = vmatpush3.bf16.msra.mxu0 %v1224_v26 }
  0x1d   :  { %1096 = vmatpush3.bf16.msra.mxu1 %v1225_v27  ;;  %1039 = vmatprep.subr.bf16.mxu0 %v1226_v28 }
  0x1e   :  { %1097 = vmatprep.subr.bf16.mxu1 %v1227_v29 }
  0x20   :  { %1040 = vmatpush3.bf16.msra.mxu0 %v1228_v30 }
  0x21   :  { %1098 = vmatpush3.bf16.msra.mxu1 %v1229_v31  ;;  %1152 = vmatprep.subr.bf16.mxu0 %v1281_v34 }
  0x22   :  { %1188 = vmatprep.subr.bf16.mxu1 %v1281_v34 }
  0x23   :  { %571 = vmatmul.mubr.bf16.vlgmr.msra.gmra.mxu0 %v1230_v32 }
  0x24   :  { %659 = vmatmul.mubr.bf16.vlgmr.msra.gmra.mxu1 %v1233_v35  ;;  %1153 = vmatpush3.bf16.msra.mxu0 %v1236_v37 }
  0x25   :  { %578 = vmatprep.mubr.bf16.mxu0 %v1237_v38  ;;  %1192 = vmatpush3.bf16.msra.mxu1 %v1236_v37 }
  0x26   :  { %666 = vmatprep.mubr.bf16.mxu1 %v1239_v39  ;;  %1154 = vmatprep.subr.bf16.mxu0 %v1281_v34 }
  0x27   :  { %1189 = vmatprep.subr.bf16.mxu1 %v1281_v34 }
  0x28   :  { %1155 = vmatpush3.bf16.msra.mxu0 %v1247_v43 }
  0x29   :  { %1193 = vmatpush3.bf16.msra.mxu1 %v1247_v43  ;;  %1156 = vmatprep.subr.bf16.mxu0 %v1281_v34 }
  0x2a   :  { %1190 = vmatprep.subr.bf16.mxu1 %v1281_v34 }
  0x2b   :  { %579 = vmatmul.mubr.bf16.gmra.mxu0 %v1241_v40 }
  0x2c   :  { %667 = vmatmul.mubr.bf16.gmra.mxu1 %v1242_v41  ;;  %586 = vmatprep.mubr.bf16.mxu0 %v1243_v42 }
  0x2d   :  { %674 = vmatprep.mubr.bf16.mxu1 %v1245_v44  ;;  %1157 = vmatpush3.bf16.msra.mxu0 %v1256_v45 }
  0x2e   :  { %1194 = vmatpush3.bf16.msra.mxu1 %v1256_v45  ;;  %1158 = vmatprep.subr.bf16.mxu0 %v1281_v34 }
  0x2f   :  { %1191 = vmatprep.subr.bf16.mxu1 %v1281_v34 }
  0x31   :  { %1159 = vmatpush3.bf16.msra.mxu0 %v1269_v50 }
  0x32   :  { %1195 = vmatpush3.bf16.msra.mxu1 %v1269_v50 }
  0x33   :  { %587 = vmatmul.mubr.bf16.gmra.mxu0 %v1248_v46 }
  0x34   :  { %675 = vmatmul.mubr.bf16.gmra.mxu1 %v1249_v47  ;;  %594 = vmatprep.mubr.bf16.mxu0 %v1250_v48 }
  0x35   :  { %682 = vmatprep.mubr.bf16.mxu1 %v1252_v49 }
  0x3b   :  { %595 = vmatmul.mubr.bf16.gmra.mxu0 %v1254_v51 }
  0x3c   :  { %683 = vmatmul.mubr.bf16.gmra.mxu1 %v1255_v52  ;;  %602 = vmatprep.mubr.bf16.mxu0 %v1257_v53 }
  0x3d   :  { %690 = vmatprep.mubr.bf16.mxu1 %v1259_v54 }
  0x43   :  { %603 = vmatmul.mubr.bf16.gmra.mxu0 %v1261_v55 }
  0x44   :  { %691 = vmatmul.mubr.bf16.gmra.mxu1 %v1262_v56  ;;  %610 = vmatprep.mubr.bf16.mxu0 %v1263_v57 }
  0x45   :  { %698 = vmatprep.mubr.bf16.mxu1 %v1265_v58 }
  0x4b   :  { %611 = vmatmul.mubr.bf16.gmra.mxu0 %v1267_v61  ;;  %v1590_v61 = vld [vmem:[%s1652_s2] ss:$0 sm:$0xff] }
  0x4c   :  { %699 = vmatmul.mubr.bf16.gmra.mxu1 %v1268_v62  ;;  %618 = vmatprep.mubr.bf16.mxu0 %v917_v63 }
  0x4d   :  { %706 = vmatprep.mubr.bf16.mxu1 %v919_v0 }
  0x53   :  { %619 = vmatmul.mubr.bf16.gmra.mxu0 %v916_v1 }
  0x54   :  { %707 = vmatmul.mubr.bf16.gmra.mxu1 %v918_v2  ;;  %1160 = vmatprep.mubr.msk.bf16.mxu0 %vm1282_vm0, %v1281_v34 }
  0x55   :  { %1176 = vmatprep.mubr.msk.bf16.mxu1 %vm1282_vm0, %v1281_v34 }
  0x5b   :  { %1161 = vmatmul.mubr.msk.bf16.vlgmr.msra.gmra.mxu0 %vm516_vm1, %v1274_v3 }
  0x5c   :  { %1177 = vmatmul.mubr.msk.bf16.vlgmr.msra.gmra.mxu1 %vm516_vm1, %v1275_v4  ;;  %1164 = vmatprep.mubr.msk.bf16.mxu0 %vm1282_vm0, %v1281_v34 }
  0x5d   :  { %1180 = vmatprep.mubr.msk.bf16.mxu1 %vm1282_vm0, %v1281_v34 }
  0x63   :  { %1165 = vmatmul.mubr.msk.bf16.gmra.mxu0 %vm516_vm1, %v1276_v5 }
  0x64   :  { %1181 = vmatmul.mubr.msk.bf16.gmra.mxu1 %vm516_vm1, %v1277_v6  ;;  %1168 = vmatprep.mubr.msk.bf16.mxu0 %vm1282_vm0, %v1281_v34 }
  0x65   :  { %1184 = vmatprep.mubr.msk.bf16.mxu1 %vm1282_vm0, %v1281_v34 }
  0x6b   :  { %1169 = vmatmul.mubr.msk.bf16.gmra.mxu0 %vm516_vm1, %v1278_v7 }
  0x6c   :  { %1185 = vmatmul.mubr.msk.bf16.gmra.mxu1 %vm516_vm1, %v1279_v8  ;;  %1172 = vmatprep.mubr.msk.bf16.mxu0 %vm1282_vm0, %v1281_v34 }
  0x73   :  { %1173 = vmatmul.mubr.msk.bf16.gmra.mxu0 %vm516_vm1, %v1280_v9 }
  0xe3   :  { %v1041_v10 = vpop.f32.mrf.mxu0 }
  0xe4   :  { %v1099_v11 = vpop.f32.mrf.mxu1 }
  0xe5   :  { %v1042_v12 = vpop.f32.mrf.mxu0 }
  0xe6   :  { %v1100_v13 = vpop.f32.mrf.mxu1  ;;  %v1043_v59 = vadd.f32 %v1042_v12, %v1041_v10 }
  0xe7   :  { %v1044_v14 = vpop.f32.mrf.mxu0  ;;  %v1101_v5 = vadd.f32 %v1100_v13, %v1099_v11 }
  0xe8   :  { %v1102_v15 = vpop.f32.mrf.mxu1  ;;  %v573_v4 = vadd.f32 %v1043_v59, %v1590_v61 }
  0xe9   :  { %v1045_v16 = vpop.f32.mrf.mxu0 }
  0xea   :  { %v1103_v17 = vpop.f32.mrf.mxu1  ;;  %v1046_v0 = vadd.f32 %v1045_v16, %v1044_v14  ;;  %v661_v16 = vadd.f32 %v1101_v5, %v573_v4 }
  0xeb   :  { %v1539_v18 = vpop.f32.mrf.mxu0  ;;  %v1104_v12 = vadd.f32 %v1103_v17, %v1102_v15 }
  0xec   :  { %v1541_v19 = vpop.f32.mrf.mxu1  ;;  %v576_v10 = vadd.f32 %v1046_v0, %v1590_v61 }
  0xed   :  { %v1048_v20 = vpop.f32.mrf.mxu0 }
  0xee   :  { %v1543_v21 = vpop.f32.mrf.mxu1  ;;  %v1049_v14 = vadd.f32 %v1048_v20, %v1539_v18 }
  0xef   :  { %v1545_v22 = vpop.f32.mrf.mxu0  ;;  %v1107_v18 = vadd.f32 %v1543_v21, %v1541_v19 }
  0xf0   :  { %v1547_v23 = vpop.f32.mrf.mxu1 }
  0xf1   :  { %v1549_v24 = vpop.f32.mrf.mxu0 }
  0xf2   :  { %v1551_v25 = vpop.f32.mrf.mxu1  ;;  %v1052_v13 = vadd.f32 %v1549_v24, %v1545_v22 }
  0xf3   :  { %v1553_v26 = vpop.f32.mrf.mxu0 }
  0xf4   :  { %v1555_v27 = vpop.f32.mrf.mxu1 }
  0xf5   :  { %v1557_v28 = vpop.f32.mrf.mxu0 }
  0xf6   :  { %v1559_v29 = vpop.f32.mrf.mxu1 }
  0xf7   :  { %v1561_v30 = vpop.f32.mrf.mxu0 }
  0xf8   :  { %v1563_v31 = vpop.f32.mrf.mxu1 }
  0xf9   :  { %v1565_v32 = vpop.f32.mrf.mxu0 }
  0xfa   :  { %v1567_v33 = vpop.f32.mrf.mxu1 }
  0xfb   :  { %v1569_v34 = vpop.f32.mrf.mxu0 }
  0xfc   :  { %v1571_v35 = vpop.f32.mrf.mxu1 }
  0xfd   :  { %v1573_v36 = vpop.f32.mrf.mxu0 }
  0xfe   :  { %v1575_v37 = vpop.f32.mrf.mxu1 }
  0xff   :  { %v1577_v38 = vpop.f32.mrf.mxu0 }
 0x100   :  { %v1579_v39 = vpop.f32.mrf.mxu1 }
 0x101   :  { %1654 = vst [vmem:[#allocation2_spill] sm:$0xff] %v1579_v39  ;;  %v1581_v40 = vpop.f32.mrf.mxu0 }
 0x102   :  { %v1583_v41 = vpop.f32.mrf.mxu1 }
 0x103   :  { %1655 = vst [vmem:[#allocation3_spill] sm:$0xff] %v1583_v41  ;;  %v1065_v42 = vpop.f32.mrf.mxu0 }
 0x104   :  { %v1123_v43 = vpop.f32.mrf.mxu1 }
 0x105   :  { %v1066_v44 = vpop.f32.mrf.mxu0 }
 0x106   :  { %v1124_v45 = vpop.f32.mrf.mxu1  ;;  %v1067_v62 = vadd.f32 %v1066_v44, %v1065_v42 }
 0x107   :  { %v1068_v46 = vpop.f32.mrf.mxu0  ;;  %v1125_v8 = vadd.f32 %v1124_v45, %v1123_v43 }
 0x108   :  { %v1126_v47 = vpop.f32.mrf.mxu1  ;;  %v605_v7 = vadd.f32 %v1067_v62, %v1590_v61  ;;  %v664_v62 = vadd.f32 %v1104_v12, %v576_v10 }
 0x109   :  { %v1069_v48 = vpop.f32.mrf.mxu0 }
 0x10a   :  { %v1127_v49 = vpop.f32.mrf.mxu1  ;;  %v1070_v2 = vadd.f32 %v1069_v48, %v1068_v46  ;;  %v693_v59 = vadd.f32 %v1125_v8, %v605_v7 }
 0x10b   :  { %v1071_v50 = vpop.f32.mrf.mxu0  ;;  %v1128_v42 = vadd.f32 %v1127_v49, %v1126_v47  ;;  %v581_v47 = vadd.f32 %v1049_v14, %v1590_v61 }
 0x10c   :  { %v1129_v51 = vpop.f32.mrf.mxu1  ;;  %v608_v39 = vadd.f32 %v1070_v2, %v1590_v61 }
 0x10d   :  { %v1072_v52 = vpop.f32.mrf.mxu0  ;;  %v669_v8 = vadd.f32 %v1107_v18, %v581_v47 }
 0x10e   :  { %v1130_v53 = vpop.f32.mrf.mxu1  ;;  %v1073_v48 = vadd.f32 %v1072_v52, %v1071_v50  ;;  %v1110_v50 = vadd.f32 %v1551_v25, %v1547_v23  ;;  %v1055_v23 = vadd.f32 %v1557_v28, %v1553_v26 }
 0x10f   :  { %v1074_v54 = vpop.f32.mrf.mxu0  ;;  %v1131_v22 = vadd.f32 %v1130_v53, %v1129_v51 }
 0x110   :  { %v1132_v55 = vpop.f32.mrf.mxu1  ;;  %v613_v52 = vadd.f32 %v1073_v48, %v1590_v61 }
 0x111   :  { %v1075_v56 = vpop.f32.mrf.mxu0 }
 0x112   :  { %v1133_v57 = vpop.f32.mrf.mxu1  ;;  %v1076_v0 = vadd.f32 %v1075_v56, %v1074_v54  ;;  %v584_v54 = vadd.f32 %v1052_v13, %v1590_v61 }
 0x113   :  { %v1077_v58 = vpop.f32.mrf.mxu0  ;;  %v1134_v56 = vadd.f32 %v1133_v57, %v1132_v55  ;;  %v1058_v55 = vadd.f32 %v1565_v32, %v1561_v30  ;;  %v589_v30 = vadd.f32 %v1055_v23, %v1590_v61  ;;  %v1113_v32 = vadd.f32 %v1559_v29, %v1555_v27 }
 0x114   :  { %v1585_v60 = vpop.f32.mrf.mxu1  ;;  %v616_v5 = vadd.f32 %v1076_v0, %v1590_v61 }
 0x115   :  { %v1078_v63 = vpop.f32.mrf.mxu0  ;;  %v677_v29 = vadd.f32 %v1113_v32, %v589_v30 }
 0x116   :  { %v1136_v1 = vpop.f32.mrf.mxu1 }
 0x117   :  { %v1080_v3 = vpop.f32.mrf.mxu0  ;;  %v1137_v26 = vadd.f32 %v1136_v1, %v1585_v60  ;;  %v1116_v60 = vadd.f32 %v1567_v33, %v1563_v31 }
 0x118   :  { %v1138_v6 = vpop.f32.mrf.mxu1 }
 0x119   :  { %v1081_v9 = vpop.f32.mrf.mxu0  ;;  %v1079_v6 = vadd.f32 %v1078_v63, %v1077_v58  ;;  %v672_v63 = vadd.f32 %v1110_v50, %v584_v54  ;;  %v1656_v54 = vld [vmem:[#allocation2_spill] sm:$0xff] }
 0x11a   :  { %v1139_v41 = vpop.f32.mrf.mxu1  ;;  %v701_v9 = vadd.f32 %v1131_v22, %v613_v52  ;;  %v1119_v52 = vadd.f32 %v1575_v37, %v1571_v35 }
 0x11b   :  { %v748_v44 = vpop.f32.mrf.mxu0  ;;  %v696_v41 = vadd.f32 %v1128_v42, %v608_v39  ;;  %v621_v12 = vadd.f32 %v1079_v6, %v1590_v61 }
 0x11c   :  { %v780_v46 = vpop.f32.mrf.mxu1  ;;  %v749_v43 = vadd.f32 %v748_v44, %v661_v16  ;;  %v704_v44 = vadd.f32 %v1134_v56, %v616_v5  ;;  %v1657_v56 = vld [vmem:[#allocation3_spill] sm:$0xff] }
 0x11d   :  { %v1162_v11 = vpop.f32.mrf.mxu0  ;;  %v781_v15 = vadd.f32 %v780_v46, %v693_v59  ;;  %v592_v59 = vadd.f32 %v1058_v55, %v1590_v61  ;;  %v709_v0 = vadd.f32 %v1137_v26, %v621_v12 }
 0x11e   :  { %v1178_v45 = vpop.f32.mrf.mxu1  ;;  %v802_v3 = vmax.f32 %v749_v43, 0.0 }
 0x11f   :  { %v751_v17 = vpop.f32.mrf.mxu0  ;;  %v810_v19 = vmax.f32 %v781_v15, 0.0  ;;  %v1061_v15 = vadd.f32 %v1573_v36, %v1569_v34  ;;  %v680_v33 = vadd.f32 %v1116_v60, %v592_v59 }
 0x120   :  { %v752_v20 = vadd.f32 %v751_v17, %v664_v62  ;;  %v783_v49 = vpop.f32.mrf.mxu1 }
 0x121   :  { %v784_v24 = vadd.f32 %v783_v49, %v696_v41  ;;  %v1163_v2 = vpop.f32.mrf.mxu0  ;;  %v597_v50 = vadd.f32 %v1061_v15, %v1590_v61 }
 0x122   :  { %v803_v39 = vmax.f32 %v752_v20, 0.0  ;;  %v1179_v4 = vpop.f32.mrf.mxu1  ;;  %v1064_v20 = vadd.f32 %v1581_v40, %v1577_v38 }
 0x123   :  { %v811_v21 = vmax.f32 %v784_v24, 0.0  ;;  %v756_v7 = vpop.f32.mrf.mxu0 }
 0x124   :  { %v993_v25 = vpack.c.bf16 %v803_v39, %v802_v3  ;;  %v788_v51 = vpop.f32.mrf.mxu1  ;;  %v757_v57 = vadd.f32 %v756_v7, %v669_v8  ;;  %v600_v2 = vadd.f32 %v1064_v20, %v1590_v61  ;;  %v1122_v3 = vadd.f32 %v1657_v56, %v1656_v54 }
 0x125   :  { %v1013_v53 = vpack.c.bf16 %v811_v21, %v810_v19  ;;  %v1166_v10 = vpop.f32.mrf.mxu0  ;;  %v789_v28 = vadd.f32 %v788_v51, %v701_v9  ;;  %v685_v21 = vadd.f32 %v1119_v52, %v597_v50 }
 0x126   :  { %994 = vst [vmem:[%s1653_s3] sm:$0xff] %v993_v25   ;;  %v1182_v58 = vpop.f32.mrf.mxu1  ;;  %v804_v1 = vmax.f32 %v757_v57, 0.0  ;;  %v688_v61 = vadd.f32 %v1122_v3, %v600_v2 }
 0x127   :  { %1023 = vst [vmem:[%s1653_s3 + $0x20] sm:$0xff] %v1013_v53   ;;  %v759_v42 = vpop.f32.mrf.mxu0  ;;  %v812_v43 = vmax.f32 %v789_v28, 0.0 }
 0x128   :  { %v760_v14 = vadd.f32 %v759_v42, %v672_v63  ;;  %v791_v16 = vpop.f32.mrf.mxu1 }
 0x129   :  { %v792_v46 = vadd.f32 %v791_v16, %v704_v44  ;;  %v1167_v48 = vpop.f32.mrf.mxu0 }
 0x12a   :  { %v805_v11 = vmax.f32 %v760_v14, 0.0  ;;  %v1183_v13 = vpop.f32.mrf.mxu1 }
 0x12b   :  { %v813_v45 = vmax.f32 %v792_v46, 0.0  ;;  %v764_v62 = vpop.f32.mrf.mxu0 }
 0x12c   :  { %v998_v27 = vpack.c.bf16 %v805_v11, %v804_v1  ;;  %v796_v17 = vpop.f32.mrf.mxu1  ;;  %v765_v31 = vadd.f32 %v764_v62, %v677_v29 }
 0x12d   :  { %v1018_v41 = vpack.c.bf16 %v813_v45, %v812_v43  ;;  %v797_v47 = vadd.f32 %v796_v17, %v709_v0  ;;  %v1170_v18 = vpop.f32.mrf.mxu0 }
 0x12e   :  { %1020 = vst [vmem:[%s1653_s3 + $0x8] sm:$0xff] %v998_v27   ;;  %v1186_v49 = vpop.f32.mrf.mxu1  ;;  %v806_v39 = vmax.f32 %v765_v31, 0.0 }
 0x12f   :  { %1024 = vst [vmem:[%s1653_s3 + $0x28] sm:$0xff] %v1018_v41   ;;  %v814_v34 = vmax.f32 %v797_v47, 0.0  ;;  %v767_v36 = vpop.f32.mrf.mxu0 }
 0x130   :  { %v768_v22 = vadd.f32 %v767_v36, %v680_v33  ;;  %v799_v38 = vpop.f32.mrf.mxu1 }
 0x131   :  { %v989_v40 = vpack.c.bf16 %v814_v34, %v814_v34  ;;  %v1171_v24 = vpop.f32.mrf.mxu0 }
 0x132   :  { %v807_v4 = vmax.f32 %v768_v22, 0.0  ;;  %v1187_v5 = vpop.f32.mrf.mxu1 }
 0x133   :  { %880 = vst [vmem:[%s1653_s3 + $0x30] sm:$0x1] %v989_v40  ;;  %v772_v6 = vpop.f32.mrf.mxu0 }
 0x134   :  { %v1003_v19 = vpack.c.bf16 %v807_v4, %v806_v39  ;;  %v773_v37 = vadd.f32 %v772_v6, %v685_v21 }
 0x135   :  { %v1174_v35 = vpop.f32.mrf.mxu0 }
 0x136   :  { %1021 = vst [vmem:[%s1653_s3 + $0x10] sm:$0xff] %v1003_v19   ;;  %v808_v8 = vmax.f32 %v773_v37, 0.0 }
 0x137   :  { %v775_v7 = vpop.f32.mrf.mxu0 }
 0x138   :  { %v776_v23 = vadd.f32 %v775_v7, %v688_v61 }
 0x139   :  { %v1175_v25 = vpop.f32.mrf.mxu0 }
 0x13a   :  { %v809_v51 = vmax.f32 %v776_v23, 0.0 }
 0x13c   :  { %v1008_v53 = vpack.c.bf16 %v809_v51, %v808_v8 }
 0x13e   :  { %1022 = vst [vmem:[%s1653_s3 + $0x18] sm:$0xff] %v1008_v53  }

// kernel: dqn_forward.7
= control target key start
LH: loop header
LB: loop body
LE: loop exit
PB: predicated region body
PF: predicated region fallthrough
CT: control target
= control target key end

     0   :  { %s2581_s18 = smov 0   ;;  %s2583_s19 = smov 0   ;;  %s3039_s0 = inlined_call_operand.vmem [shape: bf16[16,3200], index: 0, kind: input, shape index: {}]   ;;  %s3040_s1 = inlined_call_operand.vmem [shape: bf16[3200,512], index: 1, kind: input, shape index: {}]   ;;  %s3041_s2 = inlined_call_operand.vmem [shape: f32[1,512], index: 2, kind: input, shape index: {}]   ;;  %s3042_s3 = inlined_call_operand.vmem [shape: f32[512,128], index: 3, kind: input, shape index: {}]   ;;  %s3043_s4 = inlined_call_operand.vmem [shape: f32[1,128], index: 4, kind: input, shape index: {}]   ;;  %s3044_s5 = inlined_call_operand.vmem [shape: f32[16,128], index: 5, kind: output, shape index: {}]  }
   0x1   :  { %s2585_s20 = smov 0   ;;  %s2587_s21 = smov 0  }
   0x2   :  { %s2589_s22 = smov 0  }
   0x3 LB: > { %s24_s23 = sadd.s32 1, %s2543_s21  ;;  %p43_p1 = scmp.ne.s32.totalorder %s2535_s19, %s2531_s18  ;;  %s2547_s22 = sphi %s2589_s22, %s15_s22   ;;  %s2543_s21 = sphi %s2587_s21, %s3048_s21   ;;  %s2539_s20 = sphi %s2585_s20, %s3047_s20   ;;  %s2535_s19 = sphi %s2583_s19, %s3046_s19   ;;  %s2531_s18 = sphi %s2581_s18, %s3045_s18  }
   0x4   : > { %p25_p0 = scmp.ge.s32.totalorder %s24_s23, 5  ;;  %p44_p2 = scmp.eq.s32.totalorder %s2547_s22, 0 }
   0x5   : > { %s36_s25 = sadd.s32 1, %s2535_s19  ;;  %p1959_p5 = scmp.ge.s32.totalorder %s2547_s22, 5 }
   0x6   : > { %s3050_s23 = smov (%p25_p0, %s24_s23), 0  ;;  %p45_p3 = por %p44_p2, %p43_p1 }
   0x7   : > { %s32_s24 = ssub.s32 %s2543_s21, %s3050_s23  ;;  %193 = sbr.rel (%p1959_p5) target bundleno = 20 (0x14), region = 28 }
   0x8   : > { %p34_p4 = scmp.eq.s32.totalorder %s32_s24, 0 }
   0xa   : > { %s2616_s26 = scalar_select %p34_p4, %s2535_s19, %s36_s25  }
   0xc   : > { %196 = sbr.rel (!%p45_p3) target bundleno = 20 (0x14), region = 32  ;;  %s198_s27 = sand.u32 (%p45_p3), 1, %s2535_s19  }
   0xd   : > { %s2140_s28 = smul.u32 (%p45_p3), 20, %s2543_s21 }
   0xe   : > { %s2218_s29 = smul.u32 (%p45_p3), 40, %s198_s27 }
   0xf   : > { %s206_s7 = scalar_lea.vmem (%p45_p3), %s3039_s0, %s2140_s28 }
  0x10   : > { %v221_v0 = vld [vmem:[%s206_s7] sm:$0xff] (%p45_p3)  ;;  %v223_v1 = vld [vmem:[%s206_s7 + $0x8] sm:$0xff] (%p45_p3)  ;;  %s200_s8 = scalar_lea.vmem (%p45_p3), [#allocation3], %s2218_s29  ;;  %v1961_v4 = vld [vmem:[%s206_s7 + $0x10] sm:$0xf] (%p45_p3) }
  0x11   : > { %v225_v2 = vld [vmem:[%s206_s7 + $0x64] sm:$0xff]  ;;  %222 = vst [vmem:[%s200_s8] sm:$0xff] %v221_v0  ;;  %224 = vst [vmem:[%s200_s8 + $0x8] sm:$0xff] %v223_v1  ;;  %v227_v3 = vld [vmem:[%s206_s7 + $0x6c] sm:$0xff] }
  0x12   : > { %226 = vst [vmem:[%s200_s8 + $0x14] sm:$0xff] %v225_v2  ;;  %v1963_v5 = vld [vmem:[%s206_s7 + $0x74] sm:$0xf]  ;;  %228 = vst [vmem:[%s200_s8 + $0x1c] sm:$0xff] %v227_v3 }
  0x13   : > { %1962 = vst [vmem:[%s200_s8 + $0x10] sm:$0xf] %v1961_v4  ;;  %1964 = vst [vmem:[%s200_s8 + $0x24] sm:$0xf] %v1963_v5 }
  0x14 PF: > { %p1965_p6 = scmp.ge.s32.totalorder %s2547_s22, 1  ;;  %p255_p7 = scmp.lt.s32.totalorder %s2547_s22, 6 }
  0x16   : > { %p256_p8 = pnand %p1965_p6, %p255_p7 }
  0x17   : > { %s262_s9 = sand.u32 (!%p256_p8), 1, %s2531_s18   ;;  %s297_s10 = smul.u32 (!%p256_p8), 80, %s2539_s20 }
  0x18   : > { %259 = sbr.rel (%p256_p8) target bundleno = 647 (0x287), region = 62  ;;  %p1968_p10 = scmp.ne.s32.totalorder (!%p256_p8), %s2539_s20, 0 }
  0x19   : > { %s2219_s11 = smul.u32 (!%p256_p8), 40, %s262_s9  ;;  %p298_p9 = scmp.lt.s32.totalorder (!%p256_p8), %s297_s10, 399 }
  0x1b   : > { %s2633_s16 = scalar_lea.vmem (!%p256_p8), [#allocation3], %s2219_s11 }
  0x1d   : > { %s3052_s10 = smov (!%p298_p9, %s297_s10), 399  ;;  %314 = sbr.rel (%p1968_p10) target bundleno = 39 (0x27), region = 70 }
  0x1e   : > { %s2141_s12 = sshll.u32 %s3052_s10, 4 }
  0x1f   : > { %s2631_s15 = scalar_lea.vmem %s3040_s1, %s2141_s12 }
  0x22   : > { %v2549_v6 = vmov 0.0  }
  0x23   : > { %315 = vst [vmem:[#allocation2 + $0x30] sm:$0xff] %v2549_v6  ;;  %316 = vst [vmem:[#allocation2] sm:$0xff] %v2549_v6 }
  0x24   : > { %317 = vst [vmem:[#allocation2 + $0x18] sm:$0xff] %v2549_v6  ;;  %318 = vst [vmem:[#allocation2 + $0x10] sm:$0xff] %v2549_v6 }
  0x25   : > { %319 = vst [vmem:[#allocation2 + $0x8] sm:$0xff] %v2549_v6  ;;  %320 = vst [vmem:[#allocation2 + $0x20] sm:$0xff] %v2549_v6 }
  0x26   : > { %321 = vst [vmem:[#allocation2 + $0x28] sm:$0xff] %v2549_v6  ;;  %322 = vst [vmem:[#allocation2 + $0x38] sm:$0xff] %v2549_v6 }
  0x27 PF: > { %v2262_v7 = vld [vmem:[%s2631_s15 + $0xe4] ss:$16 sps:$4 sm:$0xff]   ;;  %v2266_v9 = vld [vmem:[%s2631_s15 + $0xe0] ss:$16 sps:$4 sm:$0xff]   ;;  %p2134_p11 = scmp.ne.s32.totalorder %s2539_s20, 4 }
  0x28   : > { %v2264_v8 = vld [vmem:[%s2631_s15 + $0x2e4] ss:$16 sps:$4 sm:$0xff]   ;;  %1323 = vmatprep.subr.bf16.mxu0 %v2262_v7  ;;  %v2267_v10 = vld [vmem:[%s2631_s15 + $0x2e0] ss:$16 sps:$4 sm:$0xff]  }
  0x29   : > { %1366 = vmatprep.subr.bf16.mxu1 %v2264_v8  ;;  %v2268_v11 = vld [vmem:[%s2631_s15 + $0xc4] ss:$16 sps:$4 sm:$0xff]   ;;  %1324 = vmatpush1.bf16.msra.mxu0 %v2266_v9  ;;  %v2272_v13 = vld [vmem:[%s2631_s15 + $0xc0] ss:$16 sps:$4 sm:$0xff]  }
  0x2a   : > { %1367 = vmatpush1.bf16.msra.mxu1 %v2267_v10  ;;  %v2270_v12 = vld [vmem:[%s2631_s15 + $0x2c4] ss:$16 sps:$4 sm:$0xff]   ;;  %1325 = vmatprep.subr.bf16.mxu0 %v2268_v11  ;;  %v2273_v14 = vld [vmem:[%s2631_s15 + $0x2c0] ss:$16 sps:$4 sm:$0xff]   ;;  %v2369_v10 = vld [vmem:[%s2631_s15 + $0xec] ss:$16 sps:$4 sm:$0xff]  }
  0x2b   : > { %1368 = vmatprep.subr.bf16.mxu1 %v2270_v12  ;;  %v2274_v15 = vld [vmem:[%s2631_s15 + $0xa4] ss:$16 sps:$4 sm:$0xff]   ;;  %v2278_v17 = vld [vmem:[%s2631_s15 + $0xa0] ss:$16 sps:$4 sm:$0xff]  }
  0x2c   : > { %v2276_v16 = vld [vmem:[%s2631_s15 + $0x2a4] ss:$16 sps:$4 sm:$0xff]   ;;  %v2279_v18 = vld [vmem:[%s2631_s15 + $0x2a0] ss:$16 sps:$4 sm:$0xff]  }
  0x2d   : > { %1326 = vmatpush1.bf16.msra.mxu0 %v2272_v13  ;;  %v2280_v19 = vld [vmem:[%s2631_s15 + $0x84] ss:$16 sps:$4 sm:$0xff]   ;;  %v2284_v21 = vld [vmem:[%s2631_s15 + $0x80] ss:$16 sps:$4 sm:$0xff]  }
  0x2e   : > { %1369 = vmatpush1.bf16.msra.mxu1 %v2273_v14  ;;  %1327 = vmatprep.subr.bf16.mxu0 %v2274_v15  ;;  %v2282_v20 = vld [vmem:[%s2631_s15 + $0x284] ss:$16 sps:$4 sm:$0xff]   ;;  %v2285_v22 = vld [vmem:[%s2631_s15 + $0x280] ss:$16 sps:$4 sm:$0xff]   ;;  %v2367_v14 = vld [vmem:[%s2631_s15 + $0xe8] ss:$16 sps:$4 sm:$0xff]  }
  0x2f   : > { %1370 = vmatprep.subr.bf16.mxu1 %v2276_v16  ;;  %v2286_v23 = vld [vmem:[%s2631_s15 + $0x64] ss:$16 sps:$4 sm:$0xff]   ;;  %v2290_v25 = vld [vmem:[%s2631_s15 + $0x60] ss:$16 sps:$4 sm:$0xff]   ;;  %v2375_v16 = vld [vmem:[%s2631_s15 + $0xcc] ss:$16 sps:$4 sm:$0xff]  }
  0x30   : > { %v2288_v24 = vld [vmem:[%s2631_s15 + $0x264] ss:$16 sps:$4 sm:$0xff]   ;;  %v2291_v26 = vld [vmem:[%s2631_s15 + $0x260] ss:$16 sps:$4 sm:$0xff]  }
  0x31   : > { %1328 = vmatpush1.bf16.msra.mxu0 %v2278_v17  ;;  %v2292_v27 = vld [vmem:[%s2631_s15 + $0x44] ss:$16 sps:$4 sm:$0xff]   ;;  %v2296_v29 = vld [vmem:[%s2631_s15 + $0x40] ss:$16 sps:$4 sm:$0xff]  }
  0x32   : > { %1371 = vmatpush1.bf16.msra.mxu1 %v2279_v18  ;;  %1329 = vmatprep.subr.bf16.mxu0 %v2280_v19  ;;  %v2294_v28 = vld [vmem:[%s2631_s15 + $0x244] ss:$16 sps:$4 sm:$0xff]   ;;  %v2297_v30 = vld [vmem:[%s2631_s15 + $0x240] ss:$16 sps:$4 sm:$0xff]   ;;  %v2373_v18 = vld [vmem:[%s2631_s15 + $0xc8] ss:$16 sps:$4 sm:$0xff]  }
  0x33   : > { %1372 = vmatprep.subr.bf16.mxu1 %v2282_v20  ;;  %v2298_v31 = vld [vmem:[%s2631_s15 + $0x24] ss:$16 sps:$4 sm:$0xff]   ;;  %v2302_v33 = vld [vmem:[%s2631_s15 + $0x20] ss:$16 sps:$4 sm:$0xff]   ;;  %v2381_v20 = vld [vmem:[%s2631_s15 + $0xac] ss:$16 sps:$4 sm:$0xff]  }
  0x34   : > { %v2300_v32 = vld [vmem:[%s2631_s15 + $0x224] ss:$16 sps:$4 sm:$0xff]   ;;  %v2303_v34 = vld [vmem:[%s2631_s15 + $0x220] ss:$16 sps:$4 sm:$0xff]  }
  0x35   : > { %1330 = vmatpush1.bf16.msra.mxu0 %v2284_v21  ;;  %v2304_v35 = vld [vmem:[%s2631_s15 + $0x4] ss:$16 sps:$4 sm:$0xff]   ;;  %v2308_v37 = vld [vmem:[%s2631_s15] ss:$16 sps:$4 sm:$0xff]   ;;  %v2550_v21 = vmov 0  }
  0x36   : > { %1373 = vmatpush1.bf16.msra.mxu1 %v2285_v22  ;;  %1331 = vmatprep.subr.bf16.mxu0 %v2286_v23  ;;  %v2306_v36 = vld [vmem:[%s2631_s15 + $0x204] ss:$16 sps:$4 sm:$0xff]   ;;  %v2309_v38 = vld [vmem:[%s2631_s15 + $0x200] ss:$16 sps:$4 sm:$0xff]   ;;  %v2379_v23 = vld [vmem:[%s2631_s15 + $0xa8] ss:$16 sps:$4 sm:$0xff]  }
  0x37   : > { %1374 = vmatprep.subr.bf16.mxu1 %v2288_v24  ;;  %v2310_v39 = vld [vmem:[%s2631_s15 + $0x1e4] ss:$16 sps:$4 sm:$0xff]   ;;  %v2314_v41 = vld [vmem:[%s2631_s15 + $0x1e0] ss:$16 sps:$4 sm:$0xff]  }
  0x38   : > { %v2312_v40 = vld [vmem:[%s2631_s15 + $0x3e4] ss:$16 sps:$4 sm:$0xff]   ;;  %v2315_v42 = vld [vmem:[%s2631_s15 + $0x3e0] ss:$16 sps:$4 sm:$0xff]  }
  0x39   : > { %1332 = vmatpush1.bf16.msra.mxu0 %v2290_v25  ;;  %v2316_v43 = vld [vmem:[%s2631_s15 + $0x1c4] ss:$16 sps:$4 sm:$0xff]   ;;  %v2320_v45 = vld [vmem:[%s2631_s15 + $0x1c0] ss:$16 sps:$4 sm:$0xff]   ;;  %v2387_v25 = vld [vmem:[%s2631_s15 + $0x8c] ss:$16 sps:$4 sm:$0xff]  }
  0x3a   : > { %1375 = vmatpush1.bf16.msra.mxu1 %v2291_v26  ;;  %1333 = vmatprep.subr.bf16.mxu0 %v2292_v27  ;;  %v2318_v44 = vld [vmem:[%s2631_s15 + $0x3c4] ss:$16 sps:$4 sm:$0xff]   ;;  %v2321_v46 = vld [vmem:[%s2631_s15 + $0x3c0] ss:$16 sps:$4 sm:$0xff]   ;;  %v2385_v27 = vld [vmem:[%s2631_s15 + $0x88] ss:$16 sps:$4 sm:$0xff]  }
  0x3b   : > { %1376 = vmatprep.subr.bf16.mxu1 %v2294_v28  ;;  %v2322_v47 = vld [vmem:[%s2631_s15 + $0x1a4] ss:$16 sps:$4 sm:$0xff]   ;;  %v2326_v49 = vld [vmem:[%s2631_s15 + $0x1a0] ss:$16 sps:$4 sm:$0xff]  }
  0x3c   : > { %v2324_v48 = vld [vmem:[%s2631_s15 + $0x3a4] ss:$16 sps:$4 sm:$0xff]   ;;  %v2327_v50 = vld [vmem:[%s2631_s15 + $0x3a0] ss:$16 sps:$4 sm:$0xff]  }
  0x3d   : > { %1334 = vmatpush1.bf16.msra.mxu0 %v2296_v29  ;;  %v2328_v51 = vld [vmem:[%s2631_s15 + $0x184] ss:$16 sps:$4 sm:$0xff]   ;;  %v2332_v53 = vld [vmem:[%s2631_s15 + $0x180] ss:$16 sps:$4 sm:$0xff]   ;;  %v2393_v29 = vld [vmem:[%s2631_s15 + $0x6c] ss:$16 sps:$4 sm:$0xff]  }
  0x3e   : > { %1377 = vmatpush1.bf16.msra.mxu1 %v2297_v30  ;;  %1335 = vmatprep.subr.bf16.mxu0 %v2298_v31  ;;  %v2330_v52 = vld [vmem:[%s2631_s15 + $0x384] ss:$16 sps:$4 sm:$0xff]   ;;  %v2333_v54 = vld [vmem:[%s2631_s15 + $0x380] ss:$16 sps:$4 sm:$0xff]   ;;  %v2391_v31 = vld [vmem:[%s2631_s15 + $0x68] ss:$16 sps:$4 sm:$0xff]  }
  0x3f   : > { %1378 = vmatprep.subr.bf16.mxu1 %v2300_v32  ;;  %v2334_v55 = vld [vmem:[%s2631_s15 + $0x164] ss:$16 sps:$4 sm:$0xff]   ;;  %v2338_v59 = vld [vmem:[%s2631_s15 + $0x160] ss:$16 sps:$4 sm:$0xff]  }
  0x40   : > { %v2360_v56 = vld [vmem:[%s2633_s16 + $0x4] ss:$20 sps:$4 sm:$0xff]   ;;  %v2688_v58 = vld [vmem:[%s2633_s16 + $0xc] ss:$20 sps:$4 sm:$0xff]   ;;  %v2711_v12 = vld [vmem:[%s2633_s16 + $0x8] ss:$20 sps:$4 sm:$0xff]  }
  0x41   : > { %1336 = vmatpush1.bf16.msra.mxu0 %v2302_v33  ;;  %v2336_v57 = vld [vmem:[%s2631_s15 + $0x364] ss:$16 sps:$4 sm:$0xff]   ;;  %1355 = vmatprep.mubr.bf16.mxu0 %v2360_v56  ;;  %v2339_v60 = vld [vmem:[%s2631_s15 + $0x360] ss:$16 sps:$4 sm:$0xff]   ;;  %v2399_v33 = vld [vmem:[%s2631_s15 + $0x4c] ss:$16 sps:$4 sm:$0xff]  }
  0x42   : > { %1379 = vmatpush1.bf16.msra.mxu1 %v2303_v34  ;;  %1337 = vmatprep.subr.bf16.mxu0 %v2304_v35  ;;  %v2340_v61 = vld [vmem:[%s2631_s15 + $0x144] ss:$16 sps:$4 sm:$0xff]   ;;  %v2344_v63 = vld [vmem:[%s2631_s15 + $0x140] ss:$16 sps:$4 sm:$0xff]   ;;  %v2397_v35 = vld [vmem:[%s2631_s15 + $0x48] ss:$16 sps:$4 sm:$0xff]  }
  0x43   : > { %1380 = vmatprep.subr.bf16.mxu1 %v2306_v36  ;;  %1398 = vmatprep.mubr.bf16.mxu1 %v2688_v58  ;;  %v2342_v62 = vld [vmem:[%s2631_s15 + $0x344] ss:$16 sps:$4 sm:$0xff]   ;;  %v2345_v0 = vld [vmem:[%s2631_s15 + $0x340] ss:$16 sps:$4 sm:$0xff]  }
  0x44   : > { %v2346_v1 = vld [vmem:[%s2631_s15 + $0x124] ss:$16 sps:$4 sm:$0xff]   ;;  %v2350_v3 = vld [vmem:[%s2631_s15 + $0x120] ss:$16 sps:$4 sm:$0xff]  }
  0x45   : > { %1338 = vmatpush1.bf16.msra.mxu0 %v2308_v37  ;;  %v2348_v2 = vld [vmem:[%s2631_s15 + $0x324] ss:$16 sps:$4 sm:$0xff]   ;;  %v2351_v4 = vld [vmem:[%s2631_s15 + $0x320] ss:$16 sps:$4 sm:$0xff]   ;;  %v2405_v37 = vld [vmem:[%s2631_s15 + $0x2c] ss:$16 sps:$4 sm:$0xff]  }
  0x46   : > { %1381 = vmatpush1.bf16.msra.mxu1 %v2309_v38  ;;  %1339 = vmatprep.subr.bf16.mxu0 %v2310_v39  ;;  %v2352_v5 = vld [vmem:[%s2631_s15 + $0x104] ss:$16 sps:$4 sm:$0xff]   ;;  %v2356_v7 = vld [vmem:[%s2631_s15 + $0x100] ss:$16 sps:$4 sm:$0xff]   ;;  %v2403_v39 = vld [vmem:[%s2631_s15 + $0x28] ss:$16 sps:$4 sm:$0xff]  }
  0x47   : > { %1382 = vmatprep.subr.bf16.mxu1 %v2312_v40  ;;  %v2354_v6 = vld [vmem:[%s2631_s15 + $0x304] ss:$16 sps:$4 sm:$0xff]   ;;  %v2357_v8 = vld [vmem:[%s2631_s15 + $0x300] ss:$16 sps:$4 sm:$0xff]  }
  0x48   : > { %v2366_v9 = vld [vmem:[%s2631_s15 + $0x4e4] ss:$16 sps:$4 sm:$0xff]   ;;  %v2364_v13 = vld [vmem:[%s2631_s15 + $0x4e0] ss:$16 sps:$4 sm:$0xff]  }
  0x49   : > { %1340 = vmatpush2.bf16.msra.mxu0 %v2314_v41  ;;  %v2708_v11 = vld [vmem:[%s2633_s16] ss:$20 sps:$4 sm:$0xff]  }
  0x4a   : > { %1383 = vmatpush2.bf16.msra.mxu1 %v2315_v42  ;;  %1341 = vmatprep.subr.bf16.mxu0 %v2316_v43  ;;  %v2372_v15 = vld [vmem:[%s2631_s15 + $0x4c4] ss:$16 sps:$4 sm:$0xff]   ;;  %v2370_v17 = vld [vmem:[%s2631_s15 + $0x4c0] ss:$16 sps:$4 sm:$0xff]   ;;  %v2411_v41 = vld [vmem:[%s2631_s15 + $0xc] ss:$16 sps:$4 sm:$0xff]  }
  0x4b   : > { %1384 = vmatprep.subr.bf16.mxu1 %v2318_v44  ;;  %v2378_v19 = vld [vmem:[%s2631_s15 + $0x4a4] ss:$16 sps:$4 sm:$0xff]   ;;  %v2376_v22 = vld [vmem:[%s2631_s15 + $0x4a0] ss:$16 sps:$4 sm:$0xff]   ;;  %v2409_v43 = vld [vmem:[%s2631_s15 + $0x8] ss:$16 sps:$4 sm:$0xff]  }
  0x4c   : > { %v2384_v24 = vld [vmem:[%s2631_s15 + $0x484] ss:$16 sps:$4 sm:$0xff]   ;;  %v2382_v26 = vld [vmem:[%s2631_s15 + $0x480] ss:$16 sps:$4 sm:$0xff]   ;;  %v2415_v44 = vld [vmem:[%s2631_s15 + $0x1ec] ss:$16 sps:$4 sm:$0xff]  }
  0x4d   : > { %1342 = vmatpush2.bf16.msra.mxu0 %v2320_v45  ;;  %v2390_v28 = vld [vmem:[%s2631_s15 + $0x464] ss:$16 sps:$4 sm:$0xff]   ;;  %v2388_v30 = vld [vmem:[%s2631_s15 + $0x460] ss:$16 sps:$4 sm:$0xff]   ;;  %v2418_v45 = vld [vmem:[%s2631_s15 + $0x2ec] ss:$16 sps:$4 sm:$0xff]  }
  0x4e   : > { %1385 = vmatpush2.bf16.msra.mxu1 %v2321_v46  ;;  %1343 = vmatprep.subr.bf16.mxu0 %v2322_v47  ;;  %v2396_v32 = vld [vmem:[%s2631_s15 + $0x444] ss:$16 sps:$4 sm:$0xff]   ;;  %v2394_v34 = vld [vmem:[%s2631_s15 + $0x440] ss:$16 sps:$4 sm:$0xff]   ;;  %v2413_v47 = vld [vmem:[%s2631_s15 + $0x1e8] ss:$16 sps:$4 sm:$0xff]  }
  0x4f   : > { %1386 = vmatprep.subr.bf16.mxu1 %v2324_v48  ;;  %v2402_v36 = vld [vmem:[%s2631_s15 + $0x424] ss:$16 sps:$4 sm:$0xff]   ;;  %v2400_v38 = vld [vmem:[%s2631_s15 + $0x420] ss:$16 sps:$4 sm:$0xff]   ;;  %v2416_v48 = vld [vmem:[%s2631_s15 + $0x2e8] ss:$16 sps:$4 sm:$0xff]  }
  0x50   : > { %v2408_v40 = vld [vmem:[%s2631_s15 + $0x404] ss:$16 sps:$4 sm:$0xff]   ;;  %v2406_v42 = vld [vmem:[%s2631_s15 + $0x400] ss:$16 sps:$4 sm:$0xff]  }
  0x51   : > { %1344 = vmatpush2.bf16.msra.mxu0 %v2326_v49  ;;  %v2749_v46 = vld [vmem:[%s2633_s16 + $0x10] ss:$20 sps:$4 sm:$0xff]  }
  0x52   : > { %1387 = vmatpush2.bf16.msra.mxu1 %v2327_v50  ;;  %1345 = vmatprep.subr.bf16.mxu0 %v2328_v51  ;;  %v2421_v49 = vld [vmem:[%s2631_s15 + $0x1cc] ss:$16 sps:$4 sm:$0xff]   ;;  %v2419_v51 = vld [vmem:[%s2631_s15 + $0x1c8] ss:$16 sps:$4 sm:$0xff]  }
  0x53   : > { %1388 = vmatprep.subr.bf16.mxu1 %v2330_v52  ;;  %v2424_v50 = vld [vmem:[%s2631_s15 + $0x2cc] ss:$16 sps:$4 sm:$0xff]   ;;  %v2422_v52 = vld [vmem:[%s2631_s15 + $0x2c8] ss:$16 sps:$4 sm:$0xff]  }
  0x55   : > { %1346 = vmatpush2.bf16.msra.mxu0 %v2332_v53  ;;  %v2427_v53 = vld [vmem:[%s2631_s15 + $0x1ac] ss:$16 sps:$4 sm:$0xff]  }
  0x56   : > { %1389 = vmatpush2.bf16.msra.mxu1 %v2333_v54  ;;  %1347 = vmatprep.subr.bf16.mxu0 %v2334_v55  ;;  %v2430_v54 = vld [vmem:[%s2631_s15 + $0x2ac] ss:$16 sps:$4 sm:$0xff]   ;;  %v2425_v55 = vld [vmem:[%s2631_s15 + $0x1a8] ss:$16 sps:$4 sm:$0xff]  }
  0x57   : > { %1390 = vmatprep.subr.bf16.mxu1 %v2336_v57  ;;  %v2433_v57 = vld [vmem:[%s2631_s15 + $0x18c] ss:$16 sps:$4 sm:$0xff]  }
  0x59   : > { %1348 = vmatpush2.bf16.msra.mxu0 %v2338_v59  ;;  %v2436_v59 = vld [vmem:[%s2631_s15 + $0x28c] ss:$16 sps:$4 sm:$0xff]  }
  0x5a   : > { %1391 = vmatpush2.bf16.msra.mxu1 %v2339_v60  ;;  %1349 = vmatprep.subr.bf16.mxu0 %v2340_v61  ;;  %v2431_v60 = vld [vmem:[%s2631_s15 + $0x188] ss:$16 sps:$4 sm:$0xff]  }
  0x5b   : > { %1392 = vmatprep.subr.bf16.mxu1 %v2342_v62  ;;  %v2434_v61 = vld [vmem:[%s2631_s15 + $0x288] ss:$16 sps:$4 sm:$0xff]   ;;  %v2442_v62 = vld [vmem:[%s2631_s15 + $0x26c] ss:$16 sps:$4 sm:$0xff]  }
  0x5d   : > { %1350 = vmatpush2.bf16.msra.mxu0 %v2344_v63  ;;  %v2437_v63 = vld [vmem:[%s2631_s15 + $0x168] ss:$16 sps:$4 sm:$0xff]  }
  0x5e   : > { %1393 = vmatpush2.bf16.msra.mxu1 %v2345_v0  ;;  %1351 = vmatprep.subr.bf16.mxu0 %v2346_v1  ;;  %v2440_v0 = vld [vmem:[%s2631_s15 + $0x268] ss:$16 sps:$4 sm:$0xff]   ;;  %v2445_v1 = vld [vmem:[%s2631_s15 + $0x14c] ss:$16 sps:$4 sm:$0xff]  }
  0x5f   : > { %1394 = vmatprep.subr.bf16.mxu1 %v2348_v2  ;;  %v2448_v2 = vld [vmem:[%s2631_s15 + $0x24c] ss:$16 sps:$4 sm:$0xff]  }
  0x61   : > { %1352 = vmatpush2.bf16.msra.mxu0 %v2350_v3  ;;  %v2443_v3 = vld [vmem:[%s2631_s15 + $0x148] ss:$16 sps:$4 sm:$0xff]  }
  0x62   : > { %1395 = vmatpush2.bf16.msra.mxu1 %v2351_v4  ;;  %1353 = vmatprep.subr.bf16.mxu0 %v2352_v5  ;;  %v2446_v4 = vld [vmem:[%s2631_s15 + $0x248] ss:$16 sps:$4 sm:$0xff]   ;;  %v2451_v5 = vld [vmem:[%s2631_s15 + $0x12c] ss:$16 sps:$4 sm:$0xff]  }
  0x63   : > { %1396 = vmatprep.subr.bf16.mxu1 %v2354_v6  ;;  %v2454_v6 = vld [vmem:[%s2631_s15 + $0x22c] ss:$16 sps:$4 sm:$0xff]  }
  0x65   : > { %1354 = vmatpush2.bf16.msra.mxu0 %v2356_v7  ;;  %v2449_v7 = vld [vmem:[%s2631_s15 + $0x128] ss:$16 sps:$4 sm:$0xff]  }
  0x66   : > { %1397 = vmatpush2.bf16.msra.mxu1 %v2357_v8  ;;  %1409 = vmatprep.subr.bf16.mxu0 %v2366_v9  ;;  %v2452_v8 = vld [vmem:[%s2631_s15 + $0x228] ss:$16 sps:$4 sm:$0xff]   ;;  %v2457_v9 = vld [vmem:[%s2631_s15 + $0x10c] ss:$16 sps:$4 sm:$0xff]  }
  0x67   : > { %1452 = vmatprep.subr.bf16.mxu1 %v2369_v10  ;;  %v2460_v10 = vld [vmem:[%s2631_s15 + $0x20c] ss:$16 sps:$4 sm:$0xff]  }
  0x68   : > { %1356 = vmatmul.mubr.bf16.vlgmr.msra.gmra.mxu0 %v2708_v11 }
  0x69   : > { %1399 = vmatmul.mubr.bf16.vlgmr.msra.gmra.mxu1 %v2711_v12  ;;  %1410 = vmatpush1.bf16.msra.mxu0 %v2364_v13  ;;  %v2455_v13 = vld [vmem:[%s2631_s15 + $0x108] ss:$16 sps:$4 sm:$0xff]  }
  0x6a   : > { %1453 = vmatpush1.bf16.msra.mxu1 %v2367_v14  ;;  %1411 = vmatprep.subr.bf16.mxu0 %v2372_v15  ;;  %v2458_v14 = vld [vmem:[%s2631_s15 + $0x208] ss:$16 sps:$4 sm:$0xff]   ;;  %v2463_v15 = vld [vmem:[%s2631_s15 + $0x3ec] ss:$16 sps:$4 sm:$0xff]  }
  0x6b   : > { %1454 = vmatprep.subr.bf16.mxu1 %v2375_v16  ;;  %1441 = vmatprep.mubr.bf16.mxu0 %v2550_v21  ;;  %v2466_v16 = vld [vmem:[%s2631_s15 + $0x4ec] ss:$16 sps:$4 sm:$0xff]  }
  0x6c   : > { %1484 = vmatprep.mubr.bf16.mxu1 %v2360_v56  ;;  %v2428_v56 = vld [vmem:[%s2631_s15 + $0x2a8] ss:$16 sps:$4 sm:$0xff]  }
  0x6d   : > { %1412 = vmatpush1.bf16.msra.mxu0 %v2370_v17  ;;  %v2461_v17 = vld [vmem:[%s2631_s15 + $0x3e8] ss:$16 sps:$4 sm:$0xff]  }
  0x6e   : > { %1455 = vmatpush1.bf16.msra.mxu1 %v2373_v18  ;;  %1413 = vmatprep.subr.bf16.mxu0 %v2378_v19  ;;  %v2464_v18 = vld [vmem:[%s2631_s15 + $0x4e8] ss:$16 sps:$4 sm:$0xff]   ;;  %v2469_v19 = vld [vmem:[%s2631_s15 + $0x3cc] ss:$16 sps:$4 sm:$0xff]  }
  0x6f   : > { %1456 = vmatprep.subr.bf16.mxu1 %v2381_v20  ;;  %v2472_v20 = vld [vmem:[%s2631_s15 + $0x4cc] ss:$16 sps:$4 sm:$0xff]  }
  0x71   : > { %1414 = vmatpush1.bf16.msra.mxu0 %v2376_v22  ;;  %v2467_v22 = vld [vmem:[%s2631_s15 + $0x3c8] ss:$16 sps:$4 sm:$0xff]  }
  0x72   : > { %1457 = vmatpush1.bf16.msra.mxu1 %v2379_v23  ;;  %1415 = vmatprep.subr.bf16.mxu0 %v2384_v24  ;;  %v2470_v23 = vld [vmem:[%s2631_s15 + $0x4c8] ss:$16 sps:$4 sm:$0xff]   ;;  %v2475_v24 = vld [vmem:[%s2631_s15 + $0x3ac] ss:$16 sps:$4 sm:$0xff]  }
  0x73   : > { %1458 = vmatprep.subr.bf16.mxu1 %v2387_v25  ;;  %v2478_v25 = vld [vmem:[%s2631_s15 + $0x4ac] ss:$16 sps:$4 sm:$0xff]  }
  0x75   : > { %1416 = vmatpush1.bf16.msra.mxu0 %v2382_v26  ;;  %v2473_v26 = vld [vmem:[%s2631_s15 + $0x3a8] ss:$16 sps:$4 sm:$0xff]  }
  0x76   : > { %1459 = vmatpush1.bf16.msra.mxu1 %v2385_v27  ;;  %1417 = vmatprep.subr.bf16.mxu0 %v2390_v28  ;;  %v2481_v27 = vld [vmem:[%s2631_s15 + $0x38c] ss:$16 sps:$4 sm:$0xff]  }
  0x77   : > { %1460 = vmatprep.subr.bf16.mxu1 %v2393_v29  ;;  %v2484_v28 = vld [vmem:[%s2631_s15 + $0x48c] ss:$16 sps:$4 sm:$0xff]   ;;  %v2479_v29 = vld [vmem:[%s2631_s15 + $0x388] ss:$16 sps:$4 sm:$0xff]  }
  0x79   : > { %1418 = vmatpush1.bf16.msra.mxu0 %v2388_v30  ;;  %v2482_v30 = vld [vmem:[%s2631_s15 + $0x488] ss:$16 sps:$4 sm:$0xff]  }
  0x7a   : > { %1461 = vmatpush1.bf16.msra.mxu1 %v2391_v31  ;;  %1419 = vmatprep.subr.bf16.mxu0 %v2396_v32  ;;  %v2490_v31 = vld [vmem:[%s2631_s15 + $0x46c] ss:$16 sps:$4 sm:$0xff]   ;;  %v2485_v32 = vld [vmem:[%s2631_s15 + $0x368] ss:$16 sps:$4 sm:$0xff]  }
  0x7b   : > { %1462 = vmatprep.subr.bf16.mxu1 %v2399_v33  ;;  %v2488_v33 = vld [vmem:[%s2631_s15 + $0x468] ss:$16 sps:$4 sm:$0xff]  }
  0x7d   : > { %1420 = vmatpush1.bf16.msra.mxu0 %v2394_v34  ;;  %v2493_v34 = vld [vmem:[%s2631_s15 + $0x34c] ss:$16 sps:$4 sm:$0xff]  }
  0x7e   : > { %1463 = vmatpush1.bf16.msra.mxu1 %v2397_v35  ;;  %1421 = vmatprep.subr.bf16.mxu0 %v2402_v36  ;;  %v2496_v35 = vld [vmem:[%s2631_s15 + $0x44c] ss:$16 sps:$4 sm:$0xff]   ;;  %v2491_v36 = vld [vmem:[%s2631_s15 + $0x348] ss:$16 sps:$4 sm:$0xff]  }
  0x7f   : > { %1464 = vmatprep.subr.bf16.mxu1 %v2405_v37  ;;  %v2494_v37 = vld [vmem:[%s2631_s15 + $0x448] ss:$16 sps:$4 sm:$0xff]  }
  0x81   : > { %1422 = vmatpush1.bf16.msra.mxu0 %v2400_v38  ;;  %v2499_v38 = vld [vmem:[%s2631_s15 + $0x32c] ss:$16 sps:$4 sm:$0xff]  }
  0x82   : > { %1465 = vmatpush1.bf16.msra.mxu1 %v2403_v39  ;;  %1423 = vmatprep.subr.bf16.mxu0 %v2408_v40  ;;  %v2502_v39 = vld [vmem:[%s2631_s15 + $0x42c] ss:$16 sps:$4 sm:$0xff]   ;;  %v2497_v40 = vld [vmem:[%s2631_s15 + $0x328] ss:$16 sps:$4 sm:$0xff]  }
  0x83   : > { %1466 = vmatprep.subr.bf16.mxu1 %v2411_v41  ;;  %v2500_v41 = vld [vmem:[%s2631_s15 + $0x428] ss:$16 sps:$4 sm:$0xff]  }
  0x85   : > { %1424 = vmatpush1.bf16.msra.mxu0 %v2406_v42  ;;  %v2505_v42 = vld [vmem:[%s2631_s15 + $0x30c] ss:$16 sps:$4 sm:$0xff]  }
  0x86   : > { %1467 = vmatpush1.bf16.msra.mxu1 %v2409_v43  ;;  %1495 = vmatprep.subr.bf16.mxu0 %v2418_v45  ;;  %v2508_v43 = vld [vmem:[%s2631_s15 + $0x40c] ss:$16 sps:$4 sm:$0xff]   ;;  %v2506_v45 = vld [vmem:[%s2631_s15 + $0x408] ss:$16 sps:$4 sm:$0xff]  }
  0x87   : > { %1468 = vmatprep.subr.bf16.mxu1 %v2415_v44  ;;  %v2503_v44 = vld [vmem:[%s2631_s15 + $0x308] ss:$16 sps:$4 sm:$0xff]  }
  0x88   : > { %1442 = vmatmul.mubr.bf16.vlgmr.msra.gmra.mxu0 %v2749_v46 }
  0x89   : > { %1496 = vmatpush1.bf16.msra.mxu0 %v2416_v48  ;;  %1527 = vmatprep.mubr.bf16.mxu0 %v2688_v58  ;;  %v2439_v58 = vld [vmem:[%s2631_s15 + $0x16c] ss:$16 sps:$4 sm:$0xff]  }
  0x8a   : > { %1469 = vmatpush2.bf16.msra.mxu1 %v2413_v47  ;;  %1497 = vmatprep.subr.bf16.mxu0 %v2424_v50 }
  0x8b   : > { %1470 = vmatprep.subr.bf16.mxu1 %v2421_v49 }
  0x8d   : > { %1498 = vmatpush1.bf16.msra.mxu0 %v2422_v52 }
  0x8e   : > { %1471 = vmatpush2.bf16.msra.mxu1 %v2419_v51  ;;  %1499 = vmatprep.subr.bf16.mxu0 %v2430_v54 }
  0x8f   : > { %1472 = vmatprep.subr.bf16.mxu1 %v2427_v53 }
  0x91   : > { %1500 = vmatpush1.bf16.msra.mxu0 %v2428_v56 }
  0x92   : > { %1473 = vmatpush2.bf16.msra.mxu1 %v2425_v55  ;;  %1501 = vmatprep.subr.bf16.mxu0 %v2436_v59  ;;  %v323_v55 = vld [vmem:[#allocation2 + $0x30] sm:$0xff] }
  0x93   : > { %1474 = vmatprep.subr.bf16.mxu1 %v2433_v57 }
  0x95   : > { %1502 = vmatpush1.bf16.msra.mxu0 %v2434_v61  ;;  %v324_v61 = vld [vmem:[#allocation2] sm:$0xff] }
  0x96   : > { %1475 = vmatpush2.bf16.msra.mxu1 %v2431_v60  ;;  %1503 = vmatprep.subr.bf16.mxu0 %v2442_v62 }
  0x97   : > { %1476 = vmatprep.subr.bf16.mxu1 %v2439_v58 }
  0x99   : > { %1504 = vmatpush1.bf16.msra.mxu0 %v2440_v0  ;;  %v327_v0 = vld [vmem:[#allocation2 + $0x8] sm:$0xff] }
  0x9a   : > { %1477 = vmatpush2.bf16.msra.mxu1 %v2437_v63  ;;  %1505 = vmatprep.subr.bf16.mxu0 %v2448_v2 }
  0x9b   : > { %1478 = vmatprep.subr.bf16.mxu1 %v2445_v1 }
  0x9d   : > { %1506 = vmatpush1.bf16.msra.mxu0 %v2446_v4  ;;  %v328_v4 = vld [vmem:[#allocation2 + $0x20] sm:$0xff] }
  0x9e   : > { %1479 = vmatpush2.bf16.msra.mxu1 %v2443_v3  ;;  %1507 = vmatprep.subr.bf16.mxu0 %v2454_v6 }
  0x9f   : > { %1480 = vmatprep.subr.bf16.mxu1 %v2451_v5 }
  0xa1   : > { %1508 = vmatpush1.bf16.msra.mxu0 %v2452_v8 }
  0xa2   : > { %1481 = vmatpush2.bf16.msra.mxu1 %v2449_v7  ;;  %1509 = vmatprep.subr.bf16.mxu0 %v2460_v10 }
  0xa3   : > { %1482 = vmatprep.subr.bf16.mxu1 %v2457_v9 }
  0xa5   : > { %1510 = vmatpush1.bf16.msra.mxu0 %v2458_v14 }
  0xa6   : > { %1483 = vmatpush2.bf16.msra.mxu1 %v2455_v13  ;;  %1511 = vmatprep.subr.bf16.mxu0 %v2463_v15 }
  0xa7   : > { %1538 = vmatprep.subr.bf16.mxu1 %v2466_v16 }
  0xa9   : > { %1485 = vmatmul.mubr.bf16.vlgmr.msra.gmra.mxu1 %v2708_v11  ;;  %1512 = vmatpush2.bf16.msra.mxu0 %v2461_v17  ;;  %v2476_v11 = vld [vmem:[%s2631_s15 + $0x4a8] ss:$16 sps:$4 sm:$0xff]  }
  0xaa   : > { %1539 = vmatpush1.bf16.msra.mxu1 %v2464_v18  ;;  %1513 = vmatprep.subr.bf16.mxu0 %v2469_v19  ;;  %v325_v18 = vld [vmem:[#allocation2 + $0x18] sm:$0xff] }
  0xab   : > { %1540 = vmatprep.subr.bf16.mxu1 %v2472_v20  ;;  %1570 = vmatprep.mubr.bf16.mxu1 %v2550_v21  ;;  %v2487_v21 = vld [vmem:[%s2631_s15 + $0x36c] ss:$16 sps:$4 sm:$0xff]  }
  0xad   : > { %1514 = vmatpush2.bf16.msra.mxu0 %v2467_v22 }
  0xae   : > { %1541 = vmatpush1.bf16.msra.mxu1 %v2470_v23  ;;  %1515 = vmatprep.subr.bf16.mxu0 %v2475_v24  ;;  %v326_v24 = vld [vmem:[#allocation2 + $0x10] sm:$0xff] }
  0xaf   : > { %1542 = vmatprep.subr.bf16.mxu1 %v2478_v25 }
  0xb1   : > { %1516 = vmatpush2.bf16.msra.mxu0 %v2473_v26 }
  0xb2   : > { %1543 = vmatpush1.bf16.msra.mxu1 %v2476_v11  ;;  %1517 = vmatprep.subr.bf16.mxu0 %v2481_v27 }
  0xb3   : > { %1544 = vmatprep.subr.bf16.mxu1 %v2484_v28 }
  0xb5   : > { %1518 = vmatpush2.bf16.msra.mxu0 %v2479_v29  ;;  %v329_v29 = vld [vmem:[#allocation2 + $0x28] sm:$0xff] }
  0xb6   : > { %1545 = vmatpush1.bf16.msra.mxu1 %v2482_v30  ;;  %1519 = vmatprep.subr.bf16.mxu0 %v2487_v21 }
  0xb7   : > { %1546 = vmatprep.subr.bf16.mxu1 %v2490_v31 }
  0xb9   : > { %1520 = vmatpush2.bf16.msra.mxu0 %v2485_v32 }
  0xba   : > { %1547 = vmatpush1.bf16.msra.mxu1 %v2488_v33  ;;  %1521 = vmatprep.subr.bf16.mxu0 %v2493_v34  ;;  %v330_v33 = vld [vmem:[#allocation2 + $0x38] sm:$0xff] }
  0xbb   : > { %1548 = vmatprep.subr.bf16.mxu1 %v2496_v35 }
  0xbd   : > { %1522 = vmatpush2.bf16.msra.mxu0 %v2491_v36 }
  0xbe   : > { %1549 = vmatpush1.bf16.msra.mxu1 %v2494_v37  ;;  %1523 = vmatprep.subr.bf16.mxu0 %v2499_v38 }
  0xbf   : > { %1550 = vmatprep.subr.bf16.mxu1 %v2502_v39 }
  0xc1   : > { %1524 = vmatpush2.bf16.msra.mxu0 %v2497_v40 }
  0xc2   : > { %1551 = vmatpush1.bf16.msra.mxu1 %v2500_v41  ;;  %1525 = vmatprep.subr.bf16.mxu0 %v2505_v42 }
  0xc3   : > { %1552 = vmatprep.subr.bf16.mxu1 %v2508_v43 }
  0xc5   : > { %1526 = vmatpush2.bf16.msra.mxu0 %v2503_v44 }
  0xc6   : > { %1553 = vmatpush1.bf16.msra.mxu1 %v2506_v45 }
  0xc8   : > { %1528 = vmatmul.mubr.bf16.vlgmr.msra.gmra.mxu0 %v2711_v12 }
  0xc9   : > { %1571 = vmatmul.mubr.bf16.vlgmr.msra.gmra.mxu1 %v2749_v46 }
 0x128   : > { %v1357_v47 = vpop.f32.mrf.mxu0 }
 0x129   : > { %v1400_v48 = vpop.f32.mrf.mxu1 }
 0x12a   : > { %v1359_v49 = vpop.f32.mrf.mxu0  ;;  %v1401_v54 = vadd.f32 %v1400_v48, %v1357_v47 }
 0x12b   : > { %v1402_v50 = vpop.f32.mrf.mxu1 }
 0x12c   : > { %v1361_v51 = vpop.f32.mrf.mxu0  ;;  %v1403_v57 = vadd.f32 %v1402_v50, %v1359_v49 }
 0x12d   : > { %v1404_v52 = vpop.f32.mrf.mxu1 }
 0x12e   : > { %v1363_v53 = vpop.f32.mrf.mxu0  ;;  %v1405_v62 = vadd.f32 %v1404_v52, %v1361_v51 }
 0x12f   : > { %v1406_v60 = vpop.f32.mrf.mxu1 }
 0x130   : > { %v1407_v1 = vadd.f32 %v1406_v60, %v1363_v53 }
 0x148   : > { %v1443_v56 = vpop.f32.mrf.mxu0 }
 0x149   : > { %v1444_v59 = vadd.f32 %v1443_v56, %v1401_v54 }
 0x14a   : > { %v1445_v58 = vpop.f32.mrf.mxu0 }
 0x14b   : > { %v1581_v63 = vadd.f32 %v1444_v59, %v323_v55  ;;  %v1446_v12 = vadd.f32 %v1445_v58, %v1403_v57 }
 0x14c   : > { %v1447_v46 = vpop.f32.mrf.mxu0 }
 0x14d   : > { %1589 = vst [vmem:[#allocation2 + $0x30] sm:$0xff] %v1581_v63  ;;  %v1582_v2 = vadd.f32 %v1446_v12, %v324_v61  ;;  %v1448_v3 = vadd.f32 %v1447_v46, %v1405_v62 }
 0x14e   : > { %v1449_v5 = vpop.f32.mrf.mxu0 }
 0x14f   : > { %1590 = vst [vmem:[#allocation2] sm:$0xff] %v1582_v2  ;;  %v1585_v6 = vadd.f32 %v1448_v3, %v327_v0  ;;  %v1450_v7 = vadd.f32 %v1449_v5, %v1407_v1 }
 0x151   : > { %1593 = vst [vmem:[#allocation2 + $0x8] sm:$0xff] %v1585_v6  ;;  %v1586_v8 = vadd.f32 %v1450_v7, %v328_v4 }
 0x153   : > { %1594 = vst [vmem:[#allocation2 + $0x20] sm:$0xff] %v1586_v8 }
 0x169   : > { %v1486_v9 = vpop.f32.mrf.mxu1 }
 0x16b   : > { %v1488_v10 = vpop.f32.mrf.mxu1 }
 0x16d   : > { %v1490_v13 = vpop.f32.mrf.mxu1 }
 0x16f   : > { %v1492_v14 = vpop.f32.mrf.mxu1 }
 0x188   : > { %v1529_v15 = vpop.f32.mrf.mxu0 }
 0x189   : > { %v1572_v16 = vpop.f32.mrf.mxu1  ;;  %v1530_v17 = vadd.f32 %v1529_v15, %v1486_v9 }
 0x18a   : > { %v1531_v19 = vpop.f32.mrf.mxu0 }
 0x18b   : > { %v1574_v20 = vpop.f32.mrf.mxu1  ;;  %v1573_v22 = vadd.f32 %v1572_v16, %v1530_v17  ;;  %v1532_v23 = vadd.f32 %v1531_v19, %v1488_v10 }
 0x18c   : > { %v1533_v25 = vpop.f32.mrf.mxu0 }
 0x18d   : > { %v1576_v26 = vpop.f32.mrf.mxu1  ;;  %v1583_v11 = vadd.f32 %v1573_v22, %v325_v18  ;;  %v1575_v27 = vadd.f32 %v1574_v20, %v1532_v23  ;;  %v1534_v28 = vadd.f32 %v1533_v25, %v1490_v13 }
 0x18e   : > { %v1535_v30 = vpop.f32.mrf.mxu0 }
 0x18f   : > { %1591 = vst [vmem:[#allocation2 + $0x18] sm:$0xff] %v1583_v11  ;;  %v1584_v21 = vadd.f32 %v1575_v27, %v326_v24  ;;  %v1577_v31 = vadd.f32 %v1576_v26, %v1534_v28  ;;  %v1536_v32 = vadd.f32 %v1535_v30, %v1492_v14  ;;  %v1578_v34 = vpop.f32.mrf.mxu1 }
 0x191   : > { %1592 = vst [vmem:[#allocation2 + $0x10] sm:$0xff] %v1584_v21  ;;  %v1587_v35 = vadd.f32 %v1577_v31, %v329_v29  ;;  %v1579_v36 = vadd.f32 %v1578_v34, %v1536_v32  ;;  %1600 = sbr.rel (%p2134_p11) target bundleno = 647 (0x287), region = 74 }
 0x193   : > { %1595 = vst [vmem:[#allocation2 + $0x28] sm:$0xff] %v1587_v35  ;;  %v1588_v37 = vadd.f32 %v1579_v36, %v330_v33 }
 0x195   : > { %1596 = vst [vmem:[#allocation2 + $0x38] sm:$0xff] %v1588_v37 }
 0x196   : > { %v1678_v38 = vld [vmem:[%s3042_s3 + $0xf8] sm:$0xff]  ;;  %v1677_v42 = vld [vmem:[%s3042_s3 + $0xf0] sm:$0xff]  ;;  %v1676_v47 = vld [vmem:[%s3042_s3 + $0xe8] sm:$0xff]  ;;  %v1611_v0 = vlaneseq }
 0x197   : > { %v1710_v39 = vld [vmem:[%s3042_s3 + $0x1f8] sm:$0xff]  ;;  %2142 = vmatprep.subr.mxu0 %v1678_v38  ;;  %v1709_v43 = vld [vmem:[%s3042_s3 + $0x1f0] sm:$0xff]  ;;  %v1708_v48 = vld [vmem:[%s3042_s3 + $0x1e8] sm:$0xff] }
 0x198   : > { %v1662_v40 = vld [vmem:[%s3042_s3 + $0x78] sm:$0xff]  ;;  %2180 = vmatprep.subr.mxu1 %v1710_v39  ;;  %v1661_v44 = vld [vmem:[%s3042_s3 + $0x70] sm:$0xff]  ;;  %v1660_v49 = vld [vmem:[%s3042_s3 + $0x68] sm:$0xff]  ;;  %v1612_v8 = vshrl.u32 %v1611_v0, 7 }
 0x199   : > { %v1694_v41 = vld [vmem:[%s3042_s3 + $0x178] sm:$0xff]  ;;  %2143 = vmatpush3.msra.mxu0 %v1662_v40  ;;  %v1693_v45 = vld [vmem:[%s3042_s3 + $0x170] sm:$0xff]  ;;  %v1692_v50 = vld [vmem:[%s3042_s3 + $0x168] sm:$0xff] }
 0x19a   : > { %2181 = vmatpush3.msra.mxu1 %v1694_v41  ;;  %2144 = vmatprep.subr.mxu0 %v1677_v42  ;;  %v1675_v51 = vld [vmem:[%s3042_s3 + $0xe0] sm:$0xff]  ;;  %v1674_v55 = vld [vmem:[%s3042_s3 + $0xd8] sm:$0xff]  ;;  %v1673_v60 = vld [vmem:[%s3042_s3 + $0xd0] sm:$0xff]  ;;  %v1617_v20 = vsub.s32 1, %v1612_v8  ;;  %v1625_v22 = vsub.s32 3, %v1612_v8  ;;  %v1613_v23 = vsub.s32 0, %v1612_v8 }
 0x19b   : > { %2182 = vmatprep.subr.mxu1 %v1709_v43  ;;  %2145 = vmatpush3.msra.mxu0 %v1661_v44  ;;  %v1707_v52 = vld [vmem:[%s3042_s3 + $0x1e0] sm:$0xff]  ;;  %v1706_v56 = vld [vmem:[%s3042_s3 + $0x1d8] sm:$0xff]  ;;  %v1705_v61 = vld [vmem:[%s3042_s3 + $0x1d0] sm:$0xff]  ;;  %v1621_v11 = vsub.s32 2, %v1612_v8 }
 0x19c   : > { %2183 = vmatpush3.msra.mxu1 %v1693_v45  ;;  %2146 = vmatprep.subr.mxu0 %v1676_v47  ;;  %v1659_v53 = vld [vmem:[%s3042_s3 + $0x60] sm:$0xff]  ;;  %v1658_v57 = vld [vmem:[%s3042_s3 + $0x58] sm:$0xff]  ;;  %v1657_v58 = vld [vmem:[%s3042_s3 + $0x50] sm:$0xff] }
 0x19d   : > { %2184 = vmatprep.subr.mxu1 %v1708_v48  ;;  %v1691_v54 = vld [vmem:[%s3042_s3 + $0x160] sm:$0xff]  ;;  %2147 = vmatpush3.msra.mxu0 %v1660_v49  ;;  %v1690_v59 = vld [vmem:[%s3042_s3 + $0x158] sm:$0xff]  ;;  %v1689_v62 = vld [vmem:[%s3042_s3 + $0x150] sm:$0xff] }
 0x19e   : > { %2185 = vmatpush3.msra.mxu1 %v1692_v50  ;;  %2148 = vmatprep.subr.mxu0 %v1675_v51  ;;  %v1672_v63 = vld [vmem:[%s3042_s3 + $0xc8] sm:$0xff]  ;;  %v1671_v2 = vld [vmem:[%s3042_s3 + $0xc0] sm:$0xff]  ;;  %v1670_v6 = vld [vmem:[%s3042_s3 + $0xb8] sm:$0xff] }
 0x19f   : > { %2186 = vmatprep.subr.mxu1 %v1707_v52  ;;  %2149 = vmatpush3.msra.mxu0 %v1659_v53  ;;  %v1704_v12 = vld [vmem:[%s3042_s3 + $0x1c8] sm:$0xff]  ;;  %v1703_v3 = vld [vmem:[%s3042_s3 + $0x1c0] sm:$0xff]  ;;  %v1702_v7 = vld [vmem:[%s3042_s3 + $0x1b8] sm:$0xff] }
 0x1a0   : > { %2187 = vmatpush3.msra.mxu1 %v1691_v54  ;;  %2150 = vmatprep.subr.mxu0 %v1674_v55  ;;  %v1656_v46 = vld [vmem:[%s3042_s3 + $0x48] sm:$0xff]  ;;  %v1655_v4 = vld [vmem:[%s3042_s3 + $0x40] sm:$0xff]  ;;  %v1654_v9 = vld [vmem:[%s3042_s3 + $0x38] sm:$0xff] }
 0x1a1   : > { %2188 = vmatprep.subr.mxu1 %v1706_v56  ;;  %2151 = vmatpush3.msra.mxu0 %v1658_v57  ;;  %v1688_v1 = vld [vmem:[%s3042_s3 + $0x148] sm:$0xff]  ;;  %v1687_v5 = vld [vmem:[%s3042_s3 + $0x140] sm:$0xff]  ;;  %v1686_v10 = vld [vmem:[%s3042_s3 + $0x138] sm:$0xff] }
 0x1a2   : > { %2189 = vmatpush3.msra.mxu1 %v1690_v59  ;;  %2152 = vmatprep.subr.mxu0 %v1673_v60  ;;  %v1669_v13 = vld [vmem:[%s3042_s3 + $0xb0] sm:$0xff]  ;;  %v1668_v17 = vld [vmem:[%s3042_s3 + $0xa8] sm:$0xff]  ;;  %v1667_v25 = vld [vmem:[%s3042_s3 + $0xa0] sm:$0xff] }
 0x1a3   : > { %2190 = vmatprep.subr.mxu1 %v1705_v61  ;;  %2153 = vmatpush3.msra.mxu0 %v1657_v58  ;;  %v1701_v14 = vld [vmem:[%s3042_s3 + $0x1b0] sm:$0xff]  ;;  %v1700_v18 = vld [vmem:[%s3042_s3 + $0x1a8] sm:$0xff]  ;;  %v1699_v26 = vld [vmem:[%s3042_s3 + $0x1a0] sm:$0xff] }
 0x1a4   : > { %2191 = vmatpush3.msra.mxu1 %v1689_v62  ;;  %2154 = vmatprep.subr.mxu0 %v1672_v63  ;;  %v1653_v15 = vld [vmem:[%s3042_s3 + $0x30] sm:$0xff]  ;;  %v1652_v19 = vld [vmem:[%s3042_s3 + $0x28] sm:$0xff]  ;;  %v1651_v27 = vld [vmem:[%s3042_s3 + $0x20] sm:$0xff] }
 0x1a5   : > { %2192 = vmatprep.subr.mxu1 %v1704_v12  ;;  %2155 = vmatpush3.msra.mxu0 %v1656_v46  ;;  %v1685_v16 = vld [vmem:[%s3042_s3 + $0x130] sm:$0xff]  ;;  %v1684_v24 = vld [vmem:[%s3042_s3 + $0x128] sm:$0xff]  ;;  %v1683_v28 = vld [vmem:[%s3042_s3 + $0x120] sm:$0xff] }
 0x1a6   : > { %2193 = vmatpush3.msra.mxu1 %v1688_v1  ;;  %2156 = vmatprep.subr.mxu0 %v1671_v2  ;;  %v1666_v29 = vld [vmem:[%s3042_s3 + $0x98] sm:$0xff]  ;;  %v1602_v21 = vld [vmem:[#allocation2] sm:$0xff]  ;;  %v1604_v35 = vld [vmem:[#allocation2 + $0x10] sm:$0xff] }
 0x1a7   : > { %2194 = vmatprep.subr.mxu1 %v1703_v3  ;;  %2157 = vmatpush3.msra.mxu0 %v1655_v4  ;;  %v1698_v30 = vld [vmem:[%s3042_s3 + $0x198] sm:$0xff]  ;;  %v1609_v31 = vld [vmem:[%s3041_s2] sm:$0xf]  ;;  %v1665_v38 = vld [vmem:[%s3042_s3 + $0x90] sm:$0xff] }
 0x1a8   : > { %2195 = vmatpush3.msra.mxu1 %v1687_v5  ;;  %2158 = vmatprep.subr.mxu0 %v1670_v6  ;;  %v1650_v32 = vld [vmem:[%s3042_s3 + $0x18] sm:$0xff]  ;;  %v1618_v34 = vrot.slane %v1609_v31, %v1617_v20  ;;  %v1626_v36 = vrot.slane %v1609_v31, %v1625_v22  ;;  %v1614_v37 = vrot.slane %v1609_v31, %v1613_v23  ;;  %v1601_v39 = vld [vmem:[#allocation2 + $0x30] sm:$0xff]  ;;  %v1606_v44 = vld [vmem:[#allocation2 + $0x20] sm:$0xff] }
 0x1a9   : > { %2196 = vmatprep.subr.mxu1 %v1702_v7  ;;  %2159 = vmatpush3.msra.mxu0 %v1654_v9  ;;  %v1682_v33 = vld [vmem:[%s3042_s3 + $0x118] sm:$0xff]  ;;  %v1622_v41 = vrot.slane %v1609_v31, %v1621_v11  ;;  %v1697_v42 = vld [vmem:[%s3042_s3 + $0x190] sm:$0xff]  ;;  %v1664_v50 = vld [vmem:[%s3042_s3 + $0x88] sm:$0xff] }
 0x1aa   : > { %2197 = vmatpush3.msra.mxu1 %v1686_v10  ;;  %2160 = vmatprep.subr.mxu0 %v1669_v13  ;;  %v1603_v40 = vld [vmem:[#allocation2 + $0x18] sm:$0xff]  ;;  %v1632_v43 = vadd.f32 %v1618_v34, %v1602_v21  ;;  %v1649_v47 = vld [vmem:[%s3042_s3 + $0x10] sm:$0xff]  ;;  %v1634_v49 = vadd.f32 %v1626_v36, %v1604_v35  ;;  %v1696_v51 = vld [vmem:[%s3042_s3 + $0x188] sm:$0xff]  ;;  %v1631_v53 = vadd.f32 %v1614_v37, %v1601_v39 }
 0x1ab   : > { %2198 = vmatprep.subr.mxu1 %v1701_v14  ;;  %2161 = vmatpush3.msra.mxu0 %v1653_v15  ;;  %v1608_v45 = vld [vmem:[#allocation2 + $0x38] sm:$0xff]  ;;  %v1681_v48 = vld [vmem:[%s3042_s3 + $0x110] sm:$0xff]  ;;  %v1648_v52 = vld [vmem:[%s3042_s3 + $0x8] sm:$0xff]  ;;  %v1633_v54 = vadd.f32 %v1622_v41, %v1603_v40  ;;  %v1636_v56 = vadd.f32 %v1618_v34, %v1606_v44 }
 0x1ac   : > { %2199 = vmatpush3.msra.mxu1 %v1685_v16  ;;  %2162 = vmatprep.subr.mxu0 %v1668_v17  ;;  %v1680_v55 = vld [vmem:[%s3042_s3 + $0x108] sm:$0xff]  ;;  %v1638_v57 = vadd.f32 %v1626_v36, %v1608_v45  ;;  %v1663_v61 = vld [vmem:[%s3042_s3 + $0x80] sm:$0xff]  ;;  %v1640_v62 = vmax.f32 %v1632_v43, 0.0  ;;  %v1642_v12 = vmax.f32 %v1634_v49, 0.0  ;;  %v1639_v46 = vmax.f32 %v1631_v53, 0.0 }
 0x1ad   : > { %2200 = vmatprep.subr.mxu1 %v1700_v18  ;;  %2163 = vmatpush3.msra.mxu0 %v1652_v19  ;;  %v1605_v59 = vld [vmem:[#allocation2 + $0x8] sm:$0xff]  ;;  %v1695_v58 = vld [vmem:[%s3042_s3 + $0x180] sm:$0xff]  ;;  %v1641_v1 = vmax.f32 %v1633_v54, 0.0  ;;  %v1644_v4 = vmax.f32 %v1636_v56, 0.0 }
 0x1ae   : > { %2201 = vmatpush3.msra.mxu1 %v1684_v24  ;;  %2164 = vmatprep.subr.mxu0 %v1667_v25  ;;  %v1607_v60 = vld [vmem:[#allocation2 + $0x28] sm:$0xff]  ;;  %v1647_v63 = vld [vmem:[%s3042_s3] sm:$0xff]  ;;  %v1635_v2 = vadd.f32 %v1614_v37, %v1605_v59  ;;  %v1646_v5 = vmax.f32 %v1638_v57, 0.0 }
 0x1af   : > { %2202 = vmatprep.subr.mxu1 %v1699_v26  ;;  %2165 = vmatpush3.msra.mxu0 %v1651_v27  ;;  %v1679_v0 = vld [vmem:[%s3042_s3 + $0x100] sm:$0xff]  ;;  %v1637_v3 = vadd.f32 %v1622_v41, %v1607_v60 }
 0x1b0   : > { %2203 = vmatpush3.msra.mxu1 %v1683_v28  ;;  %2166 = vmatprep.subr.mxu0 %v1666_v29  ;;  %v1643_v6 = vmax.f32 %v1635_v2, 0.0  ;;  %v2135_v10 = vld [vmem:[%s3043_s4] ss:$0 sm:$0xff] }
 0x1b1   : > { %2204 = vmatprep.subr.mxu1 %v1698_v30  ;;  %2167 = vmatpush3.msra.mxu0 %v1650_v32  ;;  %v1645_v7 = vmax.f32 %v1637_v3, 0.0 }
 0x1b2   : > { %2205 = vmatpush3.msra.mxu1 %v1682_v33  ;;  %2168 = vmatprep.subr.mxu0 %v1665_v38 }
 0x1b3   : > { %2206 = vmatprep.subr.mxu1 %v1697_v42  ;;  %2169 = vmatpush3.msra.mxu0 %v1649_v47 }
 0x1b4   : > { %2207 = vmatpush3.msra.mxu1 %v1681_v48  ;;  %2170 = vmatprep.subr.mxu0 %v1664_v50 }
 0x1b5   : > { %2208 = vmatprep.subr.mxu1 %v1696_v51  ;;  %2171 = vmatpush3.msra.mxu0 %v1648_v52 }
 0x1b6   : > { %2209 = vmatpush3.msra.mxu1 %v1680_v55  ;;  %2172 = vmatprep.subr.mxu0 %v1663_v61 }
 0x1b7   : > { %2210 = vmatprep.subr.mxu1 %v1695_v58  ;;  %2173 = vmatpush3.msra.mxu0 %v1647_v63 }
 0x1b8   : > { %1782 = vmatprep.mubr.f32.mxu0 %v1640_v62  ;;  %2211 = vmatpush3.msra.mxu1 %v1679_v0 }
 0x1b9   : > { %1857 = vmatprep.mubr.f32.mxu1 %v1642_v12  ;;  %1783 = vmatmul.mubr.f32.vlgmr.msra.gmra.mxu0 %v1639_v46 }
 0x1ba   : > { %1858 = vmatmul.mubr.f32.vlgmr.msra.gmra.mxu1 %v1641_v1  ;;  %1787 = vmatprep.mubr.f32.mxu0 %v1644_v4 }
 0x1bb   : > { %1862 = vmatprep.mubr.f32.mxu1 %v1646_v5 }
 0x1bd   : > { %1788 = vmatmul.mubr.f32.gmra.mxu0 %v1643_v6 }
 0x1be   : > { %1863 = vmatmul.mubr.f32.gmra.mxu1 %v1645_v7 }
 0x279   : > { %v2174_v8 = vpop.f32.mrf.mxu0 }
 0x27a   : > { %v2212_v9 = vpop.f32.mrf.mxu1 }
 0x27b   : > { %v2175_v13 = vpop.f32.mrf.mxu0 }
 0x27c   : > { %v2213_v14 = vpop.f32.mrf.mxu1  ;;  %v2176_v15 = vadd.f32 %v2175_v13, %v2174_v8 }
 0x27d   : > { %v2177_v16 = vpop.f32.mrf.mxu0  ;;  %v2214_v19 = vadd.f32 %v2213_v14, %v2212_v9 }
 0x27e   : > { %v2215_v17 = vpop.f32.mrf.mxu1  ;;  %v1785_v18 = vadd.f32 %v2176_v15, %v2135_v10 }
 0x27f   : > { %v2178_v20 = vpop.f32.mrf.mxu0 }
 0x280   : > { %v2216_v22 = vpop.f32.mrf.mxu1  ;;  %v1860_v23 = vadd.f32 %v2214_v19, %v1785_v18  ;;  %v2179_v24 = vadd.f32 %v2178_v20, %v2177_v16 }
 0x281   : > { %v2217_v26 = vadd.f32 %v2216_v22, %v2215_v17 }
 0x282   : > { %1868 = vst [vmem:[%s3044_s5] sm:$0xff] %v1860_v23  ;;  %v1790_v25 = vadd.f32 %v2179_v24, %v2135_v10 }
 0x284   : > { %v1865_v11 = vadd.f32 %v2217_v26, %v1790_v25 }
 0x286   : > { %1869 = vst [vmem:[%s3044_s5 + $0x8] sm:$0xff] %v1865_v11 }
 0x287 PF: > { %s15_s22 = sadd.s32 1, %s2547_s22   ;;  %s3045_s18 = smov %s2535_s19 }
 0x288   : > { %p12_p12 = scmp.ge.s32.totalorder %s15_s22, 7   ;;  %s3046_s19 = smov %s2616_s26 }
 0x289   : > { %s3047_s20 = smov %s2543_s21  ;;  %s3048_s21 = smov %s3050_s23 }
 0x28a   :  { %14 = sbr.rel (!%p12_p12) target bundleno = 3 (0x3), region = 118 }

</bundles_post_ra>
